<compile_context>
chip_gen: v7x
topology: tpu7x:2x2x1
jax: 0.10.0
libtpu: 0.0.40
codegen_flags: <defaults>
</compile_context>

<pallas_src>
import jax
import jax.numpy as jnp
from jax import lax
from jax.experimental import pallas as pl
from jax.experimental.pallas import tpu as pltpu

INPUT_SIZE = 16
HIDDEN_SIZE = 32
OUTPUT_SIZE = 8
L1 = 50                       # hidden width of layer 1 in each branch
L2 = 15                       # hidden width of layer 2 in each branch
FUSED_L1 = 2 * L1             # 100 (both branches side by side)
FUSED_L2 = 2 * L2             # 30

# 128-lane activation / output slab layout (lane-dense stores, single layer-1 dot):
#   [ hidden (32) | output (8) | x staging (16) | zeros (72) ]
OUT_SLAB = 128
HID_LO, HID_HI = 0, HIDDEN_SIZE                          # [0, 32)
OUT_LO, OUT_HI = HIDDEN_SIZE, HIDDEN_SIZE + OUTPUT_SIZE  # [32, 40)
X_LO, X_HI = OUT_HI, OUT_HI + INPUT_SIZE                 # [40, 56)


def _softsign(x):
    # Exact Softsign x / (1 + |x|).  The divide sits on the EUP, which has
    # spare slots here; exactness matters because error compounds through the
    # recurrent hidden path.
    return x / (1.0 + jnp.abs(x))


def _pick_batch_block(batch):
    assert batch % 8 == 0, "batch must be a multiple of the fp32 sublane width (8)"
    # Prefer >=2 batch blocks so the 'parallel' grid axis can be sharded across
    # both v7x TensorCores, while keeping each block as tall as possible
    # (matmul latency is ~flat in M up to the 128-row MXU height).
    bb = min(128, batch // 2) if batch >= 16 else batch
    bb -= bb % 8
    return max(8, bb)


def _pick_t_chunk(T):
    # Whole sequence in one grid step when T is small; otherwise chunk so the
    # unrolled time loop and per-chunk x/out blocks stay reasonable.
    for cand in (32, 16, 8, 4, 2, 1):
        if cand <= T and T % cand == 0:
            return cand
    return T


def rnn_seq_kernel(x_ref, h0_ref,
                   w1_ref, b1_ref, w2_ref, b2_ref, w3_ref, b3_ref,
                   out_ref, carry_ref):
    tc = pl.program_id(1)
    t_chunk, bb, _ = x_ref.shape

    # Start of this batch block's time loop: seed the carry slab with h0.
    # NOTE: correctness of this init relies on the time axis being the
    # innermost, sequentially iterated ("arbitrary") grid axis.
    @pl.when(tc == 0)
    def _():
        carry_ref[...] = h0_ref[...]

    # Weights / biases are VMEM-resident (constant index maps).  Load them and
    # hoist the (1,N)->(bb,N) bias broadcasts out of the time loop (JAX does
    # not CSE broadcast_in_dim; leaving them inside would emit them T times).
    w1 = w1_ref[...]                                     # (OUT_SLAB, FUSED_L1)
    w2 = w2_ref[...]                                     # (FUSED_L1, FUSED_L2)
    w3 = w3_ref[...]                                     # (FUSED_L2, OUT_SLAB)
    b1 = jnp.broadcast_to(b1_ref[...], (bb, FUSED_L1))
    b2 = jnp.broadcast_to(b2_ref[...], (bb, FUSED_L2))
    b3 = jnp.broadcast_to(b3_ref[...], (bb, OUT_SLAB))

    def step(t, carry):
        # carry = [h_{t-1} | out_{t-1} | 0 | 0], x slab = [0 | 0 | x_t | 0]
        # -> combined = [h_{t-1} | out_{t-1} | x_t | 0]; W1 rows for the
        # out_{t-1} lanes are zero, so only x and h contribute.
        combined = carry + x_ref[t]                      # (bb, OUT_SLAB)
        z = jnp.dot(combined, w1, preferred_element_type=jnp.float32) + b1
        z = _softsign(z)
        z = jnp.dot(z, w2, preferred_element_type=jnp.float32) + b2
        z = _softsign(z)
        z = jnp.dot(z, w3, preferred_element_type=jnp.float32) + b3
        out_ref[t] = z                                   # full 128-lane store
        return z                                         # next carry

    carry_ref[...] = lax.fori_loop(0, t_chunk, step, carry_ref[...], unroll=True)


def rnn_forward_seq(xs, h0, fused_params):
    """Run the RNN cell over a whole sequence inside one pallas_call.

    xs: (T, B, INPUT_SIZE), h0: (B, HIDDEN_SIZE).
    Returns (outputs (T, B, OUTPUT_SIZE), hiddens (T, B, HIDDEN_SIZE)),
    i.e. the per-step (output, hidden) pairs of the original module's forward().
    """
    w1, b1, w2, b2, w3, b3 = fused_params
    T, B, _ = xs.shape
    bb = _pick_batch_block(B)
    t_chunk = _pick_t_chunk(T)
    nb = B // bb
    nt = T // t_chunk

    # Stage x_t into lanes [X_LO, X_HI) of a zero 128-lane slab so the kernel's
    # per-step "concat(x, h)" is a single VPU add against the carried slab.
    xs_slab = jnp.zeros((T, B, OUT_SLAB), jnp.float32).at[:, :, X_LO:X_HI].set(xs)
    h0_slab = jnp.zeros((B, OUT_SLAB), jnp.float32).at[:, HID_LO:HID_HI].set(h0)

    x_map = lambda b, t: (t, b, 0)
    h0_map = lambda b, t: (b, 0)
    w_map = lambda b, t: (0, 0)          # constant -> weights stay VMEM-resident
    out_map = lambda b, t: (t, b, 0)

    out = pl.pallas_call(
        rnn_seq_kernel,
        out_shape=jax.ShapeDtypeStruct((T, B, OUT_SLAB), jnp.float32),
        grid_spec=pltpu.PrefetchScalarGridSpec(
            num_scalar_prefetch=0,
            # NOTE: time chunks must stay the innermost "arbitrary" axis — the
            # carry_ref hidden-state handoff depends on it.  Do not reorder.
            grid=(nb, nt),
            in_specs=[
                pl.BlockSpec((t_chunk, bb, OUT_SLAB), x_map),
                pl.BlockSpec((bb, OUT_SLAB), h0_map),
                pl.BlockSpec(w1.shape, w_map),
                pl.BlockSpec(b1.shape, w_map),
                pl.BlockSpec(w2.shape, w_map),
                pl.BlockSpec(b2.shape, w_map),
                pl.BlockSpec(w3.shape, w_map),
                pl.BlockSpec(b3.shape, w_map),
            ],
            out_specs=pl.BlockSpec((t_chunk, bb, OUT_SLAB), out_map),
            scratch_shapes=[pltpu.VMEM((bb, OUT_SLAB), jnp.float32)],
        ),
        compiler_params=pltpu.CompilerParams(
            dimension_semantics=("parallel", "arbitrary")),
    )(xs_slab, h0_slab, w1, b1, w2, b2, w3, b3)

    hiddens = out[:, :, HID_LO:HID_HI]
    outputs = out[:, :, OUT_LO:OUT_HI]
    return outputs, hiddens


def init_params(key):
    """nn.Linear-equivalent params, stored as (in_features, out_features)."""
    in_dim = INPUT_SIZE + HIDDEN_SIZE
    dims = [(in_dim, L1), (L1, L2), (L2, HIDDEN_SIZE),    # i2h branch
            (in_dim, L1), (L1, L2), (L2, OUTPUT_SIZE)]    # i2o branch
    params = []
    for fan_in, fan_out in dims:
        key, kw, kb = jax.random.split(key, 3)
        bound = 1.0 / jnp.sqrt(fan_in)
        w = jax.random.uniform(kw, (fan_in, fan_out), jnp.float32, -bound, bound)
        b = jax.random.uniform(kb, (1, fan_out), jnp.float32, -bound, bound)
        params += [w, b]
    return tuple(params)


def fuse_params(params):
    """One-time fusion of the two 3-layer branches into 3 fused matmul weights."""
    (w1h, b1h, w2h, b2h, w3h, b3h,
     w1o, b1o, w2o, b2o, w3o, b3o) = params

    # Layer 1: one (128, 100) weight indexed by the activation-slab lane layout.
    # combined = cat([x, h]) -> rows [0,16) of the original weight are x rows,
    # rows [16,48) are hidden rows.
    w1_cat = jnp.concatenate([w1h, w1o], axis=1)                  # (48, 100)
    w1 = jnp.zeros((OUT_SLAB, FUSED_L1), jnp.float32)
    w1 = w1.at[HID_LO:HID_HI, :].set(w1_cat[INPUT_SIZE:])         # hidden lanes
    w1 = w1.at[X_LO:X_HI, :].set(w1_cat[:INPUT_SIZE])             # x-staging lanes
    b1 = jnp.concatenate([b1h, b1o], axis=1)                      # (1, 100)

    # Layer 2: block-diagonal (i2h block top-left, i2o block bottom-right).
    w2 = jnp.zeros((FUSED_L1, FUSED_L2), jnp.float32)             # (100, 30)
    w2 = w2.at[:L1, :L2].set(w2h).at[L1:, L2:].set(w2o)
    b2 = jnp.concatenate([b2h, b2o], axis=1)                      # (1, 30)

    # Layer 3: block-diagonal, scattered into the 128-lane output slab.
    w3 = jnp.zeros((FUSED_L2, OUT_SLAB), jnp.float32)             # (30, 128)
    w3 = w3.at[:L2, HID_LO:HID_HI].set(w3h)
    w3 = w3.at[L2:, OUT_LO:OUT_HI].set(w3o)
    b3 = jnp.zeros((1, OUT_SLAB), jnp.float32)
    b3 = b3.at[:, HID_LO:HID_HI].set(b3h).at[:, OUT_LO:OUT_HI].set(b3o)

    return (w1, b1, w2, b2, w3, b3)


def rnn_forward_ref(xs, h0, params):
    """Pure-JAX reference: step the original (unfused) module over the sequence."""
    (w1h, b1h, w2h, b2h, w3h, b3h,
     w1o, b1o, w2o, b2o, w3o, b3o) = params

    def softsign(x):
        return x / (1.0 + jnp.abs(x))

    def mlp(c, w1, b1, w2, b2, w3, b3):
        h = softsign(c @ w1 + b1)
        h = softsign(h @ w2 + b2)
        return h @ w3 + b3

    h = h0
    outs, hids = [], []
    for t in range(xs.shape[0]):
        combined = jnp.concatenate([xs[t], h], axis=1)
        new_h = mlp(combined, w1h, b1h, w2h, b2h, w3h, b3h)
        out = mlp(combined, w1o, b1o, w2o, b2o, w3o, b3o)
        h = new_h
        outs.append(out)
        hids.append(h)
    return jnp.stack(outs), jnp.stack(hids)


if __name__ == "__main__":
    # Keep both the kernel's and the reference's f32 matmuls at full precision
    # so the correctness check can be tight.
    jax.config.update("jax_default_matmul_precision", "highest")

    T = 8        # sequence length, folded into the kernel's in-body time loop
    B = 16       # 2 batch blocks of 8 -> both v7x TensorCores get work

    key = jax.random.PRNGKey(0)
    key, kx = jax.random.split(key)
    xs = jax.random.normal(kx, (T, B, INPUT_SIZE), jnp.float32)
    h0 = jnp.zeros((B, HIDDEN_SIZE), jnp.float32)   # RNN.initHidden broadcast over batch

    params = init_params(key)
    fused = fuse_params(params)

    outputs, hiddens = jax.jit(rnn_forward_seq)(xs, h0, fused)
    outputs = jax.block_until_ready(outputs)
    hiddens = jax.block_until_ready(hiddens)

    out_ref, hid_ref = rnn_forward_ref(xs, h0, params)

    assert outputs.shape == (T, B, OUTPUT_SIZE)
    assert hiddens.shape == (T, B, HIDDEN_SIZE)
    assert jnp.allclose(outputs, out_ref, atol=2e-3, rtol=2e-3), \
        float(jnp.max(jnp.abs(outputs - out_ref)))
    assert jnp.allclose(hiddens, hid_ref, atol=2e-3, rtol=2e-3), \
        float(jnp.max(jnp.abs(hiddens - hid_ref)))

    print("KERNEL_OK")
</pallas_src>

<mosaic_0001>
module attributes {stable_mosaic.version = 11 : i64} {
  func.func @rnn_seq_kernel(%arg0: i32, %arg1: i32, %arg2: memref<8x8x128xf32, #tpu.memory_space<vmem>>, %arg3: memref<8x128xf32, #tpu.memory_space<vmem>>, %arg4: memref<128x100xf32, #tpu.memory_space<vmem>>, %arg5: memref<1x100xf32, #tpu.memory_space<vmem>>, %arg6: memref<100x30xf32, #tpu.memory_space<vmem>>, %arg7: memref<1x30xf32, #tpu.memory_space<vmem>>, %arg8: memref<30x128xf32, #tpu.memory_space<vmem>>, %arg9: memref<1x128xf32, #tpu.memory_space<vmem>>, %arg10: memref<8x8x128xf32, #tpu.memory_space<vmem>>, %arg11: memref<8x128xf32, #tpu.memory_space<vmem>>) attributes {dimension_semantics = [#tpu.dimension_semantics<parallel>, #tpu.dimension_semantics<arbitrary>], iteration_bounds = array<i64: 2, 1>, scalar_prefetch = 0 : i64, scratch_operands = 1 : i64, tpu.core_type = #tpu.core_type<tc>, window_params = [{transform_indices = @transform_0, window_bounds = array<i64: 8, 8, 128>}, {transform_indices = @transform_1, window_bounds = array<i64: 8, 128>}, {pipeline_mode = #tpu.pipeline_mode<synchronous>, transform_indices = @transform_2, window_bounds = array<i64: 128, 100>}, {pipeline_mode = #tpu.pipeline_mode<synchronous>, transform_indices = @transform_3, window_bounds = array<i64: 1, 100>}, {pipeline_mode = #tpu.pipeline_mode<synchronous>, transform_indices = @transform_4, window_bounds = array<i64: 100, 30>}, {pipeline_mode = #tpu.pipeline_mode<synchronous>, transform_indices = @transform_5, window_bounds = array<i64: 1, 30>}, {pipeline_mode = #tpu.pipeline_mode<synchronous>, transform_indices = @transform_6, window_bounds = array<i64: 30, 128>}, {pipeline_mode = #tpu.pipeline_mode<synchronous>, transform_indices = @transform_7, window_bounds = array<i64: 1, 128>}, {transform_indices = @transform_8, window_bounds = array<i64: 8, 8, 128>}]} {
    %c0_i32 = arith.constant 0 : i32
    %0 = arith.cmpi eq, %arg1, %c0_i32 : i32
    %1 = arith.extui %0 : i1 to i32
    %c0_i32_0 = arith.constant 0 : i32
    %2 = arith.cmpi ne, %1, %c0_i32_0 : i32
    scf.if %2 {
      %c0_88 = arith.constant 0 : index
      %c0_89 = arith.constant 0 : index
      %193 = vector.load %arg3[%c0_88, %c0_89] : memref<8x128xf32, #tpu.memory_space<vmem>>, vector<8x128xf32>
      %c0_90 = arith.constant 0 : index
      %c0_91 = arith.constant 0 : index
      %194 = vector.load %arg11[%c0_90, %c0_91] : memref<8x128xf32, #tpu.memory_space<vmem>>, vector<8x128xf32>
      tpu.vector_store %arg11[%c0_90, %c0_91], %193 {strides = array<i32>} : memref<8x128xf32, #tpu.memory_space<vmem>>, vector<8x128xf32>,
    } else {
    }
    %c0 = arith.constant 0 : index
    %c0_1 = arith.constant 0 : index
    %3 = vector.load %arg4[%c0, %c0_1] : memref<128x100xf32, #tpu.memory_space<vmem>>, vector<128x100xf32>
    %c0_2 = arith.constant 0 : index
    %c0_3 = arith.constant 0 : index
    %4 = vector.load %arg6[%c0_2, %c0_3] : memref<100x30xf32, #tpu.memory_space<vmem>>, vector<100x30xf32>
    %c0_4 = arith.constant 0 : index
    %c0_5 = arith.constant 0 : index
    %5 = vector.load %arg8[%c0_4, %c0_5] : memref<30x128xf32, #tpu.memory_space<vmem>>, vector<30x128xf32>
    %c0_6 = arith.constant 0 : index
    %c0_7 = arith.constant 0 : index
    %6 = vector.load %arg5[%c0_6, %c0_7] : memref<1x100xf32, #tpu.memory_space<vmem>>, vector<1x100xf32>
    %7 = vector.shape_cast %6 : vector<1x100xf32> to vector<1x100xf32>
    %8 = vector.broadcast %7 : vector<1x100xf32> to vector<8x100xf32>
    %c0_8 = arith.constant 0 : index
    %c0_9 = arith.constant 0 : index
    %9 = vector.load %arg7[%c0_8, %c0_9] : memref<1x30xf32, #tpu.memory_space<vmem>>, vector<1x30xf32>
    %10 = vector.shape_cast %9 : vector<1x30xf32> to vector<1x30xf32>
    %11 = vector.broadcast %10 : vector<1x30xf32> to vector<8x30xf32>
    %c0_10 = arith.constant 0 : index
    %c0_11 = arith.constant 0 : index
    %12 = vector.load %arg9[%c0_10, %c0_11] : memref<1x128xf32, #tpu.memory_space<vmem>>, vector<1x128xf32>
    %13 = vector.shape_cast %12 : vector<1x128xf32> to vector<1x128xf32>
    %14 = vector.broadcast %13 : vector<1x128xf32> to vector<8x128xf32>
    %c0_12 = arith.constant 0 : index
    %c0_13 = arith.constant 0 : index
    %15 = vector.load %arg11[%c0_12, %c0_13] : memref<8x128xf32, #tpu.memory_space<vmem>>, vector<8x128xf32>
    %c0_i32_14 = arith.constant 0 : i32
    %16 = arith.index_cast %c0_i32_14 : i32 to index
    %c0_15 = arith.constant 0 : index
    %c0_16 = arith.constant 0 : index
    %17 = vector.load %arg2[%16, %c0_15, %c0_16] : memref<8x8x128xf32, #tpu.memory_space<vmem>>, vector<1x8x128xf32>
    %18 = vector.shape_cast %17 : vector<1x8x128xf32> to vector<8x128xf32>
    %19 = arith.addf %15, %18 : vector<8x128xf32>
    %cst = arith.constant dense<0.000000e+00> : vector<8x100xf32>
    %20 = tpu.matmul %19, %3, %cst {dimension_numbers = #tpu.dot_dimension_numbers<[1], [0], [0], [1], [0, 0, 1, 1], [], []>, precision = #tpu.contract_precision<fp32>} : vector<8x128xf32>, vector<128x100xf32>, vector<8x100xf32> -> vector<8x100xf32>
    %21 = arith.addf %20, %8 : vector<8x100xf32>
    %22 = math.absf %21 : vector<8x100xf32>
    %cst_17 = arith.constant 1.000000e+00 : f32
    %23 = vector.broadcast %cst_17 : f32 to vector<8x100xf32>
    %24 = arith.addf %23, %22 : vector<8x100xf32>
    %25 = arith.divf %21, %24 : vector<8x100xf32>
    %cst_18 = arith.constant dense<0.000000e+00> : vector<8x30xf32>
    %26 = tpu.matmul %25, %4, %cst_18 {dimension_numbers = #tpu.dot_dimension_numbers<[1], [0], [0], [1], [0, 0, 1, 1], [], []>, precision = #tpu.contract_precision<fp32>} : vector<8x100xf32>, vector<100x30xf32>, vector<8x30xf32> -> vector<8x30xf32>
    %27 = arith.addf %26, %11 : vector<8x30xf32>
    %28 = math.absf %27 : vector<8x30xf32>
    %cst_19 = arith.constant 1.000000e+00 : f32
    %29 = vector.broadcast %cst_19 : f32 to vector<8x30xf32>
    %30 = arith.addf %29, %28 : vector<8x30xf32>
    %31 = arith.divf %27, %30 : vector<8x30xf32>
    %cst_20 = arith.constant dense<0.000000e+00> : vector<8x128xf32>
    %32 = tpu.matmul %31, %5, %cst_20 {dimension_numbers = #tpu.dot_dimension_numbers<[1], [0], [0], [1], [0, 0, 1, 1], [], []>, precision = #tpu.contract_precision<fp32>} : vector<8x30xf32>, vector<30x128xf32>, vector<8x128xf32> -> vector<8x128xf32>
    %33 = arith.addf %32, %14 : vector<8x128xf32>
    %34 = arith.index_cast %c0_i32_14 : i32 to index
    %c0_21 = arith.constant 0 : index
    %c0_22 = arith.constant 0 : index
    %35 = vector.load %arg10[%34, %c0_21, %c0_22] : memref<8x8x128xf32, #tpu.memory_space<vmem>>, vector<1x8x128xf32>
    %36 = vector.shape_cast %35 : vector<1x8x128xf32> to vector<8x128xf32>
    %37 = vector.shape_cast %33 : vector<8x128xf32> to vector<1x8x128xf32>
    tpu.vector_store %arg10[%34, %c0_21, %c0_22], %37 {strides = array<i32>} : memref<8x8x128xf32, #tpu.memory_space<vmem>>, vector<1x8x128xf32>,
    %c1_i32 = arith.constant 1 : i32
    %38 = arith.index_cast %c1_i32 : i32 to index
    %c0_23 = arith.constant 0 : index
    %c0_24 = arith.constant 0 : index
    %39 = vector.load %arg2[%38, %c0_23, %c0_24] : memref<8x8x128xf32, #tpu.memory_space<vmem>>, vector<1x8x128xf32>
    %40 = vector.shape_cast %39 : vector<1x8x128xf32> to vector<8x128xf32>
    %41 = arith.addf %33, %40 : vector<8x128xf32>
    %cst_25 = arith.constant dense<0.000000e+00> : vector<8x100xf32>
    %42 = tpu.matmul %41, %3, %cst_25 {dimension_numbers = #tpu.dot_dimension_numbers<[1], [0], [0], [1], [0, 0, 1, 1], [], []>, precision = #tpu.contract_precision<fp32>} : vector<8x128xf32>, vector<128x100xf32>, vector<8x100xf32> -> vector<8x100xf32>
    %43 = arith.addf %42, %8 : vector<8x100xf32>
    %44 = math.absf %43 : vector<8x100xf32>
    %cst_26 = arith.constant 1.000000e+00 : f32
    %45 = vector.broadcast %cst_26 : f32 to vector<8x100xf32>
    %46 = arith.addf %45, %44 : vector<8x100xf32>
    %47 = arith.divf %43, %46 : vector<8x100xf32>
    %cst_27 = arith.constant dense<0.000000e+00> : vector<8x30xf32>
    %48 = tpu.matmul %47, %4, %cst_27 {dimension_numbers = #tpu.dot_dimension_numbers<[1], [0], [0], [1], [0, 0, 1, 1], [], []>, precision = #tpu.contract_precision<fp32>} : vector<8x100xf32>, vector<100x30xf32>, vector<8x30xf32> -> vector<8x30xf32>
    %49 = arith.addf %48, %11 : vector<8x30xf32>
    %50 = math.absf %49 : vector<8x30xf32>
    %cst_28 = arith.constant 1.000000e+00 : f32
    %51 = vector.broadcast %cst_28 : f32 to vector<8x30xf32>
    %52 = arith.addf %51, %50 : vector<8x30xf32>
    %53 = arith.divf %49, %52 : vector<8x30xf32>
    %cst_29 = arith.constant dense<0.000000e+00> : vector<8x128xf32>
    %54 = tpu.matmul %53, %5, %cst_29 {dimension_numbers = #tpu.dot_dimension_numbers<[1], [0], [0], [1], [0, 0, 1, 1], [], []>, precision = #tpu.contract_precision<fp32>} : vector<8x30xf32>, vector<30x128xf32>, vector<8x128xf32> -> vector<8x128xf32>
    %55 = arith.addf %54, %14 : vector<8x128xf32>
    %56 = arith.index_cast %c1_i32 : i32 to index
    %c0_30 = arith.constant 0 : index
    %c0_31 = arith.constant 0 : index
    %57 = vector.load %arg10[%56, %c0_30, %c0_31] : memref<8x8x128xf32, #tpu.memory_space<vmem>>, vector<1x8x128xf32>
    %58 = vector.shape_cast %57 : vector<1x8x128xf32> to vector<8x128xf32>
    %59 = vector.shape_cast %55 : vector<8x128xf32> to vector<1x8x128xf32>
    tpu.vector_store %arg10[%56, %c0_30, %c0_31], %59 {strides = array<i32>} : memref<8x8x128xf32, #tpu.memory_space<vmem>>, vector<1x8x128xf32>,
    %c2_i32 = arith.constant 2 : i32
    %60 = arith.index_cast %c2_i32 : i32 to index
    %c0_32 = arith.constant 0 : index
    %c0_33 = arith.constant 0 : index
    %61 = vector.load %arg2[%60, %c0_32, %c0_33] : memref<8x8x128xf32, #tpu.memory_space<vmem>>, vector<1x8x128xf32>
    %62 = vector.shape_cast %61 : vector<1x8x128xf32> to vector<8x128xf32>
    %63 = arith.addf %55, %62 : vector<8x128xf32>
    %cst_34 = arith.constant dense<0.000000e+00> : vector<8x100xf32>
    %64 = tpu.matmul %63, %3, %cst_34 {dimension_numbers = #tpu.dot_dimension_numbers<[1], [0], [0], [1], [0, 0, 1, 1], [], []>, precision = #tpu.contract_precision<fp32>} : vector<8x128xf32>, vector<128x100xf32>, vector<8x100xf32> -> vector<8x100xf32>
    %65 = arith.addf %64, %8 : vector<8x100xf32>
    %66 = math.absf %65 : vector<8x100xf32>
    %cst_35 = arith.constant 1.000000e+00 : f32
    %67 = vector.broadcast %cst_35 : f32 to vector<8x100xf32>
    %68 = arith.addf %67, %66 : vector<8x100xf32>
    %69 = arith.divf %65, %68 : vector<8x100xf32>
    %cst_36 = arith.constant dense<0.000000e+00> : vector<8x30xf32>
    %70 = tpu.matmul %69, %4, %cst_36 {dimension_numbers = #tpu.dot_dimension_numbers<[1], [0], [0], [1], [0, 0, 1, 1], [], []>, precision = #tpu.contract_precision<fp32>} : vector<8x100xf32>, vector<100x30xf32>, vector<8x30xf32> -> vector<8x30xf32>
    %71 = arith.addf %70, %11 : vector<8x30xf32>
    %72 = math.absf %71 : vector<8x30xf32>
    %cst_37 = arith.constant 1.000000e+00 : f32
    %73 = vector.broadcast %cst_37 : f32 to vector<8x30xf32>
    %74 = arith.addf %73, %72 : vector<8x30xf32>
    %75 = arith.divf %71, %74 : vector<8x30xf32>
    %cst_38 = arith.constant dense<0.000000e+00> : vector<8x128xf32>
    %76 = tpu.matmul %75, %5, %cst_38 {dimension_numbers = #tpu.dot_dimension_numbers<[1], [0], [0], [1], [0, 0, 1, 1], [], []>, precision = #tpu.contract_precision<fp32>} : vector<8x30xf32>, vector<30x128xf32>, vector<8x128xf32> -> vector<8x128xf32>
    %77 = arith.addf %76, %14 : vector<8x128xf32>
    %78 = arith.index_cast %c2_i32 : i32 to index
    %c0_39 = arith.constant 0 : index
    %c0_40 = arith.constant 0 : index
    %79 = vector.load %arg10[%78, %c0_39, %c0_40] : memref<8x8x128xf32, #tpu.memory_space<vmem>>, vector<1x8x128xf32>
    %80 = vector.shape_cast %79 : vector<1x8x128xf32> to vector<8x128xf32>
    %81 = vector.shape_cast %77 : vector<8x128xf32> to vector<1x8x128xf32>
    tpu.vector_store %arg10[%78, %c0_39, %c0_40], %81 {strides = array<i32>} : memref<8x8x128xf32, #tpu.memory_space<vmem>>, vector<1x8x128xf32>,
    %c3_i32 = arith.constant 3 : i32
    %82 = arith.index_cast %c3_i32 : i32 to index
    %c0_41 = arith.constant 0 : index
    %c0_42 = arith.constant 0 : index
    %83 = vector.load %arg2[%82, %c0_41, %c0_42] : memref<8x8x128xf32, #tpu.memory_space<vmem>>, vector<1x8x128xf32>
    %84 = vector.shape_cast %83 : vector<1x8x128xf32> to vector<8x128xf32>
    %85 = arith.addf %77, %84 : vector<8x128xf32>
    %cst_43 = arith.constant dense<0.000000e+00> : vector<8x100xf32>
    %86 = tpu.matmul %85, %3, %cst_43 {dimension_numbers = #tpu.dot_dimension_numbers<[1], [0], [0], [1], [0, 0, 1, 1], [], []>, precision = #tpu.contract_precision<fp32>} : vector<8x128xf32>, vector<128x100xf32>, vector<8x100xf32> -> vector<8x100xf32>
    %87 = arith.addf %86, %8 : vector<8x100xf32>
    %88 = math.absf %87 : vector<8x100xf32>
    %cst_44 = arith.constant 1.000000e+00 : f32
    %89 = vector.broadcast %cst_44 : f32 to vector<8x100xf32>
    %90 = arith.addf %89, %88 : vector<8x100xf32>
    %91 = arith.divf %87, %90 : vector<8x100xf32>
    %cst_45 = arith.constant dense<0.000000e+00> : vector<8x30xf32>
    %92 = tpu.matmul %91, %4, %cst_45 {dimension_numbers = #tpu.dot_dimension_numbers<[1], [0], [0], [1], [0, 0, 1, 1], [], []>, precision = #tpu.contract_precision<fp32>} : vector<8x100xf32>, vector<100x30xf32>, vector<8x30xf32> -> vector<8x30xf32>
    %93 = arith.addf %92, %11 : vector<8x30xf32>
    %94 = math.absf %93 : vector<8x30xf32>
    %cst_46 = arith.constant 1.000000e+00 : f32
    %95 = vector.broadcast %cst_46 : f32 to vector<8x30xf32>
    %96 = arith.addf %95, %94 : vector<8x30xf32>
    %97 = arith.divf %93, %96 : vector<8x30xf32>
    %cst_47 = arith.constant dense<0.000000e+00> : vector<8x128xf32>
    %98 = tpu.matmul %97, %5, %cst_47 {dimension_numbers = #tpu.dot_dimension_numbers<[1], [0], [0], [1], [0, 0, 1, 1], [], []>, precision = #tpu.contract_precision<fp32>} : vector<8x30xf32>, vector<30x128xf32>, vector<8x128xf32> -> vector<8x128xf32>
    %99 = arith.addf %98, %14 : vector<8x128xf32>
    %100 = arith.index_cast %c3_i32 : i32 to index
    %c0_48 = arith.constant 0 : index
    %c0_49 = arith.constant 0 : index
    %101 = vector.load %arg10[%100, %c0_48, %c0_49] : memref<8x8x128xf32, #tpu.memory_space<vmem>>, vector<1x8x128xf32>
    %102 = vector.shape_cast %101 : vector<1x8x128xf32> to vector<8x128xf32>
    %103 = vector.shape_cast %99 : vector<8x128xf32> to vector<1x8x128xf32>
    tpu.vector_store %arg10[%100, %c0_48, %c0_49], %103 {strides = array<i32>} : memref<8x8x128xf32, #tpu.memory_space<vmem>>, vector<1x8x128xf32>,
    %c4_i32 = arith.constant 4 : i32
    %104 = arith.index_cast %c4_i32 : i32 to index
    %c0_50 = arith.constant 0 : index
    %c0_51 = arith.constant 0 : index
    %105 = vector.load %arg2[%104, %c0_50, %c0_51] : memref<8x8x128xf32, #tpu.memory_space<vmem>>, vector<1x8x128xf32>
    %106 = vector.shape_cast %105 : vector<1x8x128xf32> to vector<8x128xf32>
    %107 = arith.addf %99, %106 : vector<8x128xf32>
    %cst_52 = arith.constant dense<0.000000e+00> : vector<8x100xf32>
    %108 = tpu.matmul %107, %3, %cst_52 {dimension_numbers = #tpu.dot_dimension_numbers<[1], [0], [0], [1], [0, 0, 1, 1], [], []>, precision = #tpu.contract_precision<fp32>} : vector<8x128xf32>, vector<128x100xf32>, vector<8x100xf32> -> vector<8x100xf32>
    %109 = arith.addf %108, %8 : vector<8x100xf32>
    %110 = math.absf %109 : vector<8x100xf32>
    %cst_53 = arith.constant 1.000000e+00 : f32
    %111 = vector.broadcast %cst_53 : f32 to vector<8x100xf32>
    %112 = arith.addf %111, %110 : vector<8x100xf32>
    %113 = arith.divf %109, %112 : vector<8x100xf32>
    %cst_54 = arith.constant dense<0.000000e+00> : vector<8x30xf32>
    %114 = tpu.matmul %113, %4, %cst_54 {dimension_numbers = #tpu.dot_dimension_numbers<[1], [0], [0], [1], [0, 0, 1, 1], [], []>, precision = #tpu.contract_precision<fp32>} : vector<8x100xf32>, vector<100x30xf32>, vector<8x30xf32> -> vector<8x30xf32>
    %115 = arith.addf %114, %11 : vector<8x30xf32>
    %116 = math.absf %115 : vector<8x30xf32>
    %cst_55 = arith.constant 1.000000e+00 : f32
    %117 = vector.broadcast %cst_55 : f32 to vector<8x30xf32>
    %118 = arith.addf %117, %116 : vector<8x30xf32>
    %119 = arith.divf %115, %118 : vector<8x30xf32>
    %cst_56 = arith.constant dense<0.000000e+00> : vector<8x128xf32>
    %120 = tpu.matmul %119, %5, %cst_56 {dimension_numbers = #tpu.dot_dimension_numbers<[1], [0], [0], [1], [0, 0, 1, 1], [], []>, precision = #tpu.contract_precision<fp32>} : vector<8x30xf32>, vector<30x128xf32>, vector<8x128xf32> -> vector<8x128xf32>
    %121 = arith.addf %120, %14 : vector<8x128xf32>
    %122 = arith.index_cast %c4_i32 : i32 to index
    %c0_57 = arith.constant 0 : index
    %c0_58 = arith.constant 0 : index
    %123 = vector.load %arg10[%122, %c0_57, %c0_58] : memref<8x8x128xf32, #tpu.memory_space<vmem>>, vector<1x8x128xf32>
    %124 = vector.shape_cast %123 : vector<1x8x128xf32> to vector<8x128xf32>
    %125 = vector.shape_cast %121 : vector<8x128xf32> to vector<1x8x128xf32>
    tpu.vector_store %arg10[%122, %c0_57, %c0_58], %125 {strides = array<i32>} : memref<8x8x128xf32, #tpu.memory_space<vmem>>, vector<1x8x128xf32>,
    %c5_i32 = arith.constant 5 : i32
    %126 = arith.index_cast %c5_i32 : i32 to index
    %c0_59 = arith.constant 0 : index
    %c0_60 = arith.constant 0 : index
    %127 = vector.load %arg2[%126, %c0_59, %c0_60] : memref<8x8x128xf32, #tpu.memory_space<vmem>>, vector<1x8x128xf32>
    %128 = vector.shape_cast %127 : vector<1x8x128xf32> to vector<8x128xf32>
    %129 = arith.addf %121, %128 : vector<8x128xf32>
    %cst_61 = arith.constant dense<0.000000e+00> : vector<8x100xf32>
    %130 = tpu.matmul %129, %3, %cst_61 {dimension_numbers = #tpu.dot_dimension_numbers<[1], [0], [0], [1], [0, 0, 1, 1], [], []>, precision = #tpu.contract_precision<fp32>} : vector<8x128xf32>, vector<128x100xf32>, vector<8x100xf32> -> vector<8x100xf32>
    %131 = arith.addf %130, %8 : vector<8x100xf32>
    %132 = math.absf %131 : vector<8x100xf32>
    %cst_62 = arith.constant 1.000000e+00 : f32
    %133 = vector.broadcast %cst_62 : f32 to vector<8x100xf32>
    %134 = arith.addf %133, %132 : vector<8x100xf32>
    %135 = arith.divf %131, %134 : vector<8x100xf32>
    %cst_63 = arith.constant dense<0.000000e+00> : vector<8x30xf32>
    %136 = tpu.matmul %135, %4, %cst_63 {dimension_numbers = #tpu.dot_dimension_numbers<[1], [0], [0], [1], [0, 0, 1, 1], [], []>, precision = #tpu.contract_precision<fp32>} : vector<8x100xf32>, vector<100x30xf32>, vector<8x30xf32> -> vector<8x30xf32>
    %137 = arith.addf %136, %11 : vector<8x30xf32>
    %138 = math.absf %137 : vector<8x30xf32>
    %cst_64 = arith.constant 1.000000e+00 : f32
    %139 = vector.broadcast %cst_64 : f32 to vector<8x30xf32>
    %140 = arith.addf %139, %138 : vector<8x30xf32>
    %141 = arith.divf %137, %140 : vector<8x30xf32>
    %cst_65 = arith.constant dense<0.000000e+00> : vector<8x128xf32>
    %142 = tpu.matmul %141, %5, %cst_65 {dimension_numbers = #tpu.dot_dimension_numbers<[1], [0], [0], [1], [0, 0, 1, 1], [], []>, precision = #tpu.contract_precision<fp32>} : vector<8x30xf32>, vector<30x128xf32>, vector<8x128xf32> -> vector<8x128xf32>
    %143 = arith.addf %142, %14 : vector<8x128xf32>
    %144 = arith.index_cast %c5_i32 : i32 to index
    %c0_66 = arith.constant 0 : index
    %c0_67 = arith.constant 0 : index
    %145 = vector.load %arg10[%144, %c0_66, %c0_67] : memref<8x8x128xf32, #tpu.memory_space<vmem>>, vector<1x8x128xf32>
    %146 = vector.shape_cast %145 : vector<1x8x128xf32> to vector<8x128xf32>
    %147 = vector.shape_cast %143 : vector<8x128xf32> to vector<1x8x128xf32>
    tpu.vector_store %arg10[%144, %c0_66, %c0_67], %147 {strides = array<i32>} : memref<8x8x128xf32, #tpu.memory_space<vmem>>, vector<1x8x128xf32>,
    %c6_i32 = arith.constant 6 : i32
    %148 = arith.index_cast %c6_i32 : i32 to index
    %c0_68 = arith.constant 0 : index
    %c0_69 = arith.constant 0 : index
    %149 = vector.load %arg2[%148, %c0_68, %c0_69] : memref<8x8x128xf32, #tpu.memory_space<vmem>>, vector<1x8x128xf32>
    %150 = vector.shape_cast %149 : vector<1x8x128xf32> to vector<8x128xf32>
    %151 = arith.addf %143, %150 : vector<8x128xf32>
    %cst_70 = arith.constant dense<0.000000e+00> : vector<8x100xf32>
    %152 = tpu.matmul %151, %3, %cst_70 {dimension_numbers = #tpu.dot_dimension_numbers<[1], [0], [0], [1], [0, 0, 1, 1], [], []>, precision = #tpu.contract_precision<fp32>} : vector<8x128xf32>, vector<128x100xf32>, vector<8x100xf32> -> vector<8x100xf32>
    %153 = arith.addf %152, %8 : vector<8x100xf32>
    %154 = math.absf %153 : vector<8x100xf32>
    %cst_71 = arith.constant 1.000000e+00 : f32
    %155 = vector.broadcast %cst_71 : f32 to vector<8x100xf32>
    %156 = arith.addf %155, %154 : vector<8x100xf32>
    %157 = arith.divf %153, %156 : vector<8x100xf32>
    %cst_72 = arith.constant dense<0.000000e+00> : vector<8x30xf32>
    %158 = tpu.matmul %157, %4, %cst_72 {dimension_numbers = #tpu.dot_dimension_numbers<[1], [0], [0], [1], [0, 0, 1, 1], [], []>, precision = #tpu.contract_precision<fp32>} : vector<8x100xf32>, vector<100x30xf32>, vector<8x30xf32> -> vector<8x30xf32>
    %159 = arith.addf %158, %11 : vector<8x30xf32>
    %160 = math.absf %159 : vector<8x30xf32>
    %cst_73 = arith.constant 1.000000e+00 : f32
    %161 = vector.broadcast %cst_73 : f32 to vector<8x30xf32>
    %162 = arith.addf %161, %160 : vector<8x30xf32>
    %163 = arith.divf %159, %162 : vector<8x30xf32>
    %cst_74 = arith.constant dense<0.000000e+00> : vector<8x128xf32>
    %164 = tpu.matmul %163, %5, %cst_74 {dimension_numbers = #tpu.dot_dimension_numbers<[1], [0], [0], [1], [0, 0, 1, 1], [], []>, precision = #tpu.contract_precision<fp32>} : vector<8x30xf32>, vector<30x128xf32>, vector<8x128xf32> -> vector<8x128xf32>
    %165 = arith.addf %164, %14 : vector<8x128xf32>
    %166 = arith.index_cast %c6_i32 : i32 to index
    %c0_75 = arith.constant 0 : index
    %c0_76 = arith.constant 0 : index
    %167 = vector.load %arg10[%166, %c0_75, %c0_76] : memref<8x8x128xf32, #tpu.memory_space<vmem>>, vector<1x8x128xf32>
    %168 = vector.shape_cast %167 : vector<1x8x128xf32> to vector<8x128xf32>
    %169 = vector.shape_cast %165 : vector<8x128xf32> to vector<1x8x128xf32>
    tpu.vector_store %arg10[%166, %c0_75, %c0_76], %169 {strides = array<i32>} : memref<8x8x128xf32, #tpu.memory_space<vmem>>, vector<1x8x128xf32>,
    %c7_i32 = arith.constant 7 : i32
    %170 = arith.index_cast %c7_i32 : i32 to index
    %c0_77 = arith.constant 0 : index
    %c0_78 = arith.constant 0 : index
    %171 = vector.load %arg2[%170, %c0_77, %c0_78] : memref<8x8x128xf32, #tpu.memory_space<vmem>>, vector<1x8x128xf32>
    %172 = vector.shape_cast %171 : vector<1x8x128xf32> to vector<8x128xf32>
    %173 = arith.addf %165, %172 : vector<8x128xf32>
    %cst_79 = arith.constant dense<0.000000e+00> : vector<8x100xf32>
    %174 = tpu.matmul %173, %3, %cst_79 {dimension_numbers = #tpu.dot_dimension_numbers<[1], [0], [0], [1], [0, 0, 1, 1], [], []>, precision = #tpu.contract_precision<fp32>} : vector<8x128xf32>, vector<128x100xf32>, vector<8x100xf32> -> vector<8x100xf32>
    %175 = arith.addf %174, %8 : vector<8x100xf32>
    %176 = math.absf %175 : vector<8x100xf32>
    %cst_80 = arith.constant 1.000000e+00 : f32
    %177 = vector.broadcast %cst_80 : f32 to vector<8x100xf32>
    %178 = arith.addf %177, %176 : vector<8x100xf32>
    %179 = arith.divf %175, %178 : vector<8x100xf32>
    %cst_81 = arith.constant dense<0.000000e+00> : vector<8x30xf32>
    %180 = tpu.matmul %179, %4, %cst_81 {dimension_numbers = #tpu.dot_dimension_numbers<[1], [0], [0], [1], [0, 0, 1, 1], [], []>, precision = #tpu.contract_precision<fp32>} : vector<8x100xf32>, vector<100x30xf32>, vector<8x30xf32> -> vector<8x30xf32>
    %181 = arith.addf %180, %11 : vector<8x30xf32>
    %182 = math.absf %181 : vector<8x30xf32>
    %cst_82 = arith.constant 1.000000e+00 : f32
    %183 = vector.broadcast %cst_82 : f32 to vector<8x30xf32>
    %184 = arith.addf %183, %182 : vector<8x30xf32>
    %185 = arith.divf %181, %184 : vector<8x30xf32>
    %cst_83 = arith.constant dense<0.000000e+00> : vector<8x128xf32>
    %186 = tpu.matmul %185, %5, %cst_83 {dimension_numbers = #tpu.dot_dimension_numbers<[1], [0], [0], [1], [0, 0, 1, 1], [], []>, precision = #tpu.contract_precision<fp32>} : vector<8x30xf32>, vector<30x128xf32>, vector<8x128xf32> -> vector<8x128xf32>
    %187 = arith.addf %186, %14 : vector<8x128xf32>
    %188 = arith.index_cast %c7_i32 : i32 to index
    %c0_84 = arith.constant 0 : index
    %c0_85 = arith.constant 0 : index
    %189 = vector.load %arg10[%188, %c0_84, %c0_85] : memref<8x8x128xf32, #tpu.memory_space<vmem>>, vector<1x8x128xf32>
    %190 = vector.shape_cast %189 : vector<1x8x128xf32> to vector<8x128xf32>
    %191 = vector.shape_cast %187 : vector<8x128xf32> to vector<1x8x128xf32>
    tpu.vector_store %arg10[%188, %c0_84, %c0_85], %191 {strides = array<i32>} : memref<8x8x128xf32, #tpu.memory_space<vmem>>, vector<1x8x128xf32>,
    %c8_i32 = arith.constant 8 : i32
    %c0_86 = arith.constant 0 : index
    %c0_87 = arith.constant 0 : index
    %192 = vector.load %arg11[%c0_86, %c0_87] : memref<8x128xf32, #tpu.memory_space<vmem>>, vector<8x128xf32>
    tpu.vector_store %arg11[%c0_86, %c0_87], %187 {strides = array<i32>} : memref<8x128xf32, #tpu.memory_space<vmem>>, vector<8x128xf32>,
    return
  }
  func.func @transform_0(%arg0: i32, %arg1: i32) -> (i32, i32, i32) {
    %c0_i32 = arith.constant 0 : i32
    %c0_i32_0 = arith.constant 0 : i32
    return %arg1, %arg0, %c0_i32 : i32, i32, i32
  }
  func.func @transform_1(%arg0: i32, %arg1: i32) -> (i32, i32) {
    %c0_i32 = arith.constant 0 : i32
    %c0_i32_0 = arith.constant 0 : i32
    return %arg0, %c0_i32 : i32, i32
  }
  func.func @transform_2(%arg0: i32, %arg1: i32) -> (i32, i32) {
    %c0_i32 = arith.constant 0 : i32
    %c0_i32_0 = arith.constant 0 : i32
    %c0_i32_1 = arith.constant 0 : i32
    return %c0_i32, %c0_i32_0 : i32, i32
  }
  func.func @transform_3(%arg0: i32, %arg1: i32) -> (i32, i32) {
    %c0_i32 = arith.constant 0 : i32
    %c0_i32_0 = arith.constant 0 : i32
    %c0_i32_1 = arith.constant 0 : i32
    return %c0_i32, %c0_i32_0 : i32, i32
  }
  func.func @transform_4(%arg0: i32, %arg1: i32) -> (i32, i32) {
    %c0_i32 = arith.constant 0 : i32
    %c0_i32_0 = arith.constant 0 : i32
    %c0_i32_1 = arith.constant 0 : i32
    return %c0_i32, %c0_i32_0 : i32, i32
  }
  func.func @transform_5(%arg0: i32, %arg1: i32) -> (i32, i32) {
    %c0_i32 = arith.constant 0 : i32
    %c0_i32_0 = arith.constant 0 : i32
    %c0_i32_1 = arith.constant 0 : i32
    return %c0_i32, %c0_i32_0 : i32, i32
  }
  func.func @transform_6(%arg0: i32, %arg1: i32) -> (i32, i32) {
    %c0_i32 = arith.constant 0 : i32
    %c0_i32_0 = arith.constant 0 : i32
    %c0_i32_1 = arith.constant 0 : i32
    return %c0_i32, %c0_i32_0 : i32, i32
  }
  func.func @transform_7(%arg0: i32, %arg1: i32) -> (i32, i32) {
    %c0_i32 = arith.constant 0 : i32
    %c0_i32_0 = arith.constant 0 : i32
    %c0_i32_1 = arith.constant 0 : i32
    return %c0_i32, %c0_i32_0 : i32, i32
  }
  func.func @transform_8(%arg0: i32, %arg1: i32) -> (i32, i32, i32) {
    %c0_i32 = arith.constant 0 : i32
    %c0_i32_0 = arith.constant 0 : i32
    return %arg1, %arg0, %c0_i32 : i32, i32, i32
  }
}

</mosaic_0001>

<bundles_post_ra>
// kernel: rnn_forward_seq.1
= control target key start
LH: loop header
LB: loop body
LE: loop exit
PB: predicated region body
PF: predicated region fallthrough
CT: control target
= control target key end

     0   :  { %s22697_s27 = smov 0   ;;  %s22699_s28 = smov 0   ;;  %s25362_s0 = inlined_call_operand.vmem [shape: f32[8,16,128], index: 0, kind: input, shape index: {}]   ;;  %s25363_s1 = inlined_call_operand.vmem [shape: f32[16,128], index: 1, kind: input, shape index: {}]   ;;  %s25364_s2 = inlined_call_operand.vmem [shape: f32[128,100], index: 2, kind: input, shape index: {}]   ;;  %s25365_s3 = inlined_call_operand.vmem [shape: f32[1,100], index: 3, kind: input, shape index: {}]   ;;  %s25366_s4 = inlined_call_operand.vmem [shape: f32[100,30], index: 4, kind: input, shape index: {}]   ;;  %s25367_s5 = inlined_call_operand.vmem [shape: f32[1,30], index: 5, kind: input, shape index: {}]   ;;  %s25368_s6 = inlined_call_operand.vmem [shape: f32[30,128], index: 6, kind: input, shape index: {}]   ;;  %s25369_s7 = inlined_call_operand.vmem [shape: f32[1,128], index: 7, kind: input, shape index: {}]   ;;  %s25370_s8 = inlined_call_operand.vmem [shape: f32[8,16,128], index: 8, kind: output, shape index: {}]  }
   0x1   :  { %s22701_s29 = smov 0   ;;  %s22703_s30 = smov 0  }
   0x2   :  { %s22705_s9 = smov 0  }
   0x3 LB: > { %s30_s10 = sadd.s32 1, %s22643_s30  ;;  %s14599_s11 = sadd.s32 4294967295, %s22647_s9   ;;  %s22647_s9 = sphi %s22705_s9, %s18_s9   ;;  %s22643_s30 = sphi %s22703_s30, %s25700_s30   ;;  %s22639_s29 = sphi %s22701_s29, %s25699_s29   ;;  %s22635_s28 = sphi %s22699_s28, %s25698_s28   ;;  %s22631_s27 = sphi %s22697_s27, %s25697_s27  }
   0x4   : > { %p32_p0 = scmp.ge.s32.totalorder %s30_s10, 2  ;;  %p46_p1 = scmp.ne.s32.totalorder %s22635_s28, %s22631_s27 }
   0x5   : > { %p47_p2 = scmp.eq.s32.totalorder %s22647_s9, 0  ;;  %p230_p4 = scmp.eq.s32.totalorder %s14599_s11, 1 }
   0x6   : > { %s25702_s10 = smov (%p32_p0, %s30_s10), 0  ;;  %s39_s13 = sadd.s32 1, %s22635_s28 }
   0x7   : > { %p48_p3 = por %p47_p2, %p46_p1  ;;  %s35_s12 = ssub.s32 %s22643_s30, %s25702_s10 }
   0x8   : > { %p37_p5 = scmp.eq.s32.totalorder %s35_s12, 0  ;;  %p22732_p6 = por %p230_p4, %p46_p1 }
   0x9   : > { %p14602_p7 = scmp.ge.s32.totalorder %s22647_s9, 2 }
   0xa   : > { %s22737_s15 = scalar_select %p37_p5, %s22635_s28, %s39_s13  }
   0xb   : > { %270 = sbr.rel (%p14602_p7) target bundleno = 26 (0x1a), region = 40 }
  0x12   : > { %273 = sbr.rel (!%p48_p3) target bundleno = 26 (0x1a), region = 44  ;;  %s275_s16 = sand.u32 (%p48_p3), 1, %s22635_s28  }
  0x13   : > { %s14604_s17 = sshll.u32 (%p48_p3), %s22643_s30, 3  ;;  %s14603_s18 = sshll.u32 (%p48_p3), %s275_s16, 6 }
  0x14   : > { %s282_s21 = scalar_lea.vmem (%p48_p3), %s25362_s0, %s14604_s17  ;;  %s277_s22 = scalar_lea.vmem (%p48_p3), [#allocation3], %s14603_s18 }
  0x15   : > { %v324_v0 = vld [vmem:[%s282_s21] sm:$0xff] (%p48_p3)  ;;  %v326_v1 = vld [vmem:[%s282_s21 + $0x10] sm:$0xff] (%p48_p3) }
  0x16   : > { %v328_v2 = vld [vmem:[%s282_s21 + $0x20] sm:$0xff] (%p48_p3)  ;;  %325 = vst [vmem:[%s277_s22] sm:$0xff] (%p48_p3), %v324_v0  ;;  %327 = vst [vmem:[%s277_s22 + $0x8] sm:$0xff] (%p48_p3), %v326_v1  ;;  %v330_v3 = vld [vmem:[%s282_s21 + $0x30] sm:$0xff] (%p48_p3) }
  0x17   : > { %329 = vst [vmem:[%s277_s22 + $0x10] sm:$0xff] (%p48_p3), %v328_v2  ;;  %v332_v4 = vld [vmem:[%s282_s21 + $0x40] sm:$0xff] (%p48_p3)  ;;  %v334_v5 = vld [vmem:[%s282_s21 + $0x50] sm:$0xff] (%p48_p3)  ;;  %331 = vst [vmem:[%s277_s22 + $0x18] sm:$0xff] (%p48_p3), %v330_v3 }
  0x18   : > { %333 = vst [vmem:[%s277_s22 + $0x20] sm:$0xff] (%p48_p3), %v332_v4  ;;  %335 = vst [vmem:[%s277_s22 + $0x28] sm:$0xff] (%p48_p3), %v334_v5  ;;  %v336_v6 = vld [vmem:[%s282_s21 + $0x60] sm:$0xff] (%p48_p3)  ;;  %v338_v7 = vld [vmem:[%s282_s21 + $0x70] sm:$0xff] (%p48_p3) }
  0x19   : > { %337 = vst [vmem:[%s277_s22 + $0x30] sm:$0xff] %v336_v6  ;;  %339 = vst [vmem:[%s277_s22 + $0x38] sm:$0xff] %v338_v7 }
  0x1a PF: > { %p14605_p8 = scmp.ge.s32.totalorder %s22647_s9, 1  ;;  %p351_p9 = scmp.lt.s32.totalorder %s22647_s9, 3 }
  0x1c   : > { %p352_p10 = pnand %p14605_p8, %p351_p9 }
  0x1e   : > { %355 = sbr.rel (%p352_p10) target bundleno = 8356 (0x20a4), region = 86 }
  0x25   : > { %v406_v8 = vld [vmem:[%s25364_s2] sm:$0xff]  ;;  %v407_v9 = vld [vmem:[%s25364_s2 + $0x8] sm:$0xff]  ;;  %v408_v10 = vld [vmem:[%s25364_s2 + $0x10] sm:$0xff]  ;;  %v25383_v11 = vmov 0.0|0.0   ;;  %vm22650_vm0 = vmmov 0   ;;  %v25371_v16 = vmov 0.0  }
  0x26   : > { %19958 = vmatprep.subr.bf16.mxu0 %v25383_v11  ;;  %v464_v12 = vand.u32 4294901760, %v406_v8  ;;  %v467_v13 = vand.u32 4294901760, %v407_v9  ;;  %v409_v14 = vld [vmem:[%s25364_s2 + $0x18] sm:$0xff]  ;;  %v470_v15 = vand.u32 4294901760, %v408_v10  ;;  %16390 = vmatprep.mubr.msk.f32.mxu0 %vm22650_vm0, %v25371_v16  ;;  %v410_v18 = vld [vmem:[%s25364_s2 + $0x20] sm:$0xff]  ;;  %v411_v19 = vld [vmem:[%s25364_s2 + $0x28] sm:$0xff] }
  0x27   : > { %v473_v17 = vand.u32 4294901760, %v409_v14  ;;  %20102 = vmatprep.subr.bf16.mxu1 %v25383_v11  ;;  %16594 = vmatprep.mubr.msk.f32.mxu1 %vm22650_vm0, %v25371_v16  ;;  %s358_s21 = sand.u32 1, %s22631_s27   ;;  %v476_v22 = vand.u32 4294901760, %v410_v18  ;;  %v479_v23 = vand.u32 4294901760, %v411_v19  ;;  %p395_p11 = scmp.lt.s32.totalorder %s22639_s29, 1  ;;  %v412_v24 = vld [vmem:[%s25364_s2 + $0x30] sm:$0xff] }
  0x28   : > { %v22771_v20 = vpack.c.bf16 %v467_v13, %v464_v12  ;;  %s22777_s22 = sshll.u32 %s358_s21, 6  ;;  %v413_v25 = vld [vmem:[%s25364_s2 + $0x38] sm:$0xff]  ;;  %v482_v27 = vand.u32 4294901760, %v412_v24  ;;  %v414_v30 = vld [vmem:[%s25364_s2 + $0x40] sm:$0xff]  ;;  %v415_v31 = vld [vmem:[%s25364_s2 + $0x48] sm:$0xff]  ;;  %v22826_v43 = vsub.f32 %v406_v8, %v464_v12  ;;  %v22831_v51 = vsub.f32 %v407_v9, %v467_v13 }
  0x29   : > { %v22775_v21 = vpack.c.bf16 %v473_v17, %v470_v15  ;;  %s396_s27 = scalar_select %p395_p11, %s22639_s29, 1  ;;  %v22789_v26 = vpack.c.bf16 %v479_v23, %v476_v22  ;;  %v485_v28 = vand.u32 4294901760, %v413_v25  ;;  %v416_v32 = vld [vmem:[%s25364_s2 + $0x50] sm:$0xff]  ;;  %v417_v34 = vld [vmem:[%s25364_s2 + $0x58] sm:$0xff]  ;;  %v418_v35 = vld [vmem:[%s25364_s2 + $0x60] sm:$0xff]  ;;  %v488_v39 = vand.u32 4294901760, %v414_v30 }
  0x2a   : > { %25488 = vst [vmem:[#allocation5_spill] sm:$0xff] %v22771_v20  ;;  %19960 = vmatpush3.bf16.msra.mxu0 %v22771_v20  ;;  %s22792_s12 = scalar_lea.vmem [#allocation3], %s22777_s22  ;;  %v419_v36 = vld [vmem:[%s25364_s2 + $0x68] sm:$0xff]  ;;  %v491_v40 = vand.u32 4294901760, %v415_v31  ;;  %v420_v41 = vld [vmem:[%s25364_s2 + $0x70] sm:$0xff]  ;;  %v421_v42 = vld [vmem:[%s25364_s2 + $0x78] sm:$0xff]  ;;  %v22833_v52 = vsub.f32 %v408_v10, %v470_v15  ;;  %v22839_v55 = vsub.f32 %v409_v14, %v473_v17  ;;  %v22841_v56 = vsub.f32 %v410_v18, %v476_v22 }
  0x2b   : > { %25489 = vst [vmem:[#allocation6_spill] sm:$0xff] %v22775_v21  ;;  %19961 = vmatprep.subr.bf16.mxu0 %v25383_v11  ;;  %25490 = vst [vmem:[#allocation7_spill] sm:$0xff] %v22789_v26  ;;  %s14608_s11 = sshll.u32 %s396_s27, 3  ;;  %v461_v29 = vld [vmem:[%s22792_s12] sm:$0xff]  ;;  %v22818_v38 = vpack.c.bf16 %v485_v28, %v482_v27  ;;  %v494_v44 = vand.u32 4294901760, %v416_v32  ;;  %v497_v45 = vand.u32 4294901760, %v417_v34  ;;  %v22855_v63 = vsub.f32 %v411_v19, %v479_v23 }
  0x2c   : > { %s398_s21 = scalar_lea.vmem %s25363_s1, %s14608_s11  ;;  %v500_v46 = vand.u32 4294901760, %v418_v35  ;;  %v503_v47 = vand.u32 4294901760, %v419_v36  ;;  %v506_v49 = vand.u32 4294901760, %v420_v41  ;;  %v509_v50 = vand.u32 4294901760, %v421_v42  ;;  %s23509_s23 = scalar_lea.vmem [#allocation4], %s22777_s22 }
  0x2d   : > { %v404_v33 = vld [vmem:[%s398_s21] sm:$0xff]  ;;  %25491 = vst [vmem:[#allocation8_spill] sm:$0xff] %v22818_v38  ;;  %v22836_v53 = vpack.c.bf16 %v491_v40, %v488_v39  ;;  %v557_v54 = vand.u32 4294901760, %v22826_v43  ;;  %v22844_v57 = vpack.c.bf16 %v497_v45, %v494_v44  ;;  %v564_v61 = vand.u32 4294901760, %v22831_v51 }
  0x2e   : > { %19963 = vmatpush3.bf16.msra.mxu0 %v22775_v21  ;;  %v462_v37 = vadd.f32 %v461_v29, %v404_v33  ;;  %v22846_v58 = vpack.c.bf16 %v503_v47, %v500_v46  ;;  %v22851_v60 = vpack.c.bf16 %v509_v50, %v506_v49  ;;  %v571_v62 = vand.u32 4294901760, %v22833_v52 }
  0x2f   : > { %19964 = vmatprep.subr.bf16.mxu0 %v25383_v11  ;;  %25492 = vst [vmem:[#allocation9_spill] sm:$0xff] %v22836_v53  ;;  %25493 = vst [vmem:[#allocation10_spill] sm:$0xff] %v22844_v57  ;;  %v558_v0 = vsub.f32 %v22826_v43, %v557_v54  ;;  %v578_v1 = vand.u32 4294901760, %v22839_v55  ;;  %v585_v2 = vand.u32 4294901760, %v22841_v56  ;;  %v22861_v3 = vsub.f32 %v412_v24, %v482_v27 }
  0x30   : > { %v22829_v48 = vand.u32 4294901760, %v462_v37  ;;  %25494 = vst [vmem:[#allocation11_spill] sm:$0xff] %v22846_v58  ;;  %25495 = vst [vmem:[#allocation12_spill] sm:$0xff] %v22851_v60  ;;  %v22864_v4 = vsub.f32 %v413_v25, %v485_v28  ;;  %v22866_v5 = vsub.f32 %v414_v30, %v488_v39  ;;  %v22868_v6 = vsub.f32 %v415_v31, %v491_v40 }
  0x31   : > { %v22870_v7 = vsub.f32 %v416_v32, %v494_v44  ;;  %v22873_v9 = vsub.f32 %v417_v34, %v497_v45  ;;  %v22875_v10 = vsub.f32 %v418_v35, %v500_v46  ;;  %v22877_v12 = vsub.f32 %v419_v36, %v503_v47 }
  0x32   : > { %19966 = vmatpush3.bf16.msra.mxu0 %v22789_v26  ;;  %v22849_v59 = vsub.f32 %v462_v37, %v22829_v48  ;;  %v565_v13 = vsub.f32 %v22831_v51, %v564_v61  ;;  %v572_v14 = vsub.f32 %v22833_v52, %v571_v62  ;;  %v22881_v15 = vsub.f32 %v420_v41, %v506_v49 }
  0x33   : > { %19967 = vmatprep.subr.bf16.mxu0 %v25383_v11  ;;  %v22883_v17 = vsub.f32 %v421_v42, %v509_v50  ;;  %v559_v18 = vand.u32 4294901760, %v558_v0  ;;  %v579_v19 = vsub.f32 %v22839_v55, %v578_v1  ;;  %v592_v22 = vand.u32 4294901760, %v22855_v63 }
  0x34   : > { %v546_v8 = vand.u32 4294901760, %v22849_v59  ;;  %v599_v23 = vand.u32 4294901760, %v22861_v3  ;;  %v606_v24 = vand.u32 4294901760, %v22864_v4  ;;  %v613_v25 = vand.u32 4294901760, %v22866_v5 }
  0x35   : > { %v620_v27 = vand.u32 4294901760, %v22868_v6  ;;  %v627_v28 = vand.u32 4294901760, %v22870_v7  ;;  %v634_v30 = vand.u32 4294901760, %v22873_v9  ;;  %v641_v31 = vand.u32 4294901760, %v22875_v10 }
  0x36   : > { %19969 = vmatpush3.bf16.msra.mxu0 %v22818_v38  ;;  %v547_v29 = vsub.f32 %v22849_v59, %v546_v8  ;;  %v648_v32 = vand.u32 4294901760, %v22877_v12  ;;  %v655_v33 = vand.u32 4294901760, %v22881_v15  ;;  %v662_v34 = vand.u32 4294901760, %v22883_v17 }
  0x37   : > { %19970 = vmatprep.subr.bf16.mxu0 %v25383_v11  ;;  %v22902_v35 = vpack.c.bf16 %v564_v61, %v557_v54  ;;  %v22904_v36 = vpack.c.bf16 %v578_v1, %v571_v62  ;;  %v566_v37 = vand.u32 4294901760, %v565_v13  ;;  %v22907_v39 = vpack.c.bf16 %v592_v22, %v585_v2 }
  0x38   : > { %v22909_v40 = vpack.c.bf16 %v606_v24, %v599_v23  ;;  %v22911_v41 = vpack.c.bf16 %v620_v27, %v613_v25  ;;  %v22914_v42 = vpack.c.bf16 %v634_v30, %v627_v28  ;;  %v22916_v44 = vpack.c.bf16 %v648_v32, %v641_v31 }
  0x39   : > { %25496 = vst [vmem:[#allocation13_spill] sm:$0xff] %v22902_v35  ;;  %25497 = vst [vmem:[#allocation14_spill] sm:$0xff] %v22904_v36  ;;  %v22918_v45 = vpack.c.bf16 %v662_v34, %v655_v33  ;;  %v548_v46 = vand.u32 4294901760, %v547_v29  ;;  %v586_v47 = vsub.f32 %v22841_v56, %v585_v2  ;;  %v22922_v49 = vpack.c.bf16 %v566_v37, %v559_v18 }
  0x3a   : > { %19972 = vmatpush3.bf16.msra.mxu0 %v22836_v53  ;;  %25498 = vst [vmem:[#allocation15_spill] sm:$0xff] %v22907_v39  ;;  %25499 = vst [vmem:[#allocation16_spill] sm:$0xff] %v22909_v40  ;;  %v573_v50 = vand.u32 4294901760, %v572_v14  ;;  %v580_v54 = vand.u32 4294901760, %v579_v19  ;;  %v593_v61 = vsub.f32 %v22855_v63, %v592_v22  ;;  %v600_v62 = vsub.f32 %v22861_v3, %v599_v23 }
  0x3b   : > { %19973 = vmatprep.subr.bf16.mxu0 %v25383_v11  ;;  %25500 = vst [vmem:[#allocation17_spill] sm:$0xff] %v22911_v41  ;;  %25501 = vst [vmem:[#allocation18_spill] sm:$0xff] %v22914_v42  ;;  %v607_v0 = vsub.f32 %v22864_v4, %v606_v24  ;;  %v587_v2 = vand.u32 4294901760, %v586_v47  ;;  %v614_v22 = vsub.f32 %v22866_v5, %v613_v25  ;;  %vm1112_vm1 = vcmask 1043456  }
  0x3c   : > { %25502 = vst [vmem:[#allocation19_spill] sm:$0xff] %v22916_v44  ;;  %25503 = vst [vmem:[#allocation20_spill] sm:$0xff] %v22918_v45  ;;  %v22929_v1 = vpack.c.bf16 %v580_v54, %v573_v50  ;;  %v594_v13 = vand.u32 4294901760, %v593_v61  ;;  %v601_v14 = vand.u32 4294901760, %v600_v62  ;;  %v621_v23 = vsub.f32 %v22868_v6, %v620_v27 }
  0x3d   : > { %v608_v18 = vand.u32 4294901760, %v607_v0  ;;  %v615_v29 = vand.u32 4294901760, %v614_v22  ;;  %v635_v47 = vsub.f32 %v22873_v9, %v634_v30  ;;  %v642_v50 = vsub.f32 %v22875_v10, %v641_v31 }
  0x3e   : > { %19975 = vmatpush3.bf16.msra.mxu0 %v22844_v57  ;;  %v22935_v19 = vpack.c.bf16 %v594_v13, %v587_v2  ;;  %v622_v37 = vand.u32 4294901760, %v621_v23  ;;  %v649_v61 = vsub.f32 %v22877_v12, %v648_v32  ;;  %v656_v0 = vsub.f32 %v22881_v15, %v655_v33  ;;  %v428_v23 = vld [vmem:[%s25366_s4 + $0x30] sm:$0xff] }
  0x3f   : > { %19976 = vmatprep.subr.bf16.mxu0 %v25383_v11  ;;  %v22940_v24 = vpack.c.bf16 %v608_v18, %v601_v14  ;;  %v636_v54 = vand.u32 4294901760, %v635_v47  ;;  %v643_v62 = vand.u32 4294901760, %v642_v50  ;;  %v663_v31 = vsub.f32 %v22883_v17, %v662_v34  ;;  %v430_v50 = vld [vmem:[%s25366_s4 + $0x40] sm:$0xff] }
  0x40   : > { %v22948_v25 = vpack.c.bf16 %v622_v37, %v615_v29  ;;  %v650_v30 = vand.u32 4294901760, %v649_v61  ;;  %v657_v13 = vand.u32 4294901760, %v656_v0  ;;  %v22969_v33 = vpack.c.bf16 %v22831_v51, %v22826_v43  ;;  %v429_v29 = vld [vmem:[%s25366_s4 + $0x38] sm:$0xff] }
  0x41   : > { %v664_v32 = vand.u32 4294901760, %v663_v31  ;;  %v22976_v34 = vpack.c.bf16 %v22839_v55, %v22833_v52  ;;  %v22984_v43 = vpack.c.bf16 %v22855_v63, %v22841_v56  ;;  %v22990_v51 = vpack.c.bf16 %v22864_v4, %v22861_v3  ;;  %v433_v0 = vld [vmem:[%s25366_s4 + $0x58] sm:$0xff] }
  0x42   : > { %19978 = vmatpush3.bf16.msra.mxu0 %v22846_v58  ;;  %v22959_v2 = vpack.c.bf16 %v650_v30, %v643_v62  ;;  %v22996_v52 = vpack.c.bf16 %v22868_v6, %v22866_v5  ;;  %v23002_v55 = vpack.c.bf16 %v22873_v9, %v22870_v7  ;;  %v23008_v56 = vpack.c.bf16 %v22877_v12, %v22875_v10  ;;  %v424_v6 = vld [vmem:[%s25366_s4 + $0x10] sm:$0xff]  ;;  %v426_v12 = vld [vmem:[%s25366_s4 + $0x20] sm:$0xff] }
  0x43   : > { %19979 = vmatprep.subr.bf16.mxu0 %v25383_v11  ;;  %v22963_v14 = vpack.c.bf16 %v664_v32, %v657_v13  ;;  %25504 = vst [vmem:[#allocation21_spill] sm:$0xff] %v22984_v43  ;;  %25505 = vst [vmem:[#allocation22_spill] sm:$0xff] %v22990_v51  ;;  %v23014_v63 = vpack.c.bf16 %v22883_v17, %v22881_v15  ;;  %v427_v15 = vld [vmem:[%s25366_s4 + $0x28] sm:$0xff]  ;;  %v1129_v17 = vand.u32 4294901760, %v426_v12  ;;  %v1135_v37 = vand.u32 4294901760, %v428_v23  ;;  %v432_v30 = vld [vmem:[%s25366_s4 + $0x50] sm:$0xff] }
  0x44   : > { %25506 = vst [vmem:[#allocation23_spill] sm:$0xff] %v22996_v52  ;;  %25507 = vst [vmem:[#allocation24_spill] sm:$0xff] %v23002_v55  ;;  %v1132_v18 = vand.u32 4294901760, %v427_v15  ;;  %v1147_v31 = vand.u32 4294901760, %v432_v30  ;;  %v1150_v13 = vand.u32 4294901760, %v433_v0  ;;  %vm1108_vm2 = vcmask 818176  }
  0x45   : > { %25508 = vst [vmem:[#allocation25_spill] sm:$0xff] %v23008_v56  ;;  %25509 = vst [vmem:[#allocation26_spill] sm:$0xff] %v23014_v63  ;;  %vm1726_vm3 = vcmask 1045504   ;;  %vm1722_vm4 = vcmask 244736  }
  0x46   : > { %19981 = vmatpush3.bf16.msra.mxu0 %v22851_v60  ;;  %v23122_v22 = vpack.c.bf16 %v1132_v18, %v1129_v17 }
  0x47   : > { %19982 = vmatprep.subr.bf16.mxu0 %v25383_v11 }
  0x49   : > { %16391 = vmatmul.mubr.f32.vlgmr.msra.gmra.mrb[0].mxu0 %v548_v46  ;;  %v628_v46 = vsub.f32 %v22870_v7, %v627_v28  ;;  %v425_v7 = vld [vmem:[%s25366_s4 + $0x18] sm:$0xff] }
  0x4a   : > { %19984 = vmatpush3.bf16.msra.mxu0 %v22922_v49  ;;  %16425 = vmatprep.mubr.msk.f32.mxu0 %vm22650_vm0, %v25371_v16  ;;  %v1126_v9 = vand.u32 4294901760, %v425_v7 }
  0x4b   : > { %19985 = vmatprep.subr.bf16.mxu0 %v25383_v11  ;;  %v629_v27 = vand.u32 4294901760, %v628_v46  ;;  %v1138_v46 = vand.u32 4294901760, %v429_v29 }
  0x4d   : > { %v22953_v28 = vpack.c.bf16 %v636_v54, %v629_v27  ;;  %v23132_v47 = vpack.c.bf16 %v1138_v46, %v1135_v37  ;;  %v431_v27 = vld [vmem:[%s25366_s4 + $0x48] sm:$0xff]  ;;  %v1141_v54 = vand.u32 4294901760, %v430_v50 }
  0x4e   : > { %19987 = vmatpush3.bf16.msra.mxu0 %v22929_v1  ;;  %v1144_v61 = vand.u32 4294901760, %v431_v27 }
  0x4f   : > { %19988 = vmatprep.subr.bf16.mxu0 %v25383_v11 }
  0x50   : > { %v23142_v62 = vpack.c.bf16 %v1144_v61, %v1141_v54 }
  0x52   : > { %19990 = vmatpush3.bf16.msra.mxu0 %v22935_v19 }
  0x53   : > { %19991 = vmatprep.subr.bf16.mxu0 %v25383_v11 }
  0x56   : > { %19993 = vmatpush3.bf16.msra.mxu0 %v22940_v24 }
  0x57   : > { %19994 = vmatprep.subr.bf16.mxu0 %v25383_v11 }
  0x5a   : > { %19996 = vmatpush3.bf16.msra.mxu0 %v22948_v25 }
  0x5b   : > { %19997 = vmatprep.subr.bf16.mxu0 %v25383_v11 }
  0x5e   : > { %19999 = vmatpush3.bf16.msra.mxu0 %v22953_v28 }
  0x5f   : > { %20000 = vmatprep.subr.bf16.mxu0 %v25383_v11 }
  0x62   : > { %20002 = vmatpush3.bf16.msra.mxu0 %v22959_v2 }
  0x63   : > { %20003 = vmatprep.subr.bf16.mxu0 %v25383_v11 }
  0x66   : > { %20005 = vmatpush3.bf16.msra.mxu0 %v22963_v14 }
  0x67   : > { %20006 = vmatprep.subr.bf16.mxu0 %v25383_v11 }
  0x69   : > { %16426 = vmatmul.mubr.f32.vlgmr.msra.gmra.mrb[0].mxu0 %v22829_v48 }
  0x6a   : > { %20008 = vmatpush3.bf16.msra.mxu0 %v22969_v33  ;;  %16460 = vmatprep.mubr.msk.f32.mxu0 %vm22650_vm0, %v25371_v16 }
  0x6b   : > { %20009 = vmatprep.subr.bf16.mxu0 %v25383_v11 }
  0x6e   : > { %20011 = vmatpush3.bf16.msra.mxu0 %v22976_v34 }
  0x6f   : > { %20012 = vmatprep.subr.bf16.mxu0 %v25383_v11 }
  0x72   : > { %20014 = vmatpush3.bf16.msra.mxu0 %v22984_v43 }
  0x73   : > { %20015 = vmatprep.subr.bf16.mxu0 %v25383_v11 }
  0x76   : > { %20017 = vmatpush3.bf16.msra.mxu0 %v22990_v51 }
  0x77   : > { %20018 = vmatprep.subr.bf16.mxu0 %v25383_v11 }
  0x7a   : > { %20020 = vmatpush3.bf16.msra.mxu0 %v22996_v52 }
  0x7b   : > { %20021 = vmatprep.subr.bf16.mxu0 %v25383_v11 }
  0x7e   : > { %20023 = vmatpush3.bf16.msra.mxu0 %v23002_v55 }
  0x7f   : > { %20024 = vmatprep.subr.bf16.mxu0 %v25383_v11 }
  0x82   : > { %20026 = vmatpush3.bf16.msra.mxu0 %v23008_v56 }
  0x83   : > { %20027 = vmatprep.subr.bf16.mxu0 %v25383_v11 }
  0x86   : > { %20029 = vmatpush3.bf16.msra.mxu0 %v23014_v63 }
  0x87   : > { %20030 = vmatprep.subr.bf16.mxu0 %v25383_v11 }
  0x89   : > { %16461 = vmatmul.mubr.f32.vlgmr.msra.gmra.mrb[0].mxu0 %v22849_v59  ;;  %v423_v59 = vld [vmem:[%s25366_s4 + $0x8] sm:$0xff] }
  0x8a   : > { %20032 = vmatpush3.bf16.msra.mxu0 %v22771_v20  ;;  %16495 = vmatprep.mubr.msk.f32.mxu0 %vm22650_vm0, %v25371_v16  ;;  %v1120_v4 = vand.u32 4294901760, %v423_v59 }
  0x8b   : > { %20033 = vmatprep.subr.bf16.mxu0 %v25383_v11 }
  0x8e   : > { %20035 = vmatpush3.bf16.msra.mxu0 %v22775_v21 }
  0x8f   : > { %20036 = vmatprep.subr.bf16.mxu0 %v25383_v11 }
  0x92   : > { %20038 = vmatpush3.bf16.msra.mxu0 %v22789_v26 }
  0x93   : > { %20039 = vmatprep.subr.bf16.mxu0 %v25383_v11 }
  0x96   : > { %20041 = vmatpush3.bf16.msra.mxu0 %v22818_v38 }
  0x97   : > { %20042 = vmatprep.subr.bf16.mxu0 %v25383_v11 }
  0x9a   : > { %20044 = vmatpush3.bf16.msra.mxu0 %v22836_v53 }
  0x9b   : > { %20045 = vmatprep.subr.bf16.mxu0 %v25383_v11 }
  0x9e   : > { %20047 = vmatpush3.bf16.msra.mxu0 %v22844_v57 }
  0x9f   : > { %20048 = vmatprep.subr.bf16.mxu0 %v25383_v11 }
  0xa2   : > { %20050 = vmatpush3.bf16.msra.mxu0 %v22846_v58 }
  0xa3   : > { %20051 = vmatprep.subr.bf16.mxu0 %v25383_v11 }
  0xa6   : > { %20053 = vmatpush3.bf16.msra.mxu0 %v22851_v60 }
  0xa7   : > { %20054 = vmatprep.subr.bf16.mxu0 %v25383_v11 }
  0xa9   : > { %16496 = vmatmul.mubr.f32.vlgmr.msra.gmra.mrb[0].mxu0 %v546_v8  ;;  %v1123_v8 = vand.u32 4294901760, %v424_v6 }
  0xaa   : > { %20056 = vmatpush3.bf16.msra.mxu0 %v22902_v35  ;;  %16530 = vmatprep.mubr.msk.f32.mxu0 %vm22650_vm0, %v25371_v16 }
  0xab   : > { %20057 = vmatprep.subr.bf16.mxu0 %v25383_v11  ;;  %v23112_v10 = vpack.c.bf16 %v1126_v9, %v1123_v8 }
  0xae   : > { %20059 = vmatpush3.bf16.msra.mxu0 %v22904_v36 }
  0xaf   : > { %20060 = vmatprep.subr.bf16.mxu0 %v25383_v11 }
  0xb2   : > { %20062 = vmatpush3.bf16.msra.mxu0 %v22907_v39  ;;  %v23178_v39 = vsub.f32 %v425_v7, %v1126_v9  ;;  %v23192_v7 = vsub.f32 %v426_v12, %v1129_v17  ;;  %v23206_v12 = vsub.f32 %v428_v23, %v1135_v37 }
  0xb3   : > { %20063 = vmatprep.subr.bf16.mxu0 %v25383_v11 }
  0xb6   : > { %20065 = vmatpush3.bf16.msra.mxu0 %v22909_v40 }
  0xb7   : > { %20066 = vmatprep.subr.bf16.mxu0 %v25383_v11 }
  0xba   : > { %20068 = vmatpush3.bf16.msra.mxu0 %v22911_v41 }
  0xbb   : > { %20069 = vmatprep.subr.bf16.mxu0 %v25383_v11 }
  0xbe   : > { %20071 = vmatpush3.bf16.msra.mxu0 %v22914_v42 }
  0xbf   : > { %20072 = vmatprep.subr.bf16.mxu0 %v25383_v11 }
  0xc2   : > { %20074 = vmatpush3.bf16.msra.mxu0 %v22916_v44  ;;  %v434_v44 = vld [vmem:[%s25366_s4 + $0x60] sm:$0xf] }
  0xc3   : > { %20075 = vmatprep.subr.bf16.mxu0 %v25383_v11  ;;  %v23163_v40 = vsel %vm1112_vm1, %v434_v44, 0 }
  0xc6   : > { %20077 = vmatpush3.bf16.msra.mxu0 %v22918_v45  ;;  %v23156_v45 = vpack.c.bf16 %v1150_v13, %v1147_v31 }
  0xc7   : > { %20078 = vmatprep.subr.bf16.mxu0 %v25383_v11 }
  0xc9   : > { %16531 = vmatmul.mubr.f32.vlgmr.msra.gmra.mrb[0].mxu0 %v22829_v48 }
  0xca   : > { %20080 = vmatpush3.bf16.msra.mxu0 %v22771_v20  ;;  %16565 = vmatprep.mubr.msk.f32.mxu0 %vm22650_vm0, %v25371_v16 }
  0xcb   : > { %20081 = vmatprep.subr.bf16.mxu0 %v25383_v11 }
  0xce   : > { %20083 = vmatpush3.bf16.msra.mxu0 %v22775_v21 }
  0xcf   : > { %20084 = vmatprep.subr.bf16.mxu0 %v25383_v11 }
  0xd2   : > { %20086 = vmatpush3.bf16.msra.mxu0 %v22789_v26 }
  0xd3   : > { %20087 = vmatprep.subr.bf16.mxu0 %v25383_v11 }
  0xd6   : > { %20089 = vmatpush3.bf16.msra.mxu0 %v22818_v38 }
  0xd7   : > { %20090 = vmatprep.subr.bf16.mxu0 %v25383_v11 }
  0xda   : > { %20092 = vmatpush3.bf16.msra.mxu0 %v22836_v53 }
  0xdb   : > { %20093 = vmatprep.subr.bf16.mxu0 %v25383_v11 }
  0xde   : > { %20095 = vmatpush3.bf16.msra.mxu0 %v22844_v57 }
  0xdf   : > { %20096 = vmatprep.subr.bf16.mxu0 %v25383_v11 }
  0xe2   : > { %20098 = vmatpush3.bf16.msra.mxu0 %v22846_v58 }
  0xe3   : > { %20099 = vmatprep.subr.bf16.mxu0 %v25383_v11 }
  0xe6   : > { %20101 = vmatpush3.bf16.msra.mxu0 %v22851_v60 }
  0xe7   : > { %20246 = vmatprep.subr.bf16.mxu0 %v25383_v11 }
  0xe9   : > { %16566 = vmatmul.mubr.f32.vlgmr.msra.gmra.mrb[0].mxu0 %v22829_v48  ;;  %v422_v48 = vld [vmem:[%s25366_s4] sm:$0xff] }
  0xea   : > { %20248 = vmatpush3.bf16.msra.mxu0 %v22771_v20  ;;  %16840 = vmatprep.mubr.msk.f32.mxu0 %vm22650_vm0, %v25371_v16  ;;  %v1117_v3 = vand.u32 4294901760, %v422_v48  ;;  %v23153_v16 = vsub.f32 %v423_v59, %v1120_v4 }
  0xeb   : > { %20249 = vmatprep.subr.bf16.mxu0 %v25383_v11 }
  0xec   : > { %v23102_v5 = vpack.c.bf16 %v1120_v4, %v1117_v3  ;;  %v23151_v32 = vsub.f32 %v422_v48, %v1117_v3  ;;  %v25396_v41 = vand.u32 4294901760, %v23153_v16  ;;  %v23167_v48 = vand.u32 4294901760, %v23163_v40 }
  0xed   : > { %v25510_v4 = vmov 0.0  }
  0xee   : > { %20251 = vmatpush3.bf16.msra.mxu0 %v22775_v21  ;;  %20104 = vmatpush3.bf16.msra.mxu1 %v23102_v5  ;;  %v25395_v42 = vand.u32 4294901760, %v23151_v32  ;;  %v1215_v3 = vsub.f32 %v23153_v16, %v25396_v41 }
  0xef   : > { %20252 = vmatprep.subr.bf16.mxu0 %v25383_v11  ;;  %20105 = vmatprep.subr.bf16.mxu1 %v25383_v11 }
  0xf0   : > { %v1208_v59 = vsub.f32 %v23151_v32, %v25395_v42  ;;  %v1216_v36 = vand.u32 4294901760, %v1215_v3  ;;  %v25512_v42 = vmov 0.0|0.0   ;;  %v25399_v3 = vand.u32 4294901760, %v23192_v7 }
  0xf2   : > { %20254 = vmatpush3.bf16.msra.mxu0 %v22789_v26  ;;  %20107 = vmatpush3.bf16.msra.mxu1 %v23112_v10  ;;  %v1209_v44 = vand.u32 4294901760, %v1208_v59 }
  0xf3   : > { %20255 = vmatprep.subr.bf16.mxu0 %v25383_v11  ;;  %20108 = vmatprep.subr.bf16.mxu1 %v25383_v11 }
  0xf6   : > { %20257 = vmatpush3.bf16.msra.mxu0 %v22818_v38  ;;  %20110 = vmatpush3.bf16.msra.mxu1 %v23122_v22 }
  0xf7   : > { %20258 = vmatprep.subr.bf16.mxu0 %v25383_v11  ;;  %20111 = vmatprep.subr.bf16.mxu1 %v25383_v11 }
  0xfa   : > { %20260 = vmatpush3.bf16.msra.mxu0 %v22836_v53  ;;  %20113 = vmatpush3.bf16.msra.mxu1 %v23132_v47 }
  0xfb   : > { %20261 = vmatprep.subr.bf16.mxu0 %v25383_v11  ;;  %20114 = vmatprep.subr.bf16.mxu1 %v25383_v11 }
  0xfe   : > { %20263 = vmatpush3.bf16.msra.mxu0 %v22844_v57  ;;  %20116 = vmatpush3.bf16.msra.mxu1 %v23142_v62  ;;  %v23219_v57 = vsub.f32 %v431_v27, %v1144_v61  ;;  %v23232_v27 = vsub.f32 %v432_v30, %v1147_v31 }
  0xff   : > { %20264 = vmatprep.subr.bf16.mxu0 %v25383_v11  ;;  %20117 = vmatprep.subr.bf16.mxu1 %v25383_v11 }
 0x102   : > { %20266 = vmatpush3.bf16.msra.mxu0 %v22846_v58  ;;  %20119 = vmatpush3.bf16.msra.mxu1 %v23156_v45  ;;  %v23183_v58 = vpack.c.bf16 %v1216_v36, %v1209_v44 }
 0x103   : > { %20267 = vmatprep.subr.bf16.mxu0 %v25383_v11  ;;  %16592 = vmatprep.subr.mxu1 %v25510_v4 }
 0x104   : > { %25511 = vst [vmem:[#allocation27_spill] sm:$0xff] %v23183_v58 }
 0x106   : > { %20269 = vmatpush3.bf16.msra.mxu0 %v22851_v60  ;;  %v25398_v60 = vand.u32 4294901760, %v23178_v39  ;;  %16593 = vmatpush3.msra.mxu1 %v23167_v48 }
 0x107   : > { %20270 = vmatprep.subr.bf16.mxu0 %v25383_v11  ;;  %v23176_v11 = vsub.f32 %v424_v6, %v1123_v8  ;;  %20120 = vmatprep.subr.bf16.mxu1 %v25512_v42  ;;  %v23194_v8 = vsub.f32 %v427_v15, %v1132_v18  ;;  %v23208_v15 = vsub.f32 %v429_v29, %v1138_v46  ;;  %v25407_v18 = vand.u32 4294901760, %v23206_v12 }
 0x108   : > { %v1229_v6 = vsub.f32 %v23178_v39, %v25398_v60  ;;  %v25406_v29 = vand.u32 4294901760, %v23219_v57 }
 0x109   : > { %v25397_v35 = vand.u32 4294901760, %v23176_v11  ;;  %v25408_v36 = vand.u32 4294901760, %v23194_v8 }
 0x10a   : > { %v1230_v59 = vand.u32 4294901760, %v1229_v6  ;;  %v25402_v6 = vand.u32 4294901760, %v23208_v15 }
 0x10b   : > { %v1222_v41 = vsub.f32 %v23176_v11, %v25397_v35  ;;  %v1236_v35 = vsub.f32 %v23192_v7, %v25399_v3  ;;  %v1243_v60 = vsub.f32 %v23194_v8, %v25408_v36  ;;  %v23217_v3 = vsub.f32 %v430_v50, %v1141_v54 }
 0x10c   : > { %v1257_v23 = vsub.f32 %v23208_v15, %v25402_v6  ;;  %v1271_v50 = vsub.f32 %v23219_v57, %v25406_v29  ;;  %v23234_v54 = vsub.f32 %v433_v0, %v1150_v13 }
 0x10d   : > { %v1223_v9 = vand.u32 4294901760, %v1222_v41  ;;  %v1237_v41 = vand.u32 4294901760, %v1236_v35  ;;  %v1244_v17 = vand.u32 4294901760, %v1243_v60  ;;  %v25403_v60 = vand.u32 4294901760, %v23217_v3 }
 0x10e   : > { %v1258_v37 = vand.u32 4294901760, %v1257_v23  ;;  %v25404_v23 = vand.u32 4294901760, %v23234_v54 }
 0x10f   : > { %v23198_v44 = vpack.c.bf16 %v1230_v59, %v1223_v9  ;;  %v23212_v9 = vpack.c.bf16 %v1244_v17, %v1237_v41  ;;  %v1250_v59 = vsub.f32 %v23206_v12, %v25407_v18  ;;  %v1264_v46 = vsub.f32 %v23217_v3, %v25403_v60 }
 0x110   : > { %v1272_v17 = vand.u32 4294901760, %v1271_v50  ;;  %v1285_v30 = vsub.f32 %v23234_v54, %v25404_v23  ;;  %v23264_v50 = vpack.c.bf16 %v23208_v15, %v23206_v12 }
 0x111   : > { %25513 = vst [vmem:[#allocation28_spill] sm:$0xff] %v23198_v44  ;;  %25514 = vst [vmem:[#allocation29_spill] sm:$0xff] %v23212_v9  ;;  %v1251_v35 = vand.u32 4294901760, %v1250_v59  ;;  %v1265_v41 = vand.u32 4294901760, %v1264_v46  ;;  %v25405_v59 = vand.u32 4294901760, %v23232_v27  ;;  %v23260_v46 = vpack.c.bf16 %v23194_v8, %v23192_v7 }
 0x112   : > { %v1286_v31 = vand.u32 4294901760, %v1285_v30  ;;  %25521 = vst [vmem:[#allocation36_spill] sm:$0xff] %v23264_v50 }
 0x113   : > { %v23236_v61 = vpack.c.bf16 %v1258_v37, %v1251_v35  ;;  %v23240_v6 = vpack.c.bf16 %v1272_v17, %v1265_v41  ;;  %v1278_v60 = vsub.f32 %v23232_v27, %v25405_v59  ;;  %v23252_v35 = vpack.c.bf16 %v23153_v16, %v23151_v32  ;;  %25520 = vst [vmem:[#allocation35_spill] sm:$0xff] %v23260_v46  ;;  %v23277_v17 = vld [vmem:[%s25365_s3] ss:$0 sm:$0xff] }
 0x114   : > { %v23256_v37 = vpack.c.bf16 %v23178_v39, %v23176_v11  ;;  %v23272_v41 = vpack.c.bf16 %v23234_v54, %v23232_v27 }
 0x115   : > { %25515 = vst [vmem:[#allocation30_spill] sm:$0xff] %v23236_v61  ;;  %25516 = vst [vmem:[#allocation31_spill] sm:$0xff] %v23240_v6  ;;  %v1279_v0 = vand.u32 4294901760, %v1278_v60  ;;  %v23268_v60 = vpack.c.bf16 %v23219_v57, %v23217_v3 }
 0x116   : > { %25518 = vst [vmem:[#allocation33_spill] sm:$0xff] %v23252_v35  ;;  %25519 = vst [vmem:[#allocation34_spill] sm:$0xff] %v23256_v37 }
 0x117   : > { %v23248_v13 = vpack.c.bf16 %v1286_v31, %v1279_v0  ;;  %25522 = vst [vmem:[#allocation37_spill] sm:$0xff] %v23268_v60  ;;  %25523 = vst [vmem:[#allocation38_spill] sm:$0xff] %v23272_v41 }
 0x119   : > { %25517 = vst [vmem:[#allocation32_spill] sm:$0xff] %v23248_v13 }
 0x1bc   : > { %v1100_v30 = vpop.f32.mrb[0].mxu0 }
 0x1bd   : > { %v22262_v0 = vadd.f32 %v23277_v17, %v1100_v30  ;;  %v16567_v31 = vpop.f32.mrb[1].mxu0 }
 0x1bf   : > { %v1104_v23 = vand.u32 2147483647, %v22262_v0 }
 0x1c1   : > { %v1105_v59 = vadd.f32 1.0, %v1104_v23  ;;  %v25531_v23 = vand.u32 4294901760, %v23178_v39  ;;  %v25537_v39 = vand.u32 4294901760, %v23208_v15  ;;  %v25543_v15 = vand.u32 4294901760, %v23234_v54 }
 0x1c3   : > { %22568 = vrcp.f32 %v1105_v59  ;;  %v25530_v59 = vand.u32 4294901760, %v23176_v11  ;;  %v25536_v11 = vand.u32 4294901760, %v23206_v12  ;;  %v25542_v12 = vand.u32 4294901760, %v23232_v27 }
 0x1c5   : > { %v23355_v30 = vpack.c.bf16 %v25531_v23, %v25530_v59  ;;  %v437_v23 = vld [vmem:[%s25368_s6 + $0x10] sm:$0xff] }
 0x1c7   : > { %25532 = vst [vmem:[#allocation43_spill] sm:$0xff] %v23355_v30 }
 0x1cd   : > { %v22569_v29 = vpop.eup %22568 }
 0x1ce   : > { %v1107_v18 = vmul.f32 %v22569_v29, %v22262_v0  ;;  %v23373_v0 = vpack.c.bf16 %v25537_v39, %v25536_v11 }
 0x1d0   : > { %v1110_v36 = vsel %vm1108_vm2, %v1107_v18, 0  ;;  %v25528_v18 = vand.u32 4294901760, %v23153_v16  ;;  %v25533_v16 = vand.u32 4294901760, %v23192_v7  ;;  %25538 = vst [vmem:[#allocation45_spill] sm:$0xff] %v23373_v0  ;;  %v25539_v7 = vand.u32 4294901760, %v23217_v3  ;;  %v436_v3 = vld [vmem:[%s25368_s6 + $0x8] sm:$0xff] }
 0x1d1   : > { %v23281_v53 = vand.u32 4294901760, %v1110_v36  ;;  %v1734_v54 = vand.u32 4294901760, %v436_v3 }
 0x1d3   : > { %v1195_v38 = vsub.f32 %v1110_v36, %v23281_v53  ;;  %v23293_v36 = vsub.f32 %v23163_v40, %v23167_v48  ;;  %v1818_v59 = vsub.f32 %v436_v3, %v1734_v54 }
 0x1d5   : > { %v1196_v26 = vand.u32 4294901760, %v1195_v38  ;;  %25524 = vst [vmem:[#allocation39_spill] sm:$0xff] %v23293_v36 }
 0x1d7   : > { %v1197_v21 = vsub.f32 %v1195_v38, %v1196_v26 }
 0x1d9   : > { %v1198_v20 = vand.u32 4294901760, %v1197_v21 }
 0x1db   : > { %16595 = vmatmul.mubr.f32.vlgmr.msra.gmra.mrb[0].mxu1 %v1198_v20  ;;  %v23298_v20 = vand.u32 4294901760, %v23293_v36 }
 0x1dc   : > { %20122 = vmatpush3.bf16.msra.mxu1 %v23183_v58  ;;  %16623 = vmatprep.mubr.msk.f32.mxu1 %vm22650_vm0, %v25510_v4 }
 0x1dd   : > { %20123 = vmatprep.subr.bf16.mxu1 %v25512_v42  ;;  %25525 = vst [vmem:[#allocation40_spill] sm:$0xff] %v23298_v20  ;;  %v1292_v21 = vsub.f32 %v23293_v36, %v23298_v20 }
 0x1df   : > { %v23306_v40 = vand.u32 4294901760, %v1292_v21  ;;  %v23389_v21 = vpack.c.bf16 %v25543_v15, %v25542_v12 }
 0x1e0   : > { %20125 = vmatpush3.bf16.msra.mxu1 %v23198_v44 }
 0x1e1   : > { %20126 = vmatprep.subr.bf16.mxu1 %v25512_v42  ;;  %25526 = vst [vmem:[#allocation41_spill] sm:$0xff] %v23306_v40  ;;  %25544 = vst [vmem:[#allocation47_spill] sm:$0xff] %v23389_v21 }
 0x1e4   : > { %20128 = vmatpush3.bf16.msra.mxu1 %v23212_v9 }
 0x1e5   : > { %20129 = vmatprep.subr.bf16.mxu1 %v25512_v42 }
 0x1e8   : > { %20131 = vmatpush3.bf16.msra.mxu1 %v23236_v61 }
 0x1e9   : > { %20132 = vmatprep.subr.bf16.mxu1 %v25512_v42 }
 0x1ec   : > { %20134 = vmatpush3.bf16.msra.mxu1 %v23240_v6 }
 0x1ed   : > { %20135 = vmatprep.subr.bf16.mxu1 %v25512_v42 }
 0x1f0   : > { %20137 = vmatpush3.bf16.msra.mxu1 %v23248_v13 }
 0x1f1   : > { %16621 = vmatprep.subr.mxu1 %v25510_v4 }
 0x1f4   : > { %16622 = vmatpush3.msra.mxu1 %v23306_v40 }
 0x1f5   : > { %16624 = vmatmul.mubr.f32.vlgmr.msra.gmra.mrb[0].mxu1 %v23281_v53  ;;  %20138 = vmatprep.subr.bf16.mxu1 %v25512_v42 }
 0x1f6   : > { %20140 = vmatpush3.bf16.msra.mxu1 %v23252_v35  ;;  %16652 = vmatprep.mubr.msk.f32.mxu1 %vm22650_vm0, %v25510_v4 }
 0x1f7   : > { %20141 = vmatprep.subr.bf16.mxu1 %v25512_v42 }
 0x1fa   : > { %20143 = vmatpush3.bf16.msra.mxu1 %v23256_v37 }
 0x1fb   : > { %20144 = vmatprep.subr.bf16.mxu1 %v25512_v42 }
 0x1fe   : > { %20146 = vmatpush3.bf16.msra.mxu1 %v23260_v46 }
 0x1ff   : > { %20147 = vmatprep.subr.bf16.mxu1 %v25512_v42 }
 0x202   : > { %20149 = vmatpush3.bf16.msra.mxu1 %v23264_v50 }
 0x203   : > { %20150 = vmatprep.subr.bf16.mxu1 %v25512_v42 }
 0x206   : > { %20152 = vmatpush3.bf16.msra.mxu1 %v23268_v60 }
 0x207   : > { %20153 = vmatprep.subr.bf16.mxu1 %v25512_v42 }
 0x20a   : > { %20155 = vmatpush3.bf16.msra.mxu1 %v23272_v41 }
 0x20b   : > { %16650 = vmatprep.subr.mxu1 %v25510_v4 }
 0x20e   : > { %16651 = vmatpush3.msra.mxu1 %v23293_v36 }
 0x20f   : > { %16653 = vmatmul.mubr.f32.vlgmr.msra.gmra.mrb[0].mxu1 %v1195_v38  ;;  %20156 = vmatprep.subr.bf16.mxu1 %v25512_v42  ;;  %v25527_v38 = vand.u32 4294901760, %v23151_v32 }
 0x210   : > { %20158 = vmatpush3.bf16.msra.mxu1 %v23102_v5  ;;  %16681 = vmatprep.mubr.msk.f32.mxu1 %vm22650_vm0, %v25510_v4 }
 0x211   : > { %20159 = vmatprep.subr.bf16.mxu1 %v25512_v42  ;;  %v23346_v29 = vpack.c.bf16 %v25528_v18, %v25527_v38 }
 0x213   : > { %25529 = vst [vmem:[#allocation42_spill] sm:$0xff] %v23346_v29 }
 0x214   : > { %20161 = vmatpush3.bf16.msra.mxu1 %v23112_v10 }
 0x215   : > { %20162 = vmatprep.subr.bf16.mxu1 %v25512_v42 }
 0x218   : > { %20164 = vmatpush3.bf16.msra.mxu1 %v23122_v22 }
 0x219   : > { %20165 = vmatprep.subr.bf16.mxu1 %v25512_v42 }
 0x21c   : > { %20167 = vmatpush3.bf16.msra.mxu1 %v23132_v47 }
 0x21d   : > { %20168 = vmatprep.subr.bf16.mxu1 %v25512_v42 }
 0x220   : > { %20170 = vmatpush3.bf16.msra.mxu1 %v23142_v62 }
 0x221   : > { %20171 = vmatprep.subr.bf16.mxu1 %v25512_v42 }
 0x224   : > { %20173 = vmatpush3.bf16.msra.mxu1 %v23156_v45 }
 0x225   : > { %16679 = vmatprep.subr.mxu1 %v25510_v4 }
 0x228   : > { %16680 = vmatpush3.msra.mxu1 %v23167_v48 }
 0x229   : > { %16682 = vmatmul.mubr.f32.vlgmr.msra.gmra.mrb[0].mxu1 %v1196_v26  ;;  %20174 = vmatprep.subr.bf16.mxu1 %v25512_v42  ;;  %v25534_v26 = vand.u32 4294901760, %v23194_v8  ;;  %v25540_v8 = vand.u32 4294901760, %v23219_v57  ;;  %v435_v57 = vld [vmem:[%s25368_s6] sm:$0xff] }
 0x22a   : > { %20176 = vmatpush3.bf16.msra.mxu1 %v23346_v29  ;;  %16710 = vmatprep.mubr.msk.f32.mxu1 %vm22650_vm0, %v25510_v4  ;;  %v1731_v27 = vand.u32 4294901760, %v435_v57 }
 0x22b   : > { %20177 = vmatprep.subr.bf16.mxu1 %v25512_v42  ;;  %v23365_v32 = vpack.c.bf16 %v25534_v26, %v25533_v16  ;;  %v23381_v31 = vpack.c.bf16 %v25540_v8, %v25539_v7  ;;  %v1737_v26 = vand.u32 4294901760, %v437_v23  ;;  %v1819_v7 = vand.u32 4294901760, %v1818_v59 }
 0x22c   : > { %v23422_v38 = vpack.c.bf16 %v1734_v54, %v1731_v27  ;;  %v1811_v18 = vsub.f32 %v435_v57, %v1731_v27 }
 0x22d   : > { %25535 = vst [vmem:[#allocation44_spill] sm:$0xff] %v23365_v32  ;;  %25541 = vst [vmem:[#allocation46_spill] sm:$0xff] %v23381_v31  ;;  %v1820_v15 = vsub.f32 %v1818_v59, %v1819_v7 }
 0x22e   : > { %20179 = vmatpush3.bf16.msra.mxu1 %v23355_v30  ;;  %v1812_v39 = vand.u32 4294901760, %v1811_v18  ;;  %v23440_v36 = vpack.c.bf16 %v1818_v59, %v1811_v18 }
 0x22f   : > { %20180 = vmatprep.subr.bf16.mxu1 %v25512_v42  ;;  %v1821_v27 = vand.u32 4294901760, %v1820_v15 }
 0x230   : > { %v1813_v12 = vsub.f32 %v1811_v18, %v1812_v39 }
 0x232   : > { %20182 = vmatpush3.bf16.msra.mxu1 %v23365_v32  ;;  %v1814_v3 = vand.u32 4294901760, %v1813_v12 }
 0x233   : > { %20183 = vmatprep.subr.bf16.mxu1 %v25512_v42 }
 0x236   : > { %20185 = vmatpush3.bf16.msra.mxu1 %v23373_v0 }
 0x237   : > { %20186 = vmatprep.subr.bf16.mxu1 %v25512_v42 }
 0x23a   : > { %20188 = vmatpush3.bf16.msra.mxu1 %v23381_v31 }
 0x23b   : > { %20189 = vmatprep.subr.bf16.mxu1 %v25512_v42 }
 0x23e   : > { %20191 = vmatpush3.bf16.msra.mxu1 %v23389_v21  ;;  %v23436_v21 = vpack.c.bf16 %v1821_v27, %v1814_v3  ;;  %v23504_v27 = vld [vmem:[%s25369_s7] ss:$0 sm:$0xff] }
 0x23f   : > { %16708 = vmatprep.subr.mxu1 %v25510_v4 }
 0x242   : > { %16709 = vmatpush3.msra.mxu1 %v23298_v20  ;;  %v1825_v20 = vsub.f32 %v437_v23, %v1737_v26 }
 0x243   : > { %16711 = vmatmul.mubr.f32.vlgmr.msra.gmra.mrb[0].mxu1 %v23281_v53  ;;  %20192 = vmatprep.subr.bf16.mxu1 %v25512_v42 }
 0x244   : > { %20194 = vmatpush3.bf16.msra.mxu1 %v23102_v5  ;;  %16739 = vmatprep.mubr.msk.f32.mxu1 %vm22650_vm0, %v25510_v4  ;;  %v1826_v54 = vand.u32 4294901760, %v1825_v20 }
 0x245   : > { %20195 = vmatprep.subr.bf16.mxu1 %v25512_v42 }
 0x246   : > { %v1827_v31 = vsub.f32 %v1825_v20, %v1826_v54 }
 0x248   : > { %20197 = vmatpush3.bf16.msra.mxu1 %v23112_v10  ;;  %v1828_v32 = vand.u32 4294901760, %v1827_v31 }
 0x249   : > { %20198 = vmatprep.subr.bf16.mxu1 %v25512_v42 }
 0x24c   : > { %20200 = vmatpush3.bf16.msra.mxu1 %v23122_v22 }
 0x24d   : > { %20201 = vmatprep.subr.bf16.mxu1 %v25512_v42 }
 0x250   : > { %20203 = vmatpush3.bf16.msra.mxu1 %v23132_v47 }
 0x251   : > { %20204 = vmatprep.subr.bf16.mxu1 %v25512_v42 }
 0x254   : > { %20206 = vmatpush3.bf16.msra.mxu1 %v23142_v62 }
 0x255   : > { %20207 = vmatprep.subr.bf16.mxu1 %v25512_v42 }
 0x258   : > { %20209 = vmatpush3.bf16.msra.mxu1 %v23156_v45 }
 0x259   : > { %16737 = vmatprep.subr.mxu1 %v25510_v4 }
 0x25c   : > { %16738 = vmatpush3.msra.mxu1 %v23167_v48 }
 0x25d   : > { %16740 = vmatmul.mubr.f32.vlgmr.msra.gmra.mrb[0].mxu1 %v23281_v53  ;;  %20210 = vmatprep.subr.bf16.mxu1 %v25512_v42  ;;  %v438_v53 = vld [vmem:[%s25368_s6 + $0x18] sm:$0x3f] }
 0x25e   : > { %16750 = vmatprep.mubr.msk.f32.mxu1 %vm22650_vm0, %v25510_v4  ;;  %v1728_v16 = vsel %vm1726_vm3, %v438_v53, 0  ;;  %20212 = vmatpush3.bf16.msra.mxu1 %v23422_v38 }
 0x25f   : > { %v1740_v11 = vand.u32 4294901760, %v1728_v16  ;;  %20213 = vmatprep.subr.bf16.mxu1 %v25512_v42 }
 0x261   : > { %v23432_v8 = vpack.c.bf16 %v1740_v11, %v1737_v26  ;;  %v1832_v57 = vsub.f32 %v1728_v16, %v1740_v11  ;;  %v23444_v16 = vpack.c.bf16 %v1819_v7, %v1812_v39  ;;  %v23451_v11 = vld [vmem:[%s25367_s5] ss:$0 sm:$0xff] }
 0x263   : > { %20215 = vmatpush3.bf16.msra.mxu1 %v23432_v8  ;;  %v1833_v53 = vand.u32 4294901760, %v1832_v57  ;;  %v23442_v23 = vpack.c.bf16 %v1832_v57, %v1825_v20 }
 0x264   : > { %20216 = vmatprep.subr.bf16.mxu1 %v25512_v42 }
 0x265   : > { %v1834_v0 = vsub.f32 %v1832_v57, %v1833_v53  ;;  %v23446_v26 = vpack.c.bf16 %v1833_v53, %v1826_v54  ;;  %v14612_v53 = vld [vmem:[%s22792_s12 + $0x8] sm:$0xff] }
 0x267   : > { %v1835_v30 = vand.u32 4294901760, %v1834_v0 }
 0x269   : > { %v23438_v29 = vpack.c.bf16 %v1835_v30, %v1828_v32 }
 0x330   : > { %v1714_v12 = vpop.f32.mrb[0].mxu1 }
 0x331   : > { %v22263_v15 = vadd.f32 %v23451_v11, %v1714_v12  ;;  %v16741_v31 = vpop.f32.mrb[1].mxu1 }
 0x333   : > { %v1718_v0 = vand.u32 2147483647, %v22263_v15 }
 0x335   : > { %v1719_v30 = vadd.f32 1.0, %v1718_v0 }
 0x337   : > { %22570 = vrcp.f32 %v1719_v30 }
 0x341   : > { %v22571_v32 = vpop.eup %22570 }
 0x342   : > { %v1721_v20 = vmul.f32 %v22571_v32, %v22263_v15 }
 0x344   : > { %v1724_v18 = vsel %vm1722_vm4, %v1721_v20, 0 }
 0x345   : > { %v1799_v59 = vand.u32 4294901760, %v1724_v18 }
 0x347   : > { %v1800_v39 = vsub.f32 %v1724_v18, %v1799_v59 }
 0x349   : > { %v1801_v7 = vand.u32 4294901760, %v1800_v39 }
 0x34b   : > { %v1802_v57 = vsub.f32 %v1800_v39, %v1801_v7 }
 0x34d   : > { %v1803_v3 = vand.u32 4294901760, %v1802_v57  ;;  %v25548_v57 = vld [vmem:[#allocation8_spill] sm:$0xff] }
 0x34f   : > { %16751 = vmatmul.mubr.f32.vlgmr.msra.gmra.mrb[2].mxu1 %v1803_v3  ;;  %v25549_v3 = vld [vmem:[#allocation9_spill] sm:$0xff] }
 0x350   : > { %20218 = vmatpush3.bf16.msra.mxu1 %v23436_v21  ;;  %16761 = vmatprep.mubr.msk.f32.mxu1 %vm22650_vm0, %v25510_v4 }
 0x351   : > { %20219 = vmatprep.subr.bf16.mxu1 %v25512_v42 }
 0x354   : > { %20221 = vmatpush3.bf16.msra.mxu1 %v23438_v29 }
 0x355   : > { %20222 = vmatprep.subr.bf16.mxu1 %v25512_v42 }
 0x357   : > { %16762 = vmatmul.mubr.f32.vlgmr.msra.gmra.mrb[2].mxu1 %v1799_v59 }
 0x358   : > { %20224 = vmatpush3.bf16.msra.mxu1 %v23440_v36  ;;  %16772 = vmatprep.mubr.msk.f32.mxu1 %vm22650_vm0, %v25510_v4 }
 0x359   : > { %20225 = vmatprep.subr.bf16.mxu1 %v25512_v42 }
 0x35c   : > { %20227 = vmatpush3.bf16.msra.mxu1 %v23442_v23 }
 0x35d   : > { %20228 = vmatprep.subr.bf16.mxu1 %v25512_v42 }
 0x35f   : > { %16773 = vmatmul.mubr.f32.vlgmr.msra.gmra.mrb[2].mxu1 %v1800_v39  ;;  %v25546_v39 = vld [vmem:[#allocation6_spill] sm:$0xff] }
 0x360   : > { %20230 = vmatpush3.bf16.msra.mxu1 %v23422_v38  ;;  %16783 = vmatprep.mubr.msk.f32.mxu1 %vm22650_vm0, %v25510_v4 }
 0x361   : > { %20231 = vmatprep.subr.bf16.mxu1 %v25512_v42 }
 0x364   : > { %20233 = vmatpush3.bf16.msra.mxu1 %v23432_v8 }
 0x365   : > { %20234 = vmatprep.subr.bf16.mxu1 %v25512_v42 }
 0x367   : > { %16784 = vmatmul.mubr.f32.vlgmr.msra.gmra.mrb[2].mxu1 %v1801_v7  ;;  %v25547_v7 = vld [vmem:[#allocation7_spill] sm:$0xff] }
 0x368   : > { %20236 = vmatpush3.bf16.msra.mxu1 %v23444_v16  ;;  %16794 = vmatprep.mubr.msk.f32.mxu1 %vm22650_vm0, %v25510_v4 }
 0x369   : > { %20237 = vmatprep.subr.bf16.mxu1 %v25512_v42 }
 0x36c   : > { %20239 = vmatpush3.bf16.msra.mxu1 %v23446_v26 }
 0x36d   : > { %20240 = vmatprep.subr.bf16.mxu1 %v25512_v42 }
 0x36f   : > { %16795 = vmatmul.mubr.f32.vlgmr.msra.gmra.mrb[2].mxu1 %v1799_v59 }
 0x370   : > { %20242 = vmatpush3.bf16.msra.mxu1 %v23422_v38  ;;  %16805 = vmatprep.mubr.msk.f32.mxu1 %vm22650_vm0, %v25510_v4 }
 0x371   : > { %20243 = vmatprep.subr.bf16.mxu1 %v25512_v42 }
 0x374   : > { %20245 = vmatpush3.bf16.msra.mxu1 %v23432_v8 }
 0x375   : > { %20390 = vmatprep.subr.bf16.mxu1 %v25512_v42 }
 0x377   : > { %16806 = vmatmul.mubr.f32.vlgmr.msra.gmra.mrb[2].mxu1 %v1799_v59  ;;  %v25545_v59 = vld [vmem:[#allocation5_spill] sm:$0xff] }
 0x378   : > { %20392 = vmatpush3.bf16.msra.mxu1 %v23102_v5  ;;  %17044 = vmatprep.mubr.msk.f32.mxu1 %vm22650_vm0, %v25510_v4 }
 0x379   : > { %20393 = vmatprep.subr.bf16.mxu1 %v25512_v42 }
 0x37c   : > { %20395 = vmatpush3.bf16.msra.mxu1 %v23112_v10 }
 0x37d   : > { %20396 = vmatprep.subr.bf16.mxu1 %v25512_v42 }
 0x380   : > { %20398 = vmatpush3.bf16.msra.mxu1 %v23122_v22 }
 0x381   : > { %20399 = vmatprep.subr.bf16.mxu1 %v25512_v42 }
 0x384   : > { %20401 = vmatpush3.bf16.msra.mxu1 %v23132_v47 }
 0x385   : > { %20402 = vmatprep.subr.bf16.mxu1 %v25512_v42 }
 0x388   : > { %20404 = vmatpush3.bf16.msra.mxu1 %v23142_v62 }
 0x389   : > { %20405 = vmatprep.subr.bf16.mxu1 %v25512_v42 }
 0x38c   : > { %20407 = vmatpush3.bf16.msra.mxu1 %v23156_v45 }
 0x38d   : > { %17042 = vmatprep.subr.mxu1 %v25510_v4 }
 0x390   : > { %17043 = vmatpush3.msra.mxu1 %v23167_v48 }
 0x391   : > { %20408 = vmatprep.subr.bf16.mxu1 %v25512_v42 }
 0x44a   : > { %v2211_v54 = vpop.f32.mrb[2].mxu1 }
 0x44b   : > { %v22264_v12 = vadd.f32 %v23504_v27, %v2211_v54  ;;  %v16807_v15 = vpop.f32.mrb[3].mxu1  ;;  %v25550_v54 = vld [vmem:[#allocation10_spill] sm:$0xff] }
 0x44c   : > { %v25553_v15 = vld [vmem:[#allocation13_spill] sm:$0xff] }
 0x44d   : > { %2215 = vst [vmem:[%s23509_s23] sm:$0xff] %v22264_v12  ;;  %v2218_v31 = vadd.f32 %v22264_v12, %v14612_v53  ;;  %v25551_v53 = vld [vmem:[#allocation11_spill] sm:$0xff]  ;;  %v25552_v12 = vld [vmem:[#allocation12_spill] sm:$0xff] }
 0x44f   : > { %v23512_v0 = vand.u32 4294901760, %v2218_v31 }
 0x451   : > { %v2301_v30 = vsub.f32 %v2218_v31, %v23512_v0  ;;  %v25554_v31 = vld [vmem:[#allocation14_spill] sm:$0xff] }
 0x453   : > { %v2302_v32 = vand.u32 4294901760, %v2301_v30 }
 0x455   : > { %v2303_v20 = vsub.f32 %v2301_v30, %v2302_v32 }
 0x457   : > { %v2304_v18 = vand.u32 4294901760, %v2303_v20  ;;  %v25556_v20 = vld [vmem:[#allocation16_spill] sm:$0xff] }
 0x459   : > { %16841 = vmatmul.mubr.f32.vlgmr.msra.gmra.mrb[2].mxu0 %v2304_v18  ;;  %v25558_v18 = vld [vmem:[#allocation18_spill] sm:$0xff] }
 0x45a   : > { %20272 = vmatpush3.bf16.msra.mxu0 %v22922_v49  ;;  %16875 = vmatprep.mubr.msk.f32.mxu0 %vm22650_vm0, %v25510_v4 }
 0x45b   : > { %20273 = vmatprep.subr.bf16.mxu0 %v25512_v42 }
 0x45e   : > { %20275 = vmatpush3.bf16.msra.mxu0 %v22929_v1 }
 0x45f   : > { %20276 = vmatprep.subr.bf16.mxu0 %v25512_v42 }
 0x462   : > { %20278 = vmatpush3.bf16.msra.mxu0 %v22935_v19 }
 0x463   : > { %20279 = vmatprep.subr.bf16.mxu0 %v25512_v42 }
 0x466   : > { %20281 = vmatpush3.bf16.msra.mxu0 %v22940_v24 }
 0x467   : > { %20282 = vmatprep.subr.bf16.mxu0 %v25512_v42 }
 0x46a   : > { %20284 = vmatpush3.bf16.msra.mxu0 %v22948_v25 }
 0x46b   : > { %20285 = vmatprep.subr.bf16.mxu0 %v25512_v42 }
 0x46e   : > { %20287 = vmatpush3.bf16.msra.mxu0 %v22953_v28 }
 0x46f   : > { %20288 = vmatprep.subr.bf16.mxu0 %v25512_v42 }
 0x472   : > { %20290 = vmatpush3.bf16.msra.mxu0 %v22959_v2 }
 0x473   : > { %20291 = vmatprep.subr.bf16.mxu0 %v25512_v42 }
 0x476   : > { %20293 = vmatpush3.bf16.msra.mxu0 %v22963_v14 }
 0x477   : > { %20294 = vmatprep.subr.bf16.mxu0 %v25512_v42 }
 0x479   : > { %16876 = vmatmul.mubr.f32.vlgmr.msra.gmra.mrb[2].mxu0 %v23512_v0 }
 0x47a   : > { %20296 = vmatpush3.bf16.msra.mxu0 %v22969_v33  ;;  %16910 = vmatprep.mubr.msk.f32.mxu0 %vm22650_vm0, %v25510_v4 }
 0x47b   : > { %20297 = vmatprep.subr.bf16.mxu0 %v25512_v42 }
 0x47e   : > { %20299 = vmatpush3.bf16.msra.mxu0 %v22976_v34 }
 0x47f   : > { %20300 = vmatprep.subr.bf16.mxu0 %v25512_v42 }
 0x482   : > { %20302 = vmatpush3.bf16.msra.mxu0 %v22984_v43 }
 0x483   : > { %20303 = vmatprep.subr.bf16.mxu0 %v25512_v42 }
 0x486   : > { %20305 = vmatpush3.bf16.msra.mxu0 %v22990_v51 }
 0x487   : > { %20306 = vmatprep.subr.bf16.mxu0 %v25512_v42 }
 0x48a   : > { %20308 = vmatpush3.bf16.msra.mxu0 %v22996_v52 }
 0x48b   : > { %20309 = vmatprep.subr.bf16.mxu0 %v25512_v42 }
 0x48e   : > { %20311 = vmatpush3.bf16.msra.mxu0 %v23002_v55 }
 0x48f   : > { %20312 = vmatprep.subr.bf16.mxu0 %v25512_v42 }
 0x492   : > { %20314 = vmatpush3.bf16.msra.mxu0 %v23008_v56 }
 0x493   : > { %20315 = vmatprep.subr.bf16.mxu0 %v25512_v42 }
 0x496   : > { %20317 = vmatpush3.bf16.msra.mxu0 %v23014_v63 }
 0x497   : > { %20318 = vmatprep.subr.bf16.mxu0 %v25512_v42 }
 0x499   : > { %16911 = vmatmul.mubr.f32.vlgmr.msra.gmra.mrb[2].mxu0 %v2301_v30  ;;  %v25555_v30 = vld [vmem:[#allocation15_spill] sm:$0xff] }
 0x49a   : > { %20320 = vmatpush3.bf16.msra.mxu0 %v25545_v59  ;;  %16945 = vmatprep.mubr.msk.f32.mxu0 %vm22650_vm0, %v25510_v4 }
 0x49b   : > { %20321 = vmatprep.subr.bf16.mxu0 %v25512_v42 }
 0x49e   : > { %20323 = vmatpush3.bf16.msra.mxu0 %v25546_v39 }
 0x49f   : > { %20324 = vmatprep.subr.bf16.mxu0 %v25512_v42 }
 0x4a2   : > { %20326 = vmatpush3.bf16.msra.mxu0 %v25547_v7 }
 0x4a3   : > { %20327 = vmatprep.subr.bf16.mxu0 %v25512_v42 }
 0x4a6   : > { %20329 = vmatpush3.bf16.msra.mxu0 %v25548_v57 }
 0x4a7   : > { %20330 = vmatprep.subr.bf16.mxu0 %v25512_v42 }
 0x4aa   : > { %20332 = vmatpush3.bf16.msra.mxu0 %v25549_v3 }
 0x4ab   : > { %20333 = vmatprep.subr.bf16.mxu0 %v25512_v42 }
 0x4ae   : > { %20335 = vmatpush3.bf16.msra.mxu0 %v25550_v54 }
 0x4af   : > { %20336 = vmatprep.subr.bf16.mxu0 %v25512_v42 }
 0x4b2   : > { %20338 = vmatpush3.bf16.msra.mxu0 %v25551_v53 }
 0x4b3   : > { %20339 = vmatprep.subr.bf16.mxu0 %v25512_v42 }
 0x4b6   : > { %20341 = vmatpush3.bf16.msra.mxu0 %v25552_v12 }
 0x4b7   : > { %20342 = vmatprep.subr.bf16.mxu0 %v25512_v42 }
 0x4b9   : > { %16946 = vmatmul.mubr.f32.vlgmr.msra.gmra.mrb[2].mxu0 %v2302_v32  ;;  %v25557_v32 = vld [vmem:[#allocation17_spill] sm:$0xff] }
 0x4ba   : > { %20344 = vmatpush3.bf16.msra.mxu0 %v25553_v15  ;;  %16980 = vmatprep.mubr.msk.f32.mxu0 %vm22650_vm0, %v25510_v4  ;;  %v25559_v15 = vld [vmem:[#allocation19_spill] sm:$0xff] }
 0x4bb   : > { %20345 = vmatprep.subr.bf16.mxu0 %v25512_v42 }
 0x4be   : > { %20347 = vmatpush3.bf16.msra.mxu0 %v25554_v31  ;;  %v25560_v31 = vld [vmem:[#allocation20_spill] sm:$0xff] }
 0x4bf   : > { %20348 = vmatprep.subr.bf16.mxu0 %v25512_v42 }
 0x4c2   : > { %20350 = vmatpush3.bf16.msra.mxu0 %v25555_v30 }
 0x4c3   : > { %20351 = vmatprep.subr.bf16.mxu0 %v25512_v42 }
 0x4c6   : > { %20353 = vmatpush3.bf16.msra.mxu0 %v25556_v20 }
 0x4c7   : > { %20354 = vmatprep.subr.bf16.mxu0 %v25512_v42 }
 0x4ca   : > { %20356 = vmatpush3.bf16.msra.mxu0 %v25557_v32 }
 0x4cb   : > { %20357 = vmatprep.subr.bf16.mxu0 %v25512_v42 }
 0x4ce   : > { %20359 = vmatpush3.bf16.msra.mxu0 %v25558_v18 }
 0x4cf   : > { %20360 = vmatprep.subr.bf16.mxu0 %v25512_v42 }
 0x4d2   : > { %20362 = vmatpush3.bf16.msra.mxu0 %v25559_v15 }
 0x4d3   : > { %20363 = vmatprep.subr.bf16.mxu0 %v25512_v42 }
 0x4d6   : > { %20365 = vmatpush3.bf16.msra.mxu0 %v25560_v31 }
 0x4d7   : > { %20366 = vmatprep.subr.bf16.mxu0 %v25512_v42 }
 0x4d9   : > { %16981 = vmatmul.mubr.f32.vlgmr.msra.gmra.mrb[2].mxu0 %v23512_v0 }
 0x4da   : > { %20368 = vmatpush3.bf16.msra.mxu0 %v25545_v59  ;;  %17015 = vmatprep.mubr.msk.f32.mxu0 %vm22650_vm0, %v25510_v4 }
 0x4db   : > { %20369 = vmatprep.subr.bf16.mxu0 %v25512_v42 }
 0x4de   : > { %20371 = vmatpush3.bf16.msra.mxu0 %v25546_v39 }
 0x4df   : > { %20372 = vmatprep.subr.bf16.mxu0 %v25512_v42 }
 0x4e2   : > { %20374 = vmatpush3.bf16.msra.mxu0 %v25547_v7 }
 0x4e3   : > { %20375 = vmatprep.subr.bf16.mxu0 %v25512_v42 }
 0x4e6   : > { %20377 = vmatpush3.bf16.msra.mxu0 %v25548_v57 }
 0x4e7   : > { %20378 = vmatprep.subr.bf16.mxu0 %v25512_v42 }
 0x4ea   : > { %20380 = vmatpush3.bf16.msra.mxu0 %v25549_v3 }
 0x4eb   : > { %20381 = vmatprep.subr.bf16.mxu0 %v25512_v42 }
 0x4ee   : > { %20383 = vmatpush3.bf16.msra.mxu0 %v25550_v54 }
 0x4ef   : > { %20384 = vmatprep.subr.bf16.mxu0 %v25512_v42 }
 0x4f2   : > { %20386 = vmatpush3.bf16.msra.mxu0 %v25551_v53 }
 0x4f3   : > { %20387 = vmatprep.subr.bf16.mxu0 %v25512_v42 }
 0x4f6   : > { %20389 = vmatpush3.bf16.msra.mxu0 %v25552_v12 }
 0x4f7   : > { %20534 = vmatprep.subr.bf16.mxu0 %v25512_v42 }
 0x4f9   : > { %17016 = vmatmul.mubr.f32.vlgmr.msra.gmra.mrb[2].mxu0 %v23512_v0 }
 0x4fa   : > { %20536 = vmatpush3.bf16.msra.mxu0 %v25545_v59  ;;  %17290 = vmatprep.mubr.msk.f32.mxu0 %vm22650_vm0, %v25510_v4 }
 0x4fb   : > { %20537 = vmatprep.subr.bf16.mxu0 %v25512_v42 }
 0x4fe   : > { %20539 = vmatpush3.bf16.msra.mxu0 %v25546_v39 }
 0x4ff   : > { %20540 = vmatprep.subr.bf16.mxu0 %v25512_v42 }
 0x502   : > { %20542 = vmatpush3.bf16.msra.mxu0 %v25547_v7 }
 0x503   : > { %20543 = vmatprep.subr.bf16.mxu0 %v25512_v42 }
 0x506   : > { %20545 = vmatpush3.bf16.msra.mxu0 %v25548_v57 }
 0x507   : > { %20546 = vmatprep.subr.bf16.mxu0 %v25512_v42 }
 0x50a   : > { %20548 = vmatpush3.bf16.msra.mxu0 %v25549_v3 }
 0x50b   : > { %20549 = vmatprep.subr.bf16.mxu0 %v25512_v42 }
 0x50e   : > { %20551 = vmatpush3.bf16.msra.mxu0 %v25550_v54 }
 0x50f   : > { %20552 = vmatprep.subr.bf16.mxu0 %v25512_v42 }
 0x512   : > { %20554 = vmatpush3.bf16.msra.mxu0 %v25551_v53 }
 0x513   : > { %20555 = vmatprep.subr.bf16.mxu0 %v25512_v42 }
 0x516   : > { %20557 = vmatpush3.bf16.msra.mxu0 %v25552_v12 }
 0x517   : > { %20558 = vmatprep.subr.bf16.mxu0 %v25512_v42 }
 0x5cc   : > { %v2856_v0 = vpop.f32.mrb[2].mxu0 }
 0x5cd   : > { %v22265_v31 = vadd.f32 %v23277_v17, %v2856_v0  ;;  %v17017_v15 = vpop.f32.mrb[3].mxu0  ;;  %v25561_v17 = vld [vmem:[#allocation39_spill] sm:$0xff] }
 0x5ce   : > { %v25567_v15 = vld [vmem:[#allocation47_spill] sm:$0xff] }
 0x5cf   : > { %v2860_v18 = vand.u32 2147483647, %v22265_v31 }
 0x5d1   : > { %v2861_v32 = vadd.f32 1.0, %v2860_v18 }
 0x5d3   : > { %22572 = vrcp.f32 %v2861_v32 }
 0x5dd   : > { %v22573_v20 = vpop.eup %22572 }
 0x5de   : > { %v2863_v30 = vmul.f32 %v22573_v20, %v22265_v31  ;;  %v25568_v31 = vld [vmem:[#allocation40_spill] sm:$0xff] }
 0x5e0   : > { %v2865_v54 = vsel %vm1108_vm2, %v2863_v30, 0 }
 0x5e1   : > { %v23628_v3 = vand.u32 4294901760, %v2865_v54 }
 0x5e3   : > { %v2946_v53 = vsub.f32 %v2865_v54, %v23628_v3  ;;  %v25563_v54 = vld [vmem:[#allocation43_spill] sm:$0xff] }
 0x5e5   : > { %v2947_v57 = vand.u32 4294901760, %v2946_v53 }
 0x5e7   : > { %v2948_v7 = vsub.f32 %v2946_v53, %v2947_v57 }
 0x5e9   : > { %v2949_v12 = vand.u32 4294901760, %v2948_v7  ;;  %v25562_v7 = vld [vmem:[#allocation42_spill] sm:$0xff] }
 0x5eb   : > { %17045 = vmatmul.mubr.f32.vlgmr.msra.gmra.mrb[4].mxu1 %v2949_v12  ;;  %v25565_v12 = vld [vmem:[#allocation45_spill] sm:$0xff] }
 0x5ec   : > { %20410 = vmatpush3.bf16.msra.mxu1 %v23183_v58  ;;  %17073 = vmatprep.mubr.msk.f32.mxu1 %vm22650_vm0, %v25510_v4 }
 0x5ed   : > { %20411 = vmatprep.subr.bf16.mxu1 %v25512_v42 }
 0x5f0   : > { %20413 = vmatpush3.bf16.msra.mxu1 %v23198_v44 }
 0x5f1   : > { %20414 = vmatprep.subr.bf16.mxu1 %v25512_v42 }
 0x5f4   : > { %20416 = vmatpush3.bf16.msra.mxu1 %v23212_v9 }
 0x5f5   : > { %20417 = vmatprep.subr.bf16.mxu1 %v25512_v42 }
 0x5f8   : > { %20419 = vmatpush3.bf16.msra.mxu1 %v23236_v61 }
 0x5f9   : > { %20420 = vmatprep.subr.bf16.mxu1 %v25512_v42 }
 0x5fc   : > { %20422 = vmatpush3.bf16.msra.mxu1 %v23240_v6 }
 0x5fd   : > { %20423 = vmatprep.subr.bf16.mxu1 %v25512_v42 }
 0x600   : > { %20425 = vmatpush3.bf16.msra.mxu1 %v23248_v13 }
 0x601   : > { %17071 = vmatprep.subr.mxu1 %v25510_v4 }
 0x604   : > { %17072 = vmatpush3.msra.mxu1 %v23306_v40 }
 0x605   : > { %17074 = vmatmul.mubr.f32.vlgmr.msra.gmra.mrb[4].mxu1 %v23628_v3  ;;  %20426 = vmatprep.subr.bf16.mxu1 %v25512_v42 }
 0x606   : > { %20428 = vmatpush3.bf16.msra.mxu1 %v23252_v35  ;;  %17102 = vmatprep.mubr.msk.f32.mxu1 %vm22650_vm0, %v25510_v4 }
 0x607   : > { %20429 = vmatprep.subr.bf16.mxu1 %v25512_v42 }
 0x60a   : > { %20431 = vmatpush3.bf16.msra.mxu1 %v23256_v37 }
 0x60b   : > { %20432 = vmatprep.subr.bf16.mxu1 %v25512_v42 }
 0x60e   : > { %20434 = vmatpush3.bf16.msra.mxu1 %v23260_v46 }
 0x60f   : > { %20435 = vmatprep.subr.bf16.mxu1 %v25512_v42 }
 0x612   : > { %20437 = vmatpush3.bf16.msra.mxu1 %v23264_v50 }
 0x613   : > { %20438 = vmatprep.subr.bf16.mxu1 %v25512_v42 }
 0x616   : > { %20440 = vmatpush3.bf16.msra.mxu1 %v23268_v60 }
 0x617   : > { %20441 = vmatprep.subr.bf16.mxu1 %v25512_v42 }
 0x61a   : > { %20443 = vmatpush3.bf16.msra.mxu1 %v23272_v41 }
 0x61b   : > { %17100 = vmatprep.subr.mxu1 %v25510_v4 }
 0x61e   : > { %17101 = vmatpush3.msra.mxu1 %v25561_v17 }
 0x61f   : > { %17103 = vmatmul.mubr.f32.vlgmr.msra.gmra.mrb[4].mxu1 %v2946_v53  ;;  %20444 = vmatprep.subr.bf16.mxu1 %v25512_v42  ;;  %v25564_v53 = vld [vmem:[#allocation44_spill] sm:$0xff] }
 0x620   : > { %20446 = vmatpush3.bf16.msra.mxu1 %v23102_v5  ;;  %17131 = vmatprep.mubr.msk.f32.mxu1 %vm22650_vm0, %v25510_v4 }
 0x621   : > { %20447 = vmatprep.subr.bf16.mxu1 %v25512_v42 }
 0x624   : > { %20449 = vmatpush3.bf16.msra.mxu1 %v23112_v10 }
 0x625   : > { %20450 = vmatprep.subr.bf16.mxu1 %v25512_v42 }
 0x628   : > { %20452 = vmatpush3.bf16.msra.mxu1 %v23122_v22 }
 0x629   : > { %20453 = vmatprep.subr.bf16.mxu1 %v25512_v42 }
 0x62c   : > { %20455 = vmatpush3.bf16.msra.mxu1 %v23132_v47 }
 0x62d   : > { %20456 = vmatprep.subr.bf16.mxu1 %v25512_v42 }
 0x630   : > { %20458 = vmatpush3.bf16.msra.mxu1 %v23142_v62 }
 0x631   : > { %20459 = vmatprep.subr.bf16.mxu1 %v25512_v42 }
 0x634   : > { %20461 = vmatpush3.bf16.msra.mxu1 %v23156_v45 }
 0x635   : > { %17129 = vmatprep.subr.mxu1 %v25510_v4 }
 0x638   : > { %17130 = vmatpush3.msra.mxu1 %v23167_v48 }
 0x639   : > { %17132 = vmatmul.mubr.f32.vlgmr.msra.gmra.mrb[4].mxu1 %v2947_v57  ;;  %20462 = vmatprep.subr.bf16.mxu1 %v25512_v42  ;;  %v25566_v57 = vld [vmem:[#allocation46_spill] sm:$0xff] }
 0x63a   : > { %20464 = vmatpush3.bf16.msra.mxu1 %v25562_v7  ;;  %17160 = vmatprep.mubr.msk.f32.mxu1 %vm22650_vm0, %v25510_v4 }
 0x63b   : > { %20465 = vmatprep.subr.bf16.mxu1 %v25512_v42 }
 0x63e   : > { %20467 = vmatpush3.bf16.msra.mxu1 %v25563_v54 }
 0x63f   : > { %20468 = vmatprep.subr.bf16.mxu1 %v25512_v42 }
 0x642   : > { %20470 = vmatpush3.bf16.msra.mxu1 %v25564_v53 }
 0x643   : > { %20471 = vmatprep.subr.bf16.mxu1 %v25512_v42 }
 0x646   : > { %20473 = vmatpush3.bf16.msra.mxu1 %v25565_v12 }
 0x647   : > { %20474 = vmatprep.subr.bf16.mxu1 %v25512_v42 }
 0x64a   : > { %20476 = vmatpush3.bf16.msra.mxu1 %v25566_v57 }
 0x64b   : > { %20477 = vmatprep.subr.bf16.mxu1 %v25512_v42 }
 0x64e   : > { %20479 = vmatpush3.bf16.msra.mxu1 %v25567_v15 }
 0x64f   : > { %17158 = vmatprep.subr.mxu1 %v25510_v4 }
 0x652   : > { %17159 = vmatpush3.msra.mxu1 %v25568_v31 }
 0x653   : > { %17161 = vmatmul.mubr.f32.vlgmr.msra.gmra.mrb[4].mxu1 %v23628_v3  ;;  %20480 = vmatprep.subr.bf16.mxu1 %v25512_v42 }
 0x654   : > { %20482 = vmatpush3.bf16.msra.mxu1 %v23102_v5  ;;  %17189 = vmatprep.mubr.msk.f32.mxu1 %vm22650_vm0, %v25510_v4 }
 0x655   : > { %20483 = vmatprep.subr.bf16.mxu1 %v25512_v42 }
 0x658   : > { %20485 = vmatpush3.bf16.msra.mxu1 %v23112_v10 }
 0x659   : > { %20486 = vmatprep.subr.bf16.mxu1 %v25512_v42 }
 0x65c   : > { %20488 = vmatpush3.bf16.msra.mxu1 %v23122_v22 }
 0x65d   : > { %20489 = vmatprep.subr.bf16.mxu1 %v25512_v42 }
 0x660   : > { %20491 = vmatpush3.bf16.msra.mxu1 %v23132_v47 }
 0x661   : > { %20492 = vmatprep.subr.bf16.mxu1 %v25512_v42 }
 0x664   : > { %20494 = vmatpush3.bf16.msra.mxu1 %v23142_v62 }
 0x665   : > { %20495 = vmatprep.subr.bf16.mxu1 %v25512_v42 }
 0x668   : > { %20497 = vmatpush3.bf16.msra.mxu1 %v23156_v45 }
 0x669   : > { %17187 = vmatprep.subr.mxu1 %v25510_v4 }
 0x66c   : > { %17188 = vmatpush3.msra.mxu1 %v23167_v48 }
 0x66d   : > { %17190 = vmatmul.mubr.f32.vlgmr.msra.gmra.mrb[4].mxu1 %v23628_v3  ;;  %20498 = vmatprep.subr.bf16.mxu1 %v25512_v42 }
 0x66e   : > { %20500 = vmatpush3.bf16.msra.mxu1 %v23422_v38  ;;  %17200 = vmatprep.mubr.msk.f32.mxu1 %vm22650_vm0, %v25510_v4 }
 0x66f   : > { %20501 = vmatprep.subr.bf16.mxu1 %v25512_v42 }
 0x672   : > { %20503 = vmatpush3.bf16.msra.mxu1 %v23432_v8 }
 0x673   : > { %20504 = vmatprep.subr.bf16.mxu1 %v25512_v42 }
 0x740   : > { %v3465_v30 = vpop.f32.mrb[4].mxu1 }
 0x741   : > { %v22266_v20 = vadd.f32 %v23451_v11, %v3465_v30  ;;  %v17191_v32 = vpop.f32.mrb[5].mxu1 }
 0x742   : > { %v25570_v32 = vld [vmem:[#allocation8_spill] sm:$0xff] }
 0x743   : > { %v3469_v18 = vand.u32 2147483647, %v22266_v20 }
 0x745   : > { %v3470_v0 = vadd.f32 1.0, %v3469_v18  ;;  %v25571_v18 = vld [vmem:[#allocation9_spill] sm:$0xff] }
 0x747   : > { %22574 = vrcp.f32 %v3470_v0  ;;  %v25572_v0 = vld [vmem:[#allocation10_spill] sm:$0xff] }
 0x751   : > { %v22575_v3 = vpop.eup %22574 }
 0x752   : > { %v3472_v31 = vmul.f32 %v22575_v3, %v22266_v20  ;;  %v25573_v3 = vld [vmem:[#allocation11_spill] sm:$0xff] }
 0x754   : > { %v3474_v15 = vsel %vm1722_vm4, %v3472_v31, 0 }
 0x755   : > { %v3545_v57 = vand.u32 4294901760, %v3474_v15 }
 0x757   : > { %v3546_v12 = vsub.f32 %v3474_v15, %v3545_v57 }
 0x759   : > { %v3547_v53 = vand.u32 4294901760, %v3546_v12 }
 0x75b   : > { %v3548_v54 = vsub.f32 %v3546_v12, %v3547_v53 }
 0x75d   : > { %v3549_v7 = vand.u32 4294901760, %v3548_v54 }
 0x75f   : > { %17201 = vmatmul.mubr.f32.vlgmr.msra.gmra.mrb[6].mxu1 %v3549_v7  ;;  %v14614_v7 = vld [vmem:[%s22792_s12 + $0x10] sm:$0xff] }
 0x760   : > { %20506 = vmatpush3.bf16.msra.mxu1 %v23436_v21  ;;  %17211 = vmatprep.mubr.msk.f32.mxu1 %vm22650_vm0, %v25510_v4 }
 0x761   : > { %20507 = vmatprep.subr.bf16.mxu1 %v25512_v42 }
 0x764   : > { %20509 = vmatpush3.bf16.msra.mxu1 %v23438_v29 }
 0x765   : > { %20510 = vmatprep.subr.bf16.mxu1 %v25512_v42 }
 0x767   : > { %17212 = vmatmul.mubr.f32.vlgmr.msra.gmra.mrb[6].mxu1 %v3545_v57 }
 0x768   : > { %20512 = vmatpush3.bf16.msra.mxu1 %v23440_v36  ;;  %17222 = vmatprep.mubr.msk.f32.mxu1 %vm22650_vm0, %v25510_v4 }
 0x769   : > { %20513 = vmatprep.subr.bf16.mxu1 %v25512_v42 }
 0x76c   : > { %20515 = vmatpush3.bf16.msra.mxu1 %v23442_v23 }
 0x76d   : > { %20516 = vmatprep.subr.bf16.mxu1 %v25512_v42 }
 0x76f   : > { %17223 = vmatmul.mubr.f32.vlgmr.msra.gmra.mrb[6].mxu1 %v3546_v12 }
 0x770   : > { %20518 = vmatpush3.bf16.msra.mxu1 %v23422_v38  ;;  %17233 = vmatprep.mubr.msk.f32.mxu1 %vm22650_vm0, %v25510_v4 }
 0x771   : > { %20519 = vmatprep.subr.bf16.mxu1 %v25512_v42 }
 0x774   : > { %20521 = vmatpush3.bf16.msra.mxu1 %v23432_v8 }
 0x775   : > { %20522 = vmatprep.subr.bf16.mxu1 %v25512_v42 }
 0x777   : > { %17234 = vmatmul.mubr.f32.vlgmr.msra.gmra.mrb[6].mxu1 %v3547_v53 }
 0x778   : > { %20524 = vmatpush3.bf16.msra.mxu1 %v23444_v16  ;;  %17244 = vmatprep.mubr.msk.f32.mxu1 %vm22650_vm0, %v25510_v4 }
 0x779   : > { %20525 = vmatprep.subr.bf16.mxu1 %v25512_v42 }
 0x77c   : > { %20527 = vmatpush3.bf16.msra.mxu1 %v23446_v26 }
 0x77d   : > { %20528 = vmatprep.subr.bf16.mxu1 %v25512_v42 }
 0x77f   : > { %17245 = vmatmul.mubr.f32.vlgmr.msra.gmra.mrb[6].mxu1 %v3545_v57 }
 0x780   : > { %20530 = vmatpush3.bf16.msra.mxu1 %v23422_v38  ;;  %17255 = vmatprep.mubr.msk.f32.mxu1 %vm22650_vm0, %v25510_v4 }
 0x781   : > { %20531 = vmatprep.subr.bf16.mxu1 %v25512_v42 }
 0x784   : > { %20533 = vmatpush3.bf16.msra.mxu1 %v23432_v8 }
 0x785   : > { %20678 = vmatprep.subr.bf16.mxu1 %v25512_v42 }
 0x787   : > { %17256 = vmatmul.mubr.f32.vlgmr.msra.gmra.mrb[6].mxu1 %v3545_v57 }
 0x788   : > { %20680 = vmatpush3.bf16.msra.mxu1 %v23102_v5  ;;  %17494 = vmatprep.mubr.msk.f32.mxu1 %vm22650_vm0, %v25510_v4 }
 0x789   : > { %20681 = vmatprep.subr.bf16.mxu1 %v25512_v42 }
 0x78c   : > { %20683 = vmatpush3.bf16.msra.mxu1 %v23112_v10 }
 0x78d   : > { %20684 = vmatprep.subr.bf16.mxu1 %v25512_v42 }
 0x790   : > { %20686 = vmatpush3.bf16.msra.mxu1 %v23122_v22 }
 0x791   : > { %20687 = vmatprep.subr.bf16.mxu1 %v25512_v42 }
 0x794   : > { %20689 = vmatpush3.bf16.msra.mxu1 %v23132_v47 }
 0x795   : > { %20690 = vmatprep.subr.bf16.mxu1 %v25512_v42 }
 0x798   : > { %20692 = vmatpush3.bf16.msra.mxu1 %v23142_v62 }
 0x799   : > { %20693 = vmatprep.subr.bf16.mxu1 %v25512_v42 }
 0x79c   : > { %20695 = vmatpush3.bf16.msra.mxu1 %v23156_v45 }
 0x79d   : > { %17492 = vmatprep.subr.mxu1 %v25510_v4 }
 0x7a0   : > { %17493 = vmatpush3.msra.mxu1 %v23167_v48 }
 0x7a1   : > { %20696 = vmatprep.subr.bf16.mxu1 %v25512_v42 }
 0x85a   : > { %v3957_v11 = vpop.f32.mrb[6].mxu1 }
 0x85b   : > { %v22267_v54 = vadd.f32 %v23504_v27, %v3957_v11  ;;  %v17257_v53 = vpop.f32.mrb[7].mxu1  ;;  %v25569_v27 = vld [vmem:[#allocation7_spill] sm:$0xff]  ;;  %v25574_v11 = vld [vmem:[#allocation12_spill] sm:$0xff] }
 0x85c   : > { %v25577_v53 = vld [vmem:[#allocation15_spill] sm:$0xff] }
 0x85d   : > { %14613 = vst [vmem:[%s23509_s23 + $0x8] sm:$0xff] %v22267_v54  ;;  %v3965_v12 = vadd.f32 %v22267_v54, %v14614_v7  ;;  %v25575_v7 = vld [vmem:[#allocation13_spill] sm:$0xff]  ;;  %v25576_v54 = vld [vmem:[#allocation14_spill] sm:$0xff] }
 0x85f   : > { %v23771_v57 = vand.u32 4294901760, %v3965_v12 }
 0x861   : > { %v4048_v15 = vsub.f32 %v3965_v12, %v23771_v57  ;;  %v25578_v12 = vld [vmem:[#allocation16_spill] sm:$0xff] }
 0x863   : > { %v4049_v31 = vand.u32 4294901760, %v4048_v15 }
 0x865   : > { %v4050_v30 = vsub.f32 %v4048_v15, %v4049_v31 }
 0x867   : > { %v4051_v20 = vand.u32 4294901760, %v4050_v30  ;;  %v25581_v30 = vld [vmem:[#allocation19_spill] sm:$0xff] }
 0x869   : > { %17291 = vmatmul.mubr.f32.vlgmr.msra.gmra.mrb[4].mxu0 %v4051_v20  ;;  %v25582_v20 = vld [vmem:[#allocation20_spill] sm:$0xff] }
 0x86a   : > { %20560 = vmatpush3.bf16.msra.mxu0 %v22922_v49  ;;  %17325 = vmatprep.mubr.msk.f32.mxu0 %vm22650_vm0, %v25510_v4 }
 0x86b   : > { %20561 = vmatprep.subr.bf16.mxu0 %v25512_v42 }
 0x86e   : > { %20563 = vmatpush3.bf16.msra.mxu0 %v22929_v1 }
 0x86f   : > { %20564 = vmatprep.subr.bf16.mxu0 %v25512_v42 }
 0x872   : > { %20566 = vmatpush3.bf16.msra.mxu0 %v22935_v19 }
 0x873   : > { %20567 = vmatprep.subr.bf16.mxu0 %v25512_v42 }
 0x876   : > { %20569 = vmatpush3.bf16.msra.mxu0 %v22940_v24 }
 0x877   : > { %20570 = vmatprep.subr.bf16.mxu0 %v25512_v42 }
 0x87a   : > { %20572 = vmatpush3.bf16.msra.mxu0 %v22948_v25 }
 0x87b   : > { %20573 = vmatprep.subr.bf16.mxu0 %v25512_v42 }
 0x87e   : > { %20575 = vmatpush3.bf16.msra.mxu0 %v22953_v28 }
 0x87f   : > { %20576 = vmatprep.subr.bf16.mxu0 %v25512_v42 }
 0x882   : > { %20578 = vmatpush3.bf16.msra.mxu0 %v22959_v2 }
 0x883   : > { %20579 = vmatprep.subr.bf16.mxu0 %v25512_v42 }
 0x886   : > { %20581 = vmatpush3.bf16.msra.mxu0 %v22963_v14 }
 0x887   : > { %20582 = vmatprep.subr.bf16.mxu0 %v25512_v42 }
 0x889   : > { %17326 = vmatmul.mubr.f32.vlgmr.msra.gmra.mrb[4].mxu0 %v23771_v57 }
 0x88a   : > { %20584 = vmatpush3.bf16.msra.mxu0 %v22969_v33  ;;  %17360 = vmatprep.mubr.msk.f32.mxu0 %vm22650_vm0, %v25510_v4 }
 0x88b   : > { %20585 = vmatprep.subr.bf16.mxu0 %v25512_v42 }
 0x88e   : > { %20587 = vmatpush3.bf16.msra.mxu0 %v22976_v34 }
 0x88f   : > { %20588 = vmatprep.subr.bf16.mxu0 %v25512_v42 }
 0x892   : > { %20590 = vmatpush3.bf16.msra.mxu0 %v22984_v43 }
 0x893   : > { %20591 = vmatprep.subr.bf16.mxu0 %v25512_v42 }
 0x896   : > { %20593 = vmatpush3.bf16.msra.mxu0 %v22990_v51 }
 0x897   : > { %20594 = vmatprep.subr.bf16.mxu0 %v25512_v42 }
 0x89a   : > { %20596 = vmatpush3.bf16.msra.mxu0 %v22996_v52 }
 0x89b   : > { %20597 = vmatprep.subr.bf16.mxu0 %v25512_v42 }
 0x89e   : > { %20599 = vmatpush3.bf16.msra.mxu0 %v23002_v55 }
 0x89f   : > { %20600 = vmatprep.subr.bf16.mxu0 %v25512_v42 }
 0x8a2   : > { %20602 = vmatpush3.bf16.msra.mxu0 %v23008_v56 }
 0x8a3   : > { %20603 = vmatprep.subr.bf16.mxu0 %v25512_v42 }
 0x8a6   : > { %20605 = vmatpush3.bf16.msra.mxu0 %v23014_v63 }
 0x8a7   : > { %20606 = vmatprep.subr.bf16.mxu0 %v25512_v42 }
 0x8a9   : > { %17361 = vmatmul.mubr.f32.vlgmr.msra.gmra.mrb[4].mxu0 %v4048_v15  ;;  %v25579_v15 = vld [vmem:[#allocation17_spill] sm:$0xff] }
 0x8aa   : > { %20608 = vmatpush3.bf16.msra.mxu0 %v25545_v59  ;;  %17395 = vmatprep.mubr.msk.f32.mxu0 %vm22650_vm0, %v25510_v4 }
 0x8ab   : > { %20609 = vmatprep.subr.bf16.mxu0 %v25512_v42 }
 0x8ae   : > { %20611 = vmatpush3.bf16.msra.mxu0 %v25546_v39 }
 0x8af   : > { %20612 = vmatprep.subr.bf16.mxu0 %v25512_v42 }
 0x8b2   : > { %20614 = vmatpush3.bf16.msra.mxu0 %v25569_v27 }
 0x8b3   : > { %20615 = vmatprep.subr.bf16.mxu0 %v25512_v42 }
 0x8b6   : > { %20617 = vmatpush3.bf16.msra.mxu0 %v25570_v32 }
 0x8b7   : > { %20618 = vmatprep.subr.bf16.mxu0 %v25512_v42 }
 0x8ba   : > { %20620 = vmatpush3.bf16.msra.mxu0 %v25571_v18 }
 0x8bb   : > { %20621 = vmatprep.subr.bf16.mxu0 %v25512_v42 }
 0x8be   : > { %20623 = vmatpush3.bf16.msra.mxu0 %v25572_v0 }
 0x8bf   : > { %20624 = vmatprep.subr.bf16.mxu0 %v25512_v42 }
 0x8c2   : > { %20626 = vmatpush3.bf16.msra.mxu0 %v25573_v3 }
 0x8c3   : > { %20627 = vmatprep.subr.bf16.mxu0 %v25512_v42 }
 0x8c6   : > { %20629 = vmatpush3.bf16.msra.mxu0 %v25574_v11 }
 0x8c7   : > { %20630 = vmatprep.subr.bf16.mxu0 %v25512_v42 }
 0x8c9   : > { %17396 = vmatmul.mubr.f32.vlgmr.msra.gmra.mrb[4].mxu0 %v4049_v31  ;;  %v25580_v31 = vld [vmem:[#allocation18_spill] sm:$0xff] }
 0x8ca   : > { %20632 = vmatpush3.bf16.msra.mxu0 %v25575_v7  ;;  %17430 = vmatprep.mubr.msk.f32.mxu0 %vm22650_vm0, %v25510_v4 }
 0x8cb   : > { %20633 = vmatprep.subr.bf16.mxu0 %v25512_v42 }
 0x8ce   : > { %20635 = vmatpush3.bf16.msra.mxu0 %v25576_v54 }
 0x8cf   : > { %20636 = vmatprep.subr.bf16.mxu0 %v25512_v42 }
 0x8d2   : > { %20638 = vmatpush3.bf16.msra.mxu0 %v25577_v53 }
 0x8d3   : > { %20639 = vmatprep.subr.bf16.mxu0 %v25512_v42 }
 0x8d6   : > { %20641 = vmatpush3.bf16.msra.mxu0 %v25578_v12 }
 0x8d7   : > { %20642 = vmatprep.subr.bf16.mxu0 %v25512_v42 }
 0x8da   : > { %20644 = vmatpush3.bf16.msra.mxu0 %v25579_v15 }
 0x8db   : > { %20645 = vmatprep.subr.bf16.mxu0 %v25512_v42 }
 0x8de   : > { %20647 = vmatpush3.bf16.msra.mxu0 %v25580_v31 }
 0x8df   : > { %20648 = vmatprep.subr.bf16.mxu0 %v25512_v42 }
 0x8e2   : > { %20650 = vmatpush3.bf16.msra.mxu0 %v25581_v30 }
 0x8e3   : > { %20651 = vmatprep.subr.bf16.mxu0 %v25512_v42 }
 0x8e6   : > { %20653 = vmatpush3.bf16.msra.mxu0 %v25582_v20  ;;  %v23888_v20 = vld [vmem:[%s25365_s3] ss:$0 sm:$0xff] }
 0x8e7   : > { %20654 = vmatprep.subr.bf16.mxu0 %v25512_v42 }
 0x8e9   : > { %17431 = vmatmul.mubr.f32.vlgmr.msra.gmra.mrb[4].mxu0 %v23771_v57 }
 0x8ea   : > { %20656 = vmatpush3.bf16.msra.mxu0 %v25545_v59  ;;  %17465 = vmatprep.mubr.msk.f32.mxu0 %vm22650_vm0, %v25510_v4 }
 0x8eb   : > { %20657 = vmatprep.subr.bf16.mxu0 %v25512_v42 }
 0x8ee   : > { %20659 = vmatpush3.bf16.msra.mxu0 %v25546_v39 }
 0x8ef   : > { %20660 = vmatprep.subr.bf16.mxu0 %v25512_v42 }
 0x8f2   : > { %20662 = vmatpush3.bf16.msra.mxu0 %v25569_v27 }
 0x8f3   : > { %20663 = vmatprep.subr.bf16.mxu0 %v25512_v42 }
 0x8f6   : > { %20665 = vmatpush3.bf16.msra.mxu0 %v25570_v32 }
 0x8f7   : > { %20666 = vmatprep.subr.bf16.mxu0 %v25512_v42 }
 0x8fa   : > { %20668 = vmatpush3.bf16.msra.mxu0 %v25571_v18 }
 0x8fb   : > { %20669 = vmatprep.subr.bf16.mxu0 %v25512_v42 }
 0x8fe   : > { %20671 = vmatpush3.bf16.msra.mxu0 %v25572_v0 }
 0x8ff   : > { %20672 = vmatprep.subr.bf16.mxu0 %v25512_v42 }
 0x902   : > { %20674 = vmatpush3.bf16.msra.mxu0 %v25573_v3 }
 0x903   : > { %20675 = vmatprep.subr.bf16.mxu0 %v25512_v42 }
 0x906   : > { %20677 = vmatpush3.bf16.msra.mxu0 %v25574_v11 }
 0x907   : > { %20822 = vmatprep.subr.bf16.mxu0 %v25512_v42 }
 0x909   : > { %17466 = vmatmul.mubr.f32.vlgmr.msra.gmra.mrb[4].mxu0 %v23771_v57 }
 0x90a   : > { %20824 = vmatpush3.bf16.msra.mxu0 %v25545_v59  ;;  %17740 = vmatprep.mubr.msk.f32.mxu0 %vm22650_vm0, %v25510_v4 }
 0x90b   : > { %20825 = vmatprep.subr.bf16.mxu0 %v25512_v42 }
 0x90e   : > { %20827 = vmatpush3.bf16.msra.mxu0 %v25546_v39 }
 0x90f   : > { %20828 = vmatprep.subr.bf16.mxu0 %v25512_v42 }
 0x912   : > { %20830 = vmatpush3.bf16.msra.mxu0 %v25569_v27 }
 0x913   : > { %20831 = vmatprep.subr.bf16.mxu0 %v25512_v42 }
 0x916   : > { %20833 = vmatpush3.bf16.msra.mxu0 %v25570_v32 }
 0x917   : > { %20834 = vmatprep.subr.bf16.mxu0 %v25512_v42 }
 0x91a   : > { %20836 = vmatpush3.bf16.msra.mxu0 %v25571_v18 }
 0x91b   : > { %20837 = vmatprep.subr.bf16.mxu0 %v25512_v42 }
 0x91e   : > { %20839 = vmatpush3.bf16.msra.mxu0 %v25572_v0 }
 0x91f   : > { %20840 = vmatprep.subr.bf16.mxu0 %v25512_v42 }
 0x922   : > { %20842 = vmatpush3.bf16.msra.mxu0 %v25573_v3 }
 0x923   : > { %20843 = vmatprep.subr.bf16.mxu0 %v25512_v42 }
 0x926   : > { %20845 = vmatpush3.bf16.msra.mxu0 %v25574_v11 }
 0x927   : > { %20846 = vmatprep.subr.bf16.mxu0 %v25512_v42 }
 0x9dc   : > { %v4603_v57 = vpop.f32.mrb[4].mxu0 }
 0x9dd   : > { %v22268_v30 = vadd.f32 %v23888_v20, %v4603_v57  ;;  %v17467_v31 = vpop.f32.mrb[5].mxu0 }
 0x9df   : > { %v4607_v15 = vand.u32 2147483647, %v22268_v30 }
 0x9e1   : > { %v4608_v12 = vadd.f32 1.0, %v4607_v15  ;;  %v23987_v15 = vld [vmem:[%s25367_s5] ss:$0 sm:$0xff] }
 0x9e3   : > { %22576 = vrcp.f32 %v4608_v12 }
 0x9ed   : > { %v22577_v53 = vpop.eup %22576 }
 0x9ee   : > { %v4610_v54 = vmul.f32 %v22577_v53, %v22268_v30  ;;  %v25589_v53 = vld [vmem:[#allocation40_spill] sm:$0xff] }
 0x9f0   : > { %v4612_v7 = vsel %vm1108_vm2, %v4610_v54, 0  ;;  %v25588_v54 = vld [vmem:[#allocation47_spill] sm:$0xff] }
 0x9f1   : > { %v23892_v3 = vand.u32 4294901760, %v4612_v7 }
 0x9f3   : > { %v4693_v11 = vsub.f32 %v4612_v7, %v23892_v3  ;;  %v25586_v7 = vld [vmem:[#allocation45_spill] sm:$0xff] }
 0x9f5   : > { %v4694_v0 = vand.u32 4294901760, %v4693_v11 }
 0x9f7   : > { %v4695_v18 = vsub.f32 %v4693_v11, %v4694_v0 }
 0x9f9   : > { %v4696_v32 = vand.u32 4294901760, %v4695_v18  ;;  %v25584_v18 = vld [vmem:[#allocation43_spill] sm:$0xff] }
 0x9fb   : > { %17495 = vmatmul.mubr.f32.vlgmr.msra.gmra.mrb[8].mxu1 %v4696_v32  ;;  %v25583_v32 = vld [vmem:[#allocation42_spill] sm:$0xff] }
 0x9fc   : > { %20698 = vmatpush3.bf16.msra.mxu1 %v23183_v58  ;;  %17523 = vmatprep.mubr.msk.f32.mxu1 %vm22650_vm0, %v25510_v4 }
 0x9fd   : > { %20699 = vmatprep.subr.bf16.mxu1 %v25512_v42 }
 0xa00   : > { %20701 = vmatpush3.bf16.msra.mxu1 %v23198_v44 }
 0xa01   : > { %20702 = vmatprep.subr.bf16.mxu1 %v25512_v42 }
 0xa04   : > { %20704 = vmatpush3.bf16.msra.mxu1 %v23212_v9 }
 0xa05   : > { %20705 = vmatprep.subr.bf16.mxu1 %v25512_v42 }
 0xa08   : > { %20707 = vmatpush3.bf16.msra.mxu1 %v23236_v61 }
 0xa09   : > { %20708 = vmatprep.subr.bf16.mxu1 %v25512_v42 }
 0xa0c   : > { %20710 = vmatpush3.bf16.msra.mxu1 %v23240_v6 }
 0xa0d   : > { %20711 = vmatprep.subr.bf16.mxu1 %v25512_v42 }
 0xa10   : > { %20713 = vmatpush3.bf16.msra.mxu1 %v23248_v13 }
 0xa11   : > { %17521 = vmatprep.subr.mxu1 %v25510_v4 }
 0xa14   : > { %17522 = vmatpush3.msra.mxu1 %v23306_v40 }
 0xa15   : > { %17524 = vmatmul.mubr.f32.vlgmr.msra.gmra.mrb[8].mxu1 %v23892_v3  ;;  %20714 = vmatprep.subr.bf16.mxu1 %v25512_v42 }
 0xa16   : > { %20716 = vmatpush3.bf16.msra.mxu1 %v23252_v35  ;;  %17552 = vmatprep.mubr.msk.f32.mxu1 %vm22650_vm0, %v25510_v4 }
 0xa17   : > { %20717 = vmatprep.subr.bf16.mxu1 %v25512_v42 }
 0xa1a   : > { %20719 = vmatpush3.bf16.msra.mxu1 %v23256_v37 }
 0xa1b   : > { %20720 = vmatprep.subr.bf16.mxu1 %v25512_v42 }
 0xa1e   : > { %20722 = vmatpush3.bf16.msra.mxu1 %v23260_v46 }
 0xa1f   : > { %20723 = vmatprep.subr.bf16.mxu1 %v25512_v42 }
 0xa22   : > { %20725 = vmatpush3.bf16.msra.mxu1 %v23264_v50 }
 0xa23   : > { %20726 = vmatprep.subr.bf16.mxu1 %v25512_v42 }
 0xa26   : > { %20728 = vmatpush3.bf16.msra.mxu1 %v23268_v60 }
 0xa27   : > { %20729 = vmatprep.subr.bf16.mxu1 %v25512_v42 }
 0xa2a   : > { %20731 = vmatpush3.bf16.msra.mxu1 %v23272_v41 }
 0xa2b   : > { %17550 = vmatprep.subr.mxu1 %v25510_v4 }
 0xa2e   : > { %17551 = vmatpush3.msra.mxu1 %v25561_v17 }
 0xa2f   : > { %17553 = vmatmul.mubr.f32.vlgmr.msra.gmra.mrb[8].mxu1 %v4693_v11  ;;  %20732 = vmatprep.subr.bf16.mxu1 %v25512_v42  ;;  %v25585_v11 = vld [vmem:[#allocation44_spill] sm:$0xff] }
 0xa30   : > { %20734 = vmatpush3.bf16.msra.mxu1 %v23102_v5  ;;  %17581 = vmatprep.mubr.msk.f32.mxu1 %vm22650_vm0, %v25510_v4 }
 0xa31   : > { %20735 = vmatprep.subr.bf16.mxu1 %v25512_v42 }
 0xa34   : > { %20737 = vmatpush3.bf16.msra.mxu1 %v23112_v10 }
 0xa35   : > { %20738 = vmatprep.subr.bf16.mxu1 %v25512_v42 }
 0xa38   : > { %20740 = vmatpush3.bf16.msra.mxu1 %v23122_v22 }
 0xa39   : > { %20741 = vmatprep.subr.bf16.mxu1 %v25512_v42 }
 0xa3c   : > { %20743 = vmatpush3.bf16.msra.mxu1 %v23132_v47 }
 0xa3d   : > { %20744 = vmatprep.subr.bf16.mxu1 %v25512_v42 }
 0xa40   : > { %20746 = vmatpush3.bf16.msra.mxu1 %v23142_v62 }
 0xa41   : > { %20747 = vmatprep.subr.bf16.mxu1 %v25512_v42 }
 0xa44   : > { %20749 = vmatpush3.bf16.msra.mxu1 %v23156_v45 }
 0xa45   : > { %17579 = vmatprep.subr.mxu1 %v25510_v4 }
 0xa48   : > { %17580 = vmatpush3.msra.mxu1 %v23167_v48 }
 0xa49   : > { %17582 = vmatmul.mubr.f32.vlgmr.msra.gmra.mrb[8].mxu1 %v4694_v0  ;;  %20750 = vmatprep.subr.bf16.mxu1 %v25512_v42  ;;  %v25587_v0 = vld [vmem:[#allocation46_spill] sm:$0xff] }
 0xa4a   : > { %20752 = vmatpush3.bf16.msra.mxu1 %v25583_v32  ;;  %17610 = vmatprep.mubr.msk.f32.mxu1 %vm22650_vm0, %v25510_v4 }
 0xa4b   : > { %20753 = vmatprep.subr.bf16.mxu1 %v25512_v42 }
 0xa4e   : > { %20755 = vmatpush3.bf16.msra.mxu1 %v25584_v18 }
 0xa4f   : > { %20756 = vmatprep.subr.bf16.mxu1 %v25512_v42 }
 0xa52   : > { %20758 = vmatpush3.bf16.msra.mxu1 %v25585_v11 }
 0xa53   : > { %20759 = vmatprep.subr.bf16.mxu1 %v25512_v42 }
 0xa56   : > { %20761 = vmatpush3.bf16.msra.mxu1 %v25586_v7 }
 0xa57   : > { %20762 = vmatprep.subr.bf16.mxu1 %v25512_v42 }
 0xa5a   : > { %20764 = vmatpush3.bf16.msra.mxu1 %v25587_v0 }
 0xa5b   : > { %20765 = vmatprep.subr.bf16.mxu1 %v25512_v42 }
 0xa5e   : > { %20767 = vmatpush3.bf16.msra.mxu1 %v25588_v54 }
 0xa5f   : > { %17608 = vmatprep.subr.mxu1 %v25510_v4 }
 0xa62   : > { %17609 = vmatpush3.msra.mxu1 %v25589_v53 }
 0xa63   : > { %17611 = vmatmul.mubr.f32.vlgmr.msra.gmra.mrb[8].mxu1 %v23892_v3  ;;  %20768 = vmatprep.subr.bf16.mxu1 %v25512_v42 }
 0xa64   : > { %20770 = vmatpush3.bf16.msra.mxu1 %v23102_v5  ;;  %17639 = vmatprep.mubr.msk.f32.mxu1 %vm22650_vm0, %v25510_v4 }
 0xa65   : > { %20771 = vmatprep.subr.bf16.mxu1 %v25512_v42 }
 0xa68   : > { %20773 = vmatpush3.bf16.msra.mxu1 %v23112_v10 }
 0xa69   : > { %20774 = vmatprep.subr.bf16.mxu1 %v25512_v42 }
 0xa6c   : > { %20776 = vmatpush3.bf16.msra.mxu1 %v23122_v22 }
 0xa6d   : > { %20777 = vmatprep.subr.bf16.mxu1 %v25512_v42 }
 0xa70   : > { %20779 = vmatpush3.bf16.msra.mxu1 %v23132_v47 }
 0xa71   : > { %20780 = vmatprep.subr.bf16.mxu1 %v25512_v42 }
 0xa74   : > { %20782 = vmatpush3.bf16.msra.mxu1 %v23142_v62 }
 0xa75   : > { %20783 = vmatprep.subr.bf16.mxu1 %v25512_v42 }
 0xa78   : > { %20785 = vmatpush3.bf16.msra.mxu1 %v23156_v45 }
 0xa79   : > { %17637 = vmatprep.subr.mxu1 %v25510_v4 }
 0xa7c   : > { %17638 = vmatpush3.msra.mxu1 %v23167_v48 }
 0xa7d   : > { %17640 = vmatmul.mubr.f32.vlgmr.msra.gmra.mrb[8].mxu1 %v23892_v3  ;;  %20786 = vmatprep.subr.bf16.mxu1 %v25512_v42 }
 0xa7e   : > { %20788 = vmatpush3.bf16.msra.mxu1 %v23422_v38  ;;  %17650 = vmatprep.mubr.msk.f32.mxu1 %vm22650_vm0, %v25510_v4 }
 0xa7f   : > { %20789 = vmatprep.subr.bf16.mxu1 %v25512_v42 }
 0xa82   : > { %20791 = vmatpush3.bf16.msra.mxu1 %v23432_v8 }
 0xa83   : > { %20792 = vmatprep.subr.bf16.mxu1 %v25512_v42 }
 0xb50   : > { %v5212_v12 = vpop.f32.mrb[8].mxu1 }
 0xb51   : > { %v22269_v3 = vadd.f32 %v23987_v15, %v5212_v12  ;;  %v17641_v31 = vpop.f32.mrb[9].mxu1 }
 0xb53   : > { %v5216_v30 = vand.u32 2147483647, %v22269_v3 }
 0xb55   : > { %v5217_v57 = vadd.f32 1.0, %v5216_v30  ;;  %v25590_v30 = vld [vmem:[#allocation8_spill] sm:$0xff] }
 0xb57   : > { %22578 = vrcp.f32 %v5217_v57  ;;  %v25591_v57 = vld [vmem:[#allocation9_spill] sm:$0xff] }
 0xb61   : > { %v22579_v53 = vpop.eup %22578 }
 0xb62   : > { %v5219_v54 = vmul.f32 %v22579_v53, %v22269_v3 }
 0xb64   : > { %v5221_v0 = vsel %vm1722_vm4, %v5219_v54, 0 }
 0xb65   : > { %v5292_v7 = vand.u32 4294901760, %v5221_v0 }
 0xb67   : > { %v5293_v11 = vsub.f32 %v5221_v0, %v5292_v7 }
 0xb69   : > { %v5294_v18 = vand.u32 4294901760, %v5293_v11 }
 0xb6b   : > { %v5295_v32 = vsub.f32 %v5293_v11, %v5294_v18 }
 0xb6d   : > { %v5296_v17 = vand.u32 4294901760, %v5295_v32  ;;  %v14616_v32 = vld [vmem:[%s22792_s12 + $0x18] sm:$0xff] }
 0xb6f   : > { %17651 = vmatmul.mubr.f32.vlgmr.msra.gmra.mrb[10].mxu1 %v5296_v17 }
 0xb70   : > { %20794 = vmatpush3.bf16.msra.mxu1 %v23436_v21  ;;  %17661 = vmatprep.mubr.msk.f32.mxu1 %vm22650_vm0, %v25510_v4 }
 0xb71   : > { %20795 = vmatprep.subr.bf16.mxu1 %v25512_v42 }
 0xb74   : > { %20797 = vmatpush3.bf16.msra.mxu1 %v23438_v29 }
 0xb75   : > { %20798 = vmatprep.subr.bf16.mxu1 %v25512_v42 }
 0xb77   : > { %17662 = vmatmul.mubr.f32.vlgmr.msra.gmra.mrb[10].mxu1 %v5292_v7 }
 0xb78   : > { %20800 = vmatpush3.bf16.msra.mxu1 %v23440_v36  ;;  %17672 = vmatprep.mubr.msk.f32.mxu1 %vm22650_vm0, %v25510_v4 }
 0xb79   : > { %20801 = vmatprep.subr.bf16.mxu1 %v25512_v42 }
 0xb7c   : > { %20803 = vmatpush3.bf16.msra.mxu1 %v23442_v23 }
 0xb7d   : > { %20804 = vmatprep.subr.bf16.mxu1 %v25512_v42 }
 0xb7f   : > { %17673 = vmatmul.mubr.f32.vlgmr.msra.gmra.mrb[10].mxu1 %v5293_v11 }
 0xb80   : > { %20806 = vmatpush3.bf16.msra.mxu1 %v23422_v38  ;;  %17683 = vmatprep.mubr.msk.f32.mxu1 %vm22650_vm0, %v25510_v4 }
 0xb81   : > { %20807 = vmatprep.subr.bf16.mxu1 %v25512_v42 }
 0xb84   : > { %20809 = vmatpush3.bf16.msra.mxu1 %v23432_v8 }
 0xb85   : > { %20810 = vmatprep.subr.bf16.mxu1 %v25512_v42 }
 0xb87   : > { %17684 = vmatmul.mubr.f32.vlgmr.msra.gmra.mrb[10].mxu1 %v5294_v18  ;;  %v24041_v18 = vld [vmem:[%s25369_s7] ss:$0 sm:$0xff] }
 0xb88   : > { %20812 = vmatpush3.bf16.msra.mxu1 %v23444_v16  ;;  %17694 = vmatprep.mubr.msk.f32.mxu1 %vm22650_vm0, %v25510_v4 }
 0xb89   : > { %20813 = vmatprep.subr.bf16.mxu1 %v25512_v42 }
 0xb8c   : > { %20815 = vmatpush3.bf16.msra.mxu1 %v23446_v26 }
 0xb8d   : > { %20816 = vmatprep.subr.bf16.mxu1 %v25512_v42 }
 0xb8f   : > { %17695 = vmatmul.mubr.f32.vlgmr.msra.gmra.mrb[10].mxu1 %v5292_v7 }
 0xb90   : > { %20818 = vmatpush3.bf16.msra.mxu1 %v23422_v38  ;;  %17705 = vmatprep.mubr.msk.f32.mxu1 %vm22650_vm0, %v25510_v4 }
 0xb91   : > { %20819 = vmatprep.subr.bf16.mxu1 %v25512_v42 }
 0xb94   : > { %20821 = vmatpush3.bf16.msra.mxu1 %v23432_v8 }
 0xb95   : > { %20966 = vmatprep.subr.bf16.mxu1 %v25512_v42 }
 0xb97   : > { %17706 = vmatmul.mubr.f32.vlgmr.msra.gmra.mrb[10].mxu1 %v5292_v7 }
 0xb98   : > { %20968 = vmatpush3.bf16.msra.mxu1 %v23102_v5  ;;  %17944 = vmatprep.mubr.msk.f32.mxu1 %vm22650_vm0, %v25510_v4 }
 0xb99   : > { %20969 = vmatprep.subr.bf16.mxu1 %v25512_v42 }
 0xb9c   : > { %20971 = vmatpush3.bf16.msra.mxu1 %v23112_v10 }
 0xb9d   : > { %20972 = vmatprep.subr.bf16.mxu1 %v25512_v42 }
 0xba0   : > { %20974 = vmatpush3.bf16.msra.mxu1 %v23122_v22 }
 0xba1   : > { %20975 = vmatprep.subr.bf16.mxu1 %v25512_v42 }
 0xba4   : > { %20977 = vmatpush3.bf16.msra.mxu1 %v23132_v47 }
 0xba5   : > { %20978 = vmatprep.subr.bf16.mxu1 %v25512_v42 }
 0xba8   : > { %20980 = vmatpush3.bf16.msra.mxu1 %v23142_v62 }
 0xba9   : > { %20981 = vmatprep.subr.bf16.mxu1 %v25512_v42 }
 0xbac   : > { %20983 = vmatpush3.bf16.msra.mxu1 %v23156_v45 }
 0xbad   : > { %17942 = vmatprep.subr.mxu1 %v25510_v4 }
 0xbb0   : > { %17943 = vmatpush3.msra.mxu1 %v23167_v48 }
 0xbb1   : > { %20984 = vmatprep.subr.bf16.mxu1 %v25512_v42 }
 0xc6a   : > { %v5704_v17 = vpop.f32.mrb[10].mxu1 }
 0xc6b   : > { %v22270_v11 = vadd.f32 %v24041_v18, %v5704_v17  ;;  %v17707_v7 = vpop.f32.mrb[11].mxu1  ;;  %v25592_v17 = vld [vmem:[#allocation10_spill] sm:$0xff] }
 0xc6c   : > { %v25595_v7 = vld [vmem:[#allocation13_spill] sm:$0xff] }
 0xc6d   : > { %14615 = vst [vmem:[%s23509_s23 + $0x10] sm:$0xff] %v22270_v11  ;;  %v5712_v0 = vadd.f32 %v22270_v11, %v14616_v32  ;;  %v25593_v32 = vld [vmem:[#allocation11_spill] sm:$0xff]  ;;  %v25594_v11 = vld [vmem:[#allocation12_spill] sm:$0xff] }
 0xc6f   : > { %v24045_v54 = vand.u32 4294901760, %v5712_v0 }
 0xc71   : > { %v5795_v53 = vsub.f32 %v5712_v0, %v24045_v54  ;;  %v25596_v0 = vld [vmem:[#allocation14_spill] sm:$0xff] }
 0xc73   : > { %v5796_v12 = vand.u32 4294901760, %v5795_v53 }
 0xc75   : > { %v5797_v3 = vsub.f32 %v5795_v53, %v5796_v12 }
 0xc77   : > { %v5798_v31 = vand.u32 4294901760, %v5797_v3  ;;  %v25598_v3 = vld [vmem:[#allocation16_spill] sm:$0xff] }
 0xc79   : > { %17741 = vmatmul.mubr.f32.vlgmr.msra.gmra.mrb[6].mxu0 %v5798_v31  ;;  %v25600_v31 = vld [vmem:[#allocation18_spill] sm:$0xff] }
 0xc7a   : > { %20848 = vmatpush3.bf16.msra.mxu0 %v22922_v49  ;;  %17775 = vmatprep.mubr.msk.f32.mxu0 %vm22650_vm0, %v25510_v4 }
 0xc7b   : > { %20849 = vmatprep.subr.bf16.mxu0 %v25512_v42 }
 0xc7e   : > { %20851 = vmatpush3.bf16.msra.mxu0 %v22929_v1 }
 0xc7f   : > { %20852 = vmatprep.subr.bf16.mxu0 %v25512_v42 }
 0xc82   : > { %20854 = vmatpush3.bf16.msra.mxu0 %v22935_v19 }
 0xc83   : > { %20855 = vmatprep.subr.bf16.mxu0 %v25512_v42 }
 0xc86   : > { %20857 = vmatpush3.bf16.msra.mxu0 %v22940_v24 }
 0xc87   : > { %20858 = vmatprep.subr.bf16.mxu0 %v25512_v42 }
 0xc8a   : > { %20860 = vmatpush3.bf16.msra.mxu0 %v22948_v25 }
 0xc8b   : > { %20861 = vmatprep.subr.bf16.mxu0 %v25512_v42 }
 0xc8e   : > { %20863 = vmatpush3.bf16.msra.mxu0 %v22953_v28 }
 0xc8f   : > { %20864 = vmatprep.subr.bf16.mxu0 %v25512_v42 }
 0xc92   : > { %20866 = vmatpush3.bf16.msra.mxu0 %v22959_v2 }
 0xc93   : > { %20867 = vmatprep.subr.bf16.mxu0 %v25512_v42 }
 0xc96   : > { %20869 = vmatpush3.bf16.msra.mxu0 %v22963_v14 }
 0xc97   : > { %20870 = vmatprep.subr.bf16.mxu0 %v25512_v42 }
 0xc99   : > { %17776 = vmatmul.mubr.f32.vlgmr.msra.gmra.mrb[6].mxu0 %v24045_v54 }
 0xc9a   : > { %20872 = vmatpush3.bf16.msra.mxu0 %v22969_v33  ;;  %17810 = vmatprep.mubr.msk.f32.mxu0 %vm22650_vm0, %v25510_v4 }
 0xc9b   : > { %20873 = vmatprep.subr.bf16.mxu0 %v25512_v42 }
 0xc9e   : > { %20875 = vmatpush3.bf16.msra.mxu0 %v22976_v34 }
 0xc9f   : > { %20876 = vmatprep.subr.bf16.mxu0 %v25512_v42 }
 0xca2   : > { %20878 = vmatpush3.bf16.msra.mxu0 %v22984_v43 }
 0xca3   : > { %20879 = vmatprep.subr.bf16.mxu0 %v25512_v42 }
 0xca6   : > { %20881 = vmatpush3.bf16.msra.mxu0 %v22990_v51 }
 0xca7   : > { %20882 = vmatprep.subr.bf16.mxu0 %v25512_v42 }
 0xcaa   : > { %20884 = vmatpush3.bf16.msra.mxu0 %v22996_v52 }
 0xcab   : > { %20885 = vmatprep.subr.bf16.mxu0 %v25512_v42 }
 0xcae   : > { %20887 = vmatpush3.bf16.msra.mxu0 %v23002_v55 }
 0xcaf   : > { %20888 = vmatprep.subr.bf16.mxu0 %v25512_v42 }
 0xcb2   : > { %20890 = vmatpush3.bf16.msra.mxu0 %v23008_v56 }
 0xcb3   : > { %20891 = vmatprep.subr.bf16.mxu0 %v25512_v42 }
 0xcb6   : > { %20893 = vmatpush3.bf16.msra.mxu0 %v23014_v63 }
 0xcb7   : > { %20894 = vmatprep.subr.bf16.mxu0 %v25512_v42 }
 0xcb9   : > { %17811 = vmatmul.mubr.f32.vlgmr.msra.gmra.mrb[6].mxu0 %v5795_v53  ;;  %v25597_v53 = vld [vmem:[#allocation15_spill] sm:$0xff] }
 0xcba   : > { %20896 = vmatpush3.bf16.msra.mxu0 %v25545_v59  ;;  %17845 = vmatprep.mubr.msk.f32.mxu0 %vm22650_vm0, %v25510_v4 }
 0xcbb   : > { %20897 = vmatprep.subr.bf16.mxu0 %v25512_v42 }
 0xcbe   : > { %20899 = vmatpush3.bf16.msra.mxu0 %v25546_v39 }
 0xcbf   : > { %20900 = vmatprep.subr.bf16.mxu0 %v25512_v42 }
 0xcc2   : > { %20902 = vmatpush3.bf16.msra.mxu0 %v25569_v27 }
 0xcc3   : > { %20903 = vmatprep.subr.bf16.mxu0 %v25512_v42 }
 0xcc6   : > { %20905 = vmatpush3.bf16.msra.mxu0 %v25590_v30 }
 0xcc7   : > { %20906 = vmatprep.subr.bf16.mxu0 %v25512_v42 }
 0xcca   : > { %20908 = vmatpush3.bf16.msra.mxu0 %v25591_v57 }
 0xccb   : > { %20909 = vmatprep.subr.bf16.mxu0 %v25512_v42 }
 0xcce   : > { %20911 = vmatpush3.bf16.msra.mxu0 %v25592_v17 }
 0xccf   : > { %20912 = vmatprep.subr.bf16.mxu0 %v25512_v42 }
 0xcd2   : > { %20914 = vmatpush3.bf16.msra.mxu0 %v25593_v32 }
 0xcd3   : > { %20915 = vmatprep.subr.bf16.mxu0 %v25512_v42 }
 0xcd6   : > { %20917 = vmatpush3.bf16.msra.mxu0 %v25594_v11 }
 0xcd7   : > { %20918 = vmatprep.subr.bf16.mxu0 %v25512_v42 }
 0xcd9   : > { %17846 = vmatmul.mubr.f32.vlgmr.msra.gmra.mrb[6].mxu0 %v5796_v12  ;;  %v25599_v12 = vld [vmem:[#allocation17_spill] sm:$0xff] }
 0xcda   : > { %20920 = vmatpush3.bf16.msra.mxu0 %v25595_v7  ;;  %17880 = vmatprep.mubr.msk.f32.mxu0 %vm22650_vm0, %v25510_v4  ;;  %v25601_v7 = vld [vmem:[#allocation19_spill] sm:$0xff] }
 0xcdb   : > { %20921 = vmatprep.subr.bf16.mxu0 %v25512_v42 }
 0xcde   : > { %20923 = vmatpush3.bf16.msra.mxu0 %v25596_v0  ;;  %v25602_v0 = vld [vmem:[#allocation20_spill] sm:$0xff] }
 0xcdf   : > { %20924 = vmatprep.subr.bf16.mxu0 %v25512_v42 }
 0xce2   : > { %20926 = vmatpush3.bf16.msra.mxu0 %v25597_v53 }
 0xce3   : > { %20927 = vmatprep.subr.bf16.mxu0 %v25512_v42 }
 0xce6   : > { %20929 = vmatpush3.bf16.msra.mxu0 %v25598_v3 }
 0xce7   : > { %20930 = vmatprep.subr.bf16.mxu0 %v25512_v42 }
 0xcea   : > { %20932 = vmatpush3.bf16.msra.mxu0 %v25599_v12 }
 0xceb   : > { %20933 = vmatprep.subr.bf16.mxu0 %v25512_v42 }
 0xcee   : > { %20935 = vmatpush3.bf16.msra.mxu0 %v25600_v31 }
 0xcef   : > { %20936 = vmatprep.subr.bf16.mxu0 %v25512_v42 }
 0xcf2   : > { %20938 = vmatpush3.bf16.msra.mxu0 %v25601_v7 }
 0xcf3   : > { %20939 = vmatprep.subr.bf16.mxu0 %v25512_v42 }
 0xcf6   : > { %20941 = vmatpush3.bf16.msra.mxu0 %v25602_v0 }
 0xcf7   : > { %20942 = vmatprep.subr.bf16.mxu0 %v25512_v42 }
 0xcf9   : > { %17881 = vmatmul.mubr.f32.vlgmr.msra.gmra.mrb[6].mxu0 %v24045_v54 }
 0xcfa   : > { %20944 = vmatpush3.bf16.msra.mxu0 %v25545_v59  ;;  %17915 = vmatprep.mubr.msk.f32.mxu0 %vm22650_vm0, %v25510_v4 }
 0xcfb   : > { %20945 = vmatprep.subr.bf16.mxu0 %v25512_v42 }
 0xcfe   : > { %20947 = vmatpush3.bf16.msra.mxu0 %v25546_v39 }
 0xcff   : > { %20948 = vmatprep.subr.bf16.mxu0 %v25512_v42 }
 0xd02   : > { %20950 = vmatpush3.bf16.msra.mxu0 %v25569_v27 }
 0xd03   : > { %20951 = vmatprep.subr.bf16.mxu0 %v25512_v42 }
 0xd06   : > { %20953 = vmatpush3.bf16.msra.mxu0 %v25590_v30 }
 0xd07   : > { %20954 = vmatprep.subr.bf16.mxu0 %v25512_v42 }
 0xd0a   : > { %20956 = vmatpush3.bf16.msra.mxu0 %v25591_v57 }
 0xd0b   : > { %20957 = vmatprep.subr.bf16.mxu0 %v25512_v42 }
 0xd0e   : > { %20959 = vmatpush3.bf16.msra.mxu0 %v25592_v17 }
 0xd0f   : > { %20960 = vmatprep.subr.bf16.mxu0 %v25512_v42 }
 0xd12   : > { %20962 = vmatpush3.bf16.msra.mxu0 %v25593_v32 }
 0xd13   : > { %20963 = vmatprep.subr.bf16.mxu0 %v25512_v42 }
 0xd16   : > { %20965 = vmatpush3.bf16.msra.mxu0 %v25594_v11 }
 0xd17   : > { %21074 = vmatprep.subr.bf16.mxu0 %v25512_v42 }
 0xd19   : > { %17916 = vmatmul.mubr.f32.vlgmr.msra.gmra.mrb[6].mxu0 %v24045_v54 }
 0xd1a   : > { %21076 = vmatpush3.bf16.msra.mxu0 %v23422_v38  ;;  %18100 = vmatprep.mubr.msk.f32.mxu0 %vm22650_vm0, %v25510_v4 }
 0xd1b   : > { %21077 = vmatprep.subr.bf16.mxu0 %v25512_v42 }
 0xd1e   : > { %21079 = vmatpush3.bf16.msra.mxu0 %v23432_v8 }
 0xd1f   : > { %21080 = vmatprep.subr.bf16.mxu0 %v25512_v42 }
 0xdec   : > { %v6350_v0 = vpop.f32.mrb[6].mxu0 }
 0xded   : > { %v22271_v7 = vadd.f32 %v23888_v20, %v6350_v0  ;;  %v17917_v31 = vpop.f32.mrb[7].mxu0  ;;  %v25607_v20 = vld [vmem:[#allocation45_spill] sm:$0xff]  ;;  %v25610_v0 = vld [vmem:[#allocation40_spill] sm:$0xff] }
 0xdef   : > { %v6354_v12 = vand.u32 2147483647, %v22271_v7 }
 0xdf1   : > { %v6355_v3 = vadd.f32 1.0, %v6354_v12 }
 0xdf3   : > { %22580 = vrcp.f32 %v6355_v3 }
 0xdfd   : > { %v22581_v53 = vpop.eup %22580 }
 0xdfe   : > { %v6357_v54 = vmul.f32 %v22581_v53, %v22271_v7  ;;  %v25609_v7 = vld [vmem:[#allocation47_spill] sm:$0xff] }
 0xe00   : > { %v6359_v63 = vsel %vm1108_vm2, %v6357_v54, 0 }
 0xe01   : > { %v24149_v56 = vand.u32 4294901760, %v6359_v63 }
 0xe03   : > { %v6440_v55 = vsub.f32 %v6359_v63, %v24149_v56  ;;  %v25606_v63 = vld [vmem:[#allocation44_spill] sm:$0xff] }
 0xe05   : > { %v6441_v52 = vand.u32 4294901760, %v6440_v55 }
 0xe07   : > { %v6442_v51 = vsub.f32 %v6440_v55, %v6441_v52 }
 0xe09   : > { %v6443_v43 = vand.u32 4294901760, %v6442_v51  ;;  %v25604_v51 = vld [vmem:[#allocation42_spill] sm:$0xff] }
 0xe0b   : > { %17945 = vmatmul.mubr.f32.vlgmr.msra.gmra.mrb[12].mxu1 %v6443_v43  ;;  %v25603_v43 = vld [vmem:[#allocation39_spill] sm:$0xff] }
 0xe0c   : > { %20986 = vmatpush3.bf16.msra.mxu1 %v23183_v58  ;;  %17973 = vmatprep.mubr.msk.f32.mxu1 %vm22650_vm0, %v25510_v4 }
 0xe0d   : > { %20987 = vmatprep.subr.bf16.mxu1 %v25512_v42 }
 0xe10   : > { %20989 = vmatpush3.bf16.msra.mxu1 %v23198_v44 }
 0xe11   : > { %20990 = vmatprep.subr.bf16.mxu1 %v25512_v42 }
 0xe14   : > { %20992 = vmatpush3.bf16.msra.mxu1 %v23212_v9 }
 0xe15   : > { %20993 = vmatprep.subr.bf16.mxu1 %v25512_v42 }
 0xe18   : > { %20995 = vmatpush3.bf16.msra.mxu1 %v23236_v61 }
 0xe19   : > { %20996 = vmatprep.subr.bf16.mxu1 %v25512_v42 }
 0xe1c   : > { %20998 = vmatpush3.bf16.msra.mxu1 %v23240_v6 }
 0xe1d   : > { %20999 = vmatprep.subr.bf16.mxu1 %v25512_v42 }
 0xe20   : > { %21001 = vmatpush3.bf16.msra.mxu1 %v23248_v13 }
 0xe21   : > { %17971 = vmatprep.subr.mxu1 %v25510_v4 }
 0xe24   : > { %17972 = vmatpush3.msra.mxu1 %v23306_v40 }
 0xe25   : > { %17974 = vmatmul.mubr.f32.vlgmr.msra.gmra.mrb[12].mxu1 %v24149_v56  ;;  %21002 = vmatprep.subr.bf16.mxu1 %v25512_v42 }
 0xe26   : > { %21004 = vmatpush3.bf16.msra.mxu1 %v23252_v35  ;;  %18002 = vmatprep.mubr.msk.f32.mxu1 %vm22650_vm0, %v25510_v4 }
 0xe27   : > { %21005 = vmatprep.subr.bf16.mxu1 %v25512_v42 }
 0xe2a   : > { %21007 = vmatpush3.bf16.msra.mxu1 %v23256_v37 }
 0xe2b   : > { %21008 = vmatprep.subr.bf16.mxu1 %v25512_v42 }
 0xe2e   : > { %21010 = vmatpush3.bf16.msra.mxu1 %v23260_v46 }
 0xe2f   : > { %21011 = vmatprep.subr.bf16.mxu1 %v25512_v42 }
 0xe32   : > { %21013 = vmatpush3.bf16.msra.mxu1 %v23264_v50 }
 0xe33   : > { %21014 = vmatprep.subr.bf16.mxu1 %v25512_v42 }
 0xe36   : > { %21016 = vmatpush3.bf16.msra.mxu1 %v23268_v60 }
 0xe37   : > { %21017 = vmatprep.subr.bf16.mxu1 %v25512_v42 }
 0xe3a   : > { %21019 = vmatpush3.bf16.msra.mxu1 %v23272_v41 }
 0xe3b   : > { %18000 = vmatprep.subr.mxu1 %v25510_v4 }
 0xe3e   : > { %18001 = vmatpush3.msra.mxu1 %v25603_v43 }
 0xe3f   : > { %18003 = vmatmul.mubr.f32.vlgmr.msra.gmra.mrb[12].mxu1 %v6440_v55  ;;  %21020 = vmatprep.subr.bf16.mxu1 %v25512_v42  ;;  %v25605_v55 = vld [vmem:[#allocation43_spill] sm:$0xff] }
 0xe40   : > { %21022 = vmatpush3.bf16.msra.mxu1 %v23102_v5  ;;  %18031 = vmatprep.mubr.msk.f32.mxu1 %vm22650_vm0, %v25510_v4 }
 0xe41   : > { %21023 = vmatprep.subr.bf16.mxu1 %v25512_v42 }
 0xe44   : > { %21025 = vmatpush3.bf16.msra.mxu1 %v23112_v10 }
 0xe45   : > { %21026 = vmatprep.subr.bf16.mxu1 %v25512_v42 }
 0xe48   : > { %21028 = vmatpush3.bf16.msra.mxu1 %v23122_v22 }
 0xe49   : > { %21029 = vmatprep.subr.bf16.mxu1 %v25512_v42 }
 0xe4c   : > { %21031 = vmatpush3.bf16.msra.mxu1 %v23132_v47 }
 0xe4d   : > { %21032 = vmatprep.subr.bf16.mxu1 %v25512_v42 }
 0xe50   : > { %21034 = vmatpush3.bf16.msra.mxu1 %v23142_v62 }
 0xe51   : > { %21035 = vmatprep.subr.bf16.mxu1 %v25512_v42 }
 0xe54   : > { %21037 = vmatpush3.bf16.msra.mxu1 %v23156_v45 }
 0xe55   : > { %18029 = vmatprep.subr.mxu1 %v25510_v4 }
 0xe58   : > { %18030 = vmatpush3.msra.mxu1 %v23167_v48 }
 0xe59   : > { %18032 = vmatmul.mubr.f32.vlgmr.msra.gmra.mrb[12].mxu1 %v6441_v52  ;;  %21038 = vmatprep.subr.bf16.mxu1 %v25512_v42  ;;  %v25608_v52 = vld [vmem:[#allocation46_spill] sm:$0xff] }
 0xe5a   : > { %21040 = vmatpush3.bf16.msra.mxu1 %v25604_v51  ;;  %18060 = vmatprep.mubr.msk.f32.mxu1 %vm22650_vm0, %v25510_v4 }
 0xe5b   : > { %21041 = vmatprep.subr.bf16.mxu1 %v25512_v42 }
 0xe5e   : > { %21043 = vmatpush3.bf16.msra.mxu1 %v25605_v55 }
 0xe5f   : > { %21044 = vmatprep.subr.bf16.mxu1 %v25512_v42 }
 0xe62   : > { %21046 = vmatpush3.bf16.msra.mxu1 %v25606_v63 }
 0xe63   : > { %21047 = vmatprep.subr.bf16.mxu1 %v25512_v42 }
 0xe66   : > { %21049 = vmatpush3.bf16.msra.mxu1 %v25607_v20 }
 0xe67   : > { %21050 = vmatprep.subr.bf16.mxu1 %v25512_v42 }
 0xe6a   : > { %21052 = vmatpush3.bf16.msra.mxu1 %v25608_v52 }
 0xe6b   : > { %21053 = vmatprep.subr.bf16.mxu1 %v25512_v42 }
 0xe6e   : > { %21055 = vmatpush3.bf16.msra.mxu1 %v25609_v7 }
 0xe6f   : > { %18058 = vmatprep.subr.mxu1 %v25510_v4 }
 0xe72   : > { %18059 = vmatpush3.msra.mxu1 %v25610_v0 }
 0xe73   : > { %18061 = vmatmul.mubr.f32.vlgmr.msra.gmra.mrb[12].mxu1 %v24149_v56  ;;  %21056 = vmatprep.subr.bf16.mxu1 %v25512_v42 }
 0xe74   : > { %21058 = vmatpush3.bf16.msra.mxu1 %v23102_v5  ;;  %18089 = vmatprep.mubr.msk.f32.mxu1 %vm22650_vm0, %v25510_v4 }
 0xe75   : > { %21059 = vmatprep.subr.bf16.mxu1 %v25512_v42 }
 0xe78   : > { %21061 = vmatpush3.bf16.msra.mxu1 %v23112_v10 }
 0xe79   : > { %21062 = vmatprep.subr.bf16.mxu1 %v25512_v42 }
 0xe7c   : > { %21064 = vmatpush3.bf16.msra.mxu1 %v23122_v22 }
 0xe7d   : > { %21065 = vmatprep.subr.bf16.mxu1 %v25512_v42 }
 0xe80   : > { %21067 = vmatpush3.bf16.msra.mxu1 %v23132_v47 }
 0xe81   : > { %21068 = vmatprep.subr.bf16.mxu1 %v25512_v42 }
 0xe84   : > { %21070 = vmatpush3.bf16.msra.mxu1 %v23142_v62 }
 0xe85   : > { %21071 = vmatprep.subr.bf16.mxu1 %v25512_v42 }
 0xe88   : > { %21073 = vmatpush3.bf16.msra.mxu1 %v23156_v45 }
 0xe89   : > { %18087 = vmatprep.subr.mxu1 %v25510_v4 }
 0xe8c   : > { %18088 = vmatpush3.msra.mxu1 %v23167_v48 }
 0xe8d   : > { %18090 = vmatmul.mubr.f32.vlgmr.msra.gmra.mrb[12].mxu1 %v24149_v56  ;;  %21110 = vmatprep.subr.bf16.mxu1 %v25512_v42 }
 0xe8e   : > { %21112 = vmatpush3.bf16.msra.mxu1 %v25545_v59  ;;  %18190 = vmatprep.mubr.msk.f32.mxu1 %vm22650_vm0, %v25510_v4 }
 0xe8f   : > { %21113 = vmatprep.subr.bf16.mxu1 %v25512_v42 }
 0xe92   : > { %21115 = vmatpush3.bf16.msra.mxu1 %v25546_v39 }
 0xe93   : > { %21116 = vmatprep.subr.bf16.mxu1 %v25512_v42 }
 0xe96   : > { %21118 = vmatpush3.bf16.msra.mxu1 %v25569_v27 }
 0xe97   : > { %21119 = vmatprep.subr.bf16.mxu1 %v25512_v42 }
 0xe9a   : > { %21121 = vmatpush3.bf16.msra.mxu1 %v25590_v30 }
 0xe9b   : > { %21122 = vmatprep.subr.bf16.mxu1 %v25512_v42 }
 0xe9e   : > { %21124 = vmatpush3.bf16.msra.mxu1 %v25591_v57 }
 0xe9f   : > { %21125 = vmatprep.subr.bf16.mxu1 %v25512_v42 }
 0xea2   : > { %21127 = vmatpush3.bf16.msra.mxu1 %v25592_v17 }
 0xea3   : > { %21128 = vmatprep.subr.bf16.mxu1 %v25512_v42 }
 0xea6   : > { %21130 = vmatpush3.bf16.msra.mxu1 %v25593_v32 }
 0xea7   : > { %21131 = vmatprep.subr.bf16.mxu1 %v25512_v42 }
 0xeaa   : > { %21133 = vmatpush3.bf16.msra.mxu1 %v25594_v11 }
 0xeab   : > { %21134 = vmatprep.subr.bf16.mxu1 %v25512_v42 }
 0xf60   : > { %v6959_v56 = vpop.f32.mrb[12].mxu1 }
 0xf61   : > { %v22272_v53 = vadd.f32 %v23987_v15, %v6959_v56  ;;  %v18091_v3 = vpop.f32.mrb[13].mxu1 }
 0xf62   : > { %v25612_v3 = vld [vmem:[#allocation22_spill] sm:$0xff] }
 0xf63   : > { %v6963_v12 = vand.u32 2147483647, %v22272_v53 }
 0xf65   : > { %v6964_v31 = vadd.f32 1.0, %v6963_v12  ;;  %v25613_v12 = vld [vmem:[#allocation23_spill] sm:$0xff] }
 0xf67   : > { %22582 = vrcp.f32 %v6964_v31  ;;  %v25614_v31 = vld [vmem:[#allocation24_spill] sm:$0xff] }
 0xf71   : > { %v22583_v54 = vpop.eup %22582 }
 0xf72   : > { %v6966_v0 = vmul.f32 %v22583_v54, %v22272_v53  ;;  %v25615_v54 = vld [vmem:[#allocation25_spill] sm:$0xff] }
 0xf74   : > { %v6968_v7 = vsel %vm1722_vm4, %v6966_v0, 0 }
 0xf75   : > { %v7039_v52 = vand.u32 4294901760, %v6968_v7 }
 0xf77   : > { %v7040_v20 = vsub.f32 %v6968_v7, %v7039_v52 }
 0xf79   : > { %v7041_v63 = vand.u32 4294901760, %v7040_v20 }
 0xf7b   : > { %v7042_v55 = vsub.f32 %v7040_v20, %v7041_v63 }
 0xf7d   : > { %v7043_v51 = vand.u32 4294901760, %v7042_v55 }
 0xf7f   : > { %18101 = vmatmul.mubr.f32.vlgmr.msra.gmra.mrb[8].mxu0 %v7043_v51  ;;  %v14618_v51 = vld [vmem:[%s22792_s12 + $0x20] sm:$0xff] }
 0xf80   : > { %21082 = vmatpush3.bf16.msra.mxu0 %v23436_v21  ;;  %18111 = vmatprep.mubr.msk.f32.mxu0 %vm22650_vm0, %v25510_v4 }
 0xf81   : > { %21083 = vmatprep.subr.bf16.mxu0 %v25512_v42 }
 0xf84   : > { %21085 = vmatpush3.bf16.msra.mxu0 %v23438_v29 }
 0xf85   : > { %21086 = vmatprep.subr.bf16.mxu0 %v25512_v42 }
 0xf87   : > { %18112 = vmatmul.mubr.f32.vlgmr.msra.gmra.mrb[8].mxu0 %v7039_v52 }
 0xf88   : > { %21088 = vmatpush3.bf16.msra.mxu0 %v23440_v36  ;;  %18122 = vmatprep.mubr.msk.f32.mxu0 %vm22650_vm0, %v25510_v4 }
 0xf89   : > { %21089 = vmatprep.subr.bf16.mxu0 %v25512_v42 }
 0xf8c   : > { %21091 = vmatpush3.bf16.msra.mxu0 %v23442_v23 }
 0xf8d   : > { %21092 = vmatprep.subr.bf16.mxu0 %v25512_v42 }
 0xf8f   : > { %18123 = vmatmul.mubr.f32.vlgmr.msra.gmra.mrb[8].mxu0 %v7040_v20 }
 0xf90   : > { %21094 = vmatpush3.bf16.msra.mxu0 %v23422_v38  ;;  %18133 = vmatprep.mubr.msk.f32.mxu0 %vm22650_vm0, %v25510_v4 }
 0xf91   : > { %21095 = vmatprep.subr.bf16.mxu0 %v25512_v42 }
 0xf94   : > { %21097 = vmatpush3.bf16.msra.mxu0 %v23432_v8 }
 0xf95   : > { %21098 = vmatprep.subr.bf16.mxu0 %v25512_v42 }
 0xf97   : > { %18134 = vmatmul.mubr.f32.vlgmr.msra.gmra.mrb[8].mxu0 %v7041_v63 }
 0xf98   : > { %21100 = vmatpush3.bf16.msra.mxu0 %v23444_v16  ;;  %18144 = vmatprep.mubr.msk.f32.mxu0 %vm22650_vm0, %v25510_v4 }
 0xf99   : > { %21101 = vmatprep.subr.bf16.mxu0 %v25512_v42 }
 0xf9c   : > { %21103 = vmatpush3.bf16.msra.mxu0 %v23446_v26 }
 0xf9d   : > { %21104 = vmatprep.subr.bf16.mxu0 %v25512_v42 }
 0xf9f   : > { %18145 = vmatmul.mubr.f32.vlgmr.msra.gmra.mrb[8].mxu0 %v7039_v52 }
 0xfa0   : > { %21106 = vmatpush3.bf16.msra.mxu0 %v23422_v38  ;;  %18155 = vmatprep.mubr.msk.f32.mxu0 %vm22650_vm0, %v25510_v4 }
 0xfa1   : > { %21107 = vmatprep.subr.bf16.mxu0 %v25512_v42 }
 0xfa4   : > { %21109 = vmatpush3.bf16.msra.mxu0 %v23432_v8 }
 0xfa5   : > { %21272 = vmatprep.subr.bf16.mxu0 %v25512_v42 }
 0xfa7   : > { %18156 = vmatmul.mubr.f32.vlgmr.msra.gmra.mrb[8].mxu0 %v7039_v52 }
 0xfa8   : > { %21274 = vmatpush3.bf16.msra.mxu0 %v23183_v58  ;;  %18423 = vmatprep.mubr.msk.f32.mxu0 %vm22650_vm0, %v25510_v4 }
 0xfa9   : > { %21275 = vmatprep.subr.bf16.mxu0 %v25512_v42 }
 0xfac   : > { %21277 = vmatpush3.bf16.msra.mxu0 %v23198_v44 }
 0xfad   : > { %21278 = vmatprep.subr.bf16.mxu0 %v25512_v42 }
 0xfb0   : > { %21280 = vmatpush3.bf16.msra.mxu0 %v23212_v9 }
 0xfb1   : > { %21281 = vmatprep.subr.bf16.mxu0 %v25512_v42 }
 0xfb4   : > { %21283 = vmatpush3.bf16.msra.mxu0 %v23236_v61 }
 0xfb5   : > { %21284 = vmatprep.subr.bf16.mxu0 %v25512_v42 }
 0xfb8   : > { %21286 = vmatpush3.bf16.msra.mxu0 %v23240_v6 }
 0xfb9   : > { %21287 = vmatprep.subr.bf16.mxu0 %v25512_v42 }
 0xfbc   : > { %21289 = vmatpush3.bf16.msra.mxu0 %v23248_v13 }
 0xfbd   : > { %18421 = vmatprep.subr.mxu0 %v25510_v4 }
 0xfc0   : > { %18422 = vmatpush3.msra.mxu0 %v23306_v40  ;;  %v24419_v40 = vld [vmem:[%s25365_s3] ss:$0 sm:$0xff] }
 0xfc1   : > { %21290 = vmatprep.subr.bf16.mxu0 %v25512_v42 }
0x107a   : > { %v7451_v15 = vpop.f32.mrb[8].mxu0 }
0x107b   : > { %v22273_v55 = vadd.f32 %v24041_v18, %v7451_v15  ;;  %v18157_v63 = vpop.f32.mrb[9].mxu0  ;;  %v25611_v18 = vld [vmem:[#allocation21_spill] sm:$0xff]  ;;  %v25616_v15 = vld [vmem:[#allocation26_spill] sm:$0xff] }
0x107c   : > { %v25619_v63 = vld [vmem:[#allocation15_spill] sm:$0xff] }
0x107d   : > { %14617 = vst [vmem:[%s23509_s23 + $0x18] sm:$0xff] %v22273_v55  ;;  %v7459_v20 = vadd.f32 %v22273_v55, %v14618_v51  ;;  %v25617_v51 = vld [vmem:[#allocation13_spill] sm:$0xff]  ;;  %v25618_v55 = vld [vmem:[#allocation14_spill] sm:$0xff] }
0x107f   : > { %v24304_v52 = vand.u32 4294901760, %v7459_v20 }
0x1081   : > { %v7542_v7 = vsub.f32 %v7459_v20, %v24304_v52  ;;  %v25620_v20 = vld [vmem:[#allocation16_spill] sm:$0xff] }
0x1083   : > { %v7543_v0 = vand.u32 4294901760, %v7542_v7 }
0x1085   : > { %v7544_v56 = vsub.f32 %v7542_v7, %v7543_v0 }
0x1087   : > { %v7545_v53 = vand.u32 4294901760, %v7544_v56  ;;  %v25623_v56 = vld [vmem:[#allocation19_spill] sm:$0xff] }
0x1089   : > { %18191 = vmatmul.mubr.f32.vlgmr.msra.gmra.mrb[14].mxu1 %v7545_v53  ;;  %v25624_v53 = vld [vmem:[#allocation20_spill] sm:$0xff] }
0x108a   : > { %21136 = vmatpush3.bf16.msra.mxu1 %v22922_v49  ;;  %18225 = vmatprep.mubr.msk.f32.mxu1 %vm22650_vm0, %v25510_v4 }
0x108b   : > { %21137 = vmatprep.subr.bf16.mxu1 %v25512_v42 }
0x108e   : > { %21139 = vmatpush3.bf16.msra.mxu1 %v22929_v1 }
0x108f   : > { %21140 = vmatprep.subr.bf16.mxu1 %v25512_v42 }
0x1092   : > { %21142 = vmatpush3.bf16.msra.mxu1 %v22935_v19 }
0x1093   : > { %21143 = vmatprep.subr.bf16.mxu1 %v25512_v42 }
0x1096   : > { %21145 = vmatpush3.bf16.msra.mxu1 %v22940_v24 }
0x1097   : > { %21146 = vmatprep.subr.bf16.mxu1 %v25512_v42 }
0x109a   : > { %21148 = vmatpush3.bf16.msra.mxu1 %v22948_v25 }
0x109b   : > { %21149 = vmatprep.subr.bf16.mxu1 %v25512_v42 }
0x109e   : > { %21151 = vmatpush3.bf16.msra.mxu1 %v22953_v28 }
0x109f   : > { %21152 = vmatprep.subr.bf16.mxu1 %v25512_v42 }
0x10a2   : > { %21154 = vmatpush3.bf16.msra.mxu1 %v22959_v2 }
0x10a3   : > { %21155 = vmatprep.subr.bf16.mxu1 %v25512_v42 }
0x10a6   : > { %21157 = vmatpush3.bf16.msra.mxu1 %v22963_v14 }
0x10a7   : > { %21158 = vmatprep.subr.bf16.mxu1 %v25512_v42 }
0x10a9   : > { %18226 = vmatmul.mubr.f32.vlgmr.msra.gmra.mrb[14].mxu1 %v24304_v52 }
0x10aa   : > { %21160 = vmatpush3.bf16.msra.mxu1 %v22969_v33  ;;  %18260 = vmatprep.mubr.msk.f32.mxu1 %vm22650_vm0, %v25510_v4 }
0x10ab   : > { %21161 = vmatprep.subr.bf16.mxu1 %v25512_v42 }
0x10ae   : > { %21163 = vmatpush3.bf16.msra.mxu1 %v22976_v34 }
0x10af   : > { %21164 = vmatprep.subr.bf16.mxu1 %v25512_v42 }
0x10b2   : > { %21166 = vmatpush3.bf16.msra.mxu1 %v25611_v18 }
0x10b3   : > { %21167 = vmatprep.subr.bf16.mxu1 %v25512_v42 }
0x10b6   : > { %21169 = vmatpush3.bf16.msra.mxu1 %v25612_v3 }
0x10b7   : > { %21170 = vmatprep.subr.bf16.mxu1 %v25512_v42 }
0x10ba   : > { %21172 = vmatpush3.bf16.msra.mxu1 %v25613_v12 }
0x10bb   : > { %21173 = vmatprep.subr.bf16.mxu1 %v25512_v42 }
0x10be   : > { %21175 = vmatpush3.bf16.msra.mxu1 %v25614_v31 }
0x10bf   : > { %21176 = vmatprep.subr.bf16.mxu1 %v25512_v42 }
0x10c2   : > { %21178 = vmatpush3.bf16.msra.mxu1 %v25615_v54 }
0x10c3   : > { %21179 = vmatprep.subr.bf16.mxu1 %v25512_v42 }
0x10c6   : > { %21181 = vmatpush3.bf16.msra.mxu1 %v25616_v15 }
0x10c7   : > { %21182 = vmatprep.subr.bf16.mxu1 %v25512_v42 }
0x10c9   : > { %18261 = vmatmul.mubr.f32.vlgmr.msra.gmra.mrb[14].mxu1 %v7542_v7  ;;  %v25621_v7 = vld [vmem:[#allocation17_spill] sm:$0xff] }
0x10ca   : > { %21184 = vmatpush3.bf16.msra.mxu1 %v25545_v59  ;;  %18295 = vmatprep.mubr.msk.f32.mxu1 %vm22650_vm0, %v25510_v4 }
0x10cb   : > { %21185 = vmatprep.subr.bf16.mxu1 %v25512_v42 }
0x10ce   : > { %21187 = vmatpush3.bf16.msra.mxu1 %v25546_v39 }
0x10cf   : > { %21188 = vmatprep.subr.bf16.mxu1 %v25512_v42 }
0x10d2   : > { %21190 = vmatpush3.bf16.msra.mxu1 %v25569_v27 }
0x10d3   : > { %21191 = vmatprep.subr.bf16.mxu1 %v25512_v42 }
0x10d6   : > { %21193 = vmatpush3.bf16.msra.mxu1 %v25590_v30 }
0x10d7   : > { %21194 = vmatprep.subr.bf16.mxu1 %v25512_v42 }
0x10da   : > { %21196 = vmatpush3.bf16.msra.mxu1 %v25591_v57 }
0x10db   : > { %21197 = vmatprep.subr.bf16.mxu1 %v25512_v42 }
0x10de   : > { %21199 = vmatpush3.bf16.msra.mxu1 %v25592_v17 }
0x10df   : > { %21200 = vmatprep.subr.bf16.mxu1 %v25512_v42 }
0x10e2   : > { %21202 = vmatpush3.bf16.msra.mxu1 %v25593_v32 }
0x10e3   : > { %21203 = vmatprep.subr.bf16.mxu1 %v25512_v42 }
0x10e6   : > { %21205 = vmatpush3.bf16.msra.mxu1 %v25594_v11 }
0x10e7   : > { %21206 = vmatprep.subr.bf16.mxu1 %v25512_v42 }
0x10e9   : > { %18296 = vmatmul.mubr.f32.vlgmr.msra.gmra.mrb[14].mxu1 %v7543_v0  ;;  %v25622_v0 = vld [vmem:[#allocation18_spill] sm:$0xff] }
0x10ea   : > { %21208 = vmatpush3.bf16.msra.mxu1 %v25617_v51  ;;  %18330 = vmatprep.mubr.msk.f32.mxu1 %vm22650_vm0, %v25510_v4 }
0x10eb   : > { %21209 = vmatprep.subr.bf16.mxu1 %v25512_v42 }
0x10ee   : > { %21211 = vmatpush3.bf16.msra.mxu1 %v25618_v55 }
0x10ef   : > { %21212 = vmatprep.subr.bf16.mxu1 %v25512_v42 }
0x10f2   : > { %21214 = vmatpush3.bf16.msra.mxu1 %v25619_v63 }
0x10f3   : > { %21215 = vmatprep.subr.bf16.mxu1 %v25512_v42 }
0x10f6   : > { %21217 = vmatpush3.bf16.msra.mxu1 %v25620_v20 }
0x10f7   : > { %21218 = vmatprep.subr.bf16.mxu1 %v25512_v42 }
0x10fa   : > { %21220 = vmatpush3.bf16.msra.mxu1 %v25621_v7 }
0x10fb   : > { %21221 = vmatprep.subr.bf16.mxu1 %v25512_v42 }
0x10fe   : > { %21223 = vmatpush3.bf16.msra.mxu1 %v25622_v0 }
0x10ff   : > { %21224 = vmatprep.subr.bf16.mxu1 %v25512_v42 }
0x1102   : > { %21226 = vmatpush3.bf16.msra.mxu1 %v25623_v56 }
0x1103   : > { %21227 = vmatprep.subr.bf16.mxu1 %v25512_v42 }
0x1106   : > { %21229 = vmatpush3.bf16.msra.mxu1 %v25624_v53 }
0x1107   : > { %21230 = vmatprep.subr.bf16.mxu1 %v25512_v42 }
0x1109   : > { %18331 = vmatmul.mubr.f32.vlgmr.msra.gmra.mrb[14].mxu1 %v24304_v52 }
0x110a   : > { %21232 = vmatpush3.bf16.msra.mxu1 %v25545_v59  ;;  %18365 = vmatprep.mubr.msk.f32.mxu1 %vm22650_vm0, %v25510_v4 }
0x110b   : > { %21233 = vmatprep.subr.bf16.mxu1 %v25512_v42 }
0x110e   : > { %21235 = vmatpush3.bf16.msra.mxu1 %v25546_v39 }
0x110f   : > { %21236 = vmatprep.subr.bf16.mxu1 %v25512_v42 }
0x1112   : > { %21238 = vmatpush3.bf16.msra.mxu1 %v25569_v27 }
0x1113   : > { %21239 = vmatprep.subr.bf16.mxu1 %v25512_v42 }
0x1116   : > { %21241 = vmatpush3.bf16.msra.mxu1 %v25590_v30 }
0x1117   : > { %21242 = vmatprep.subr.bf16.mxu1 %v25512_v42 }
0x111a   : > { %21244 = vmatpush3.bf16.msra.mxu1 %v25591_v57 }
0x111b   : > { %21245 = vmatprep.subr.bf16.mxu1 %v25512_v42 }
0x111e   : > { %21247 = vmatpush3.bf16.msra.mxu1 %v25592_v17 }
0x111f   : > { %21248 = vmatprep.subr.bf16.mxu1 %v25512_v42 }
0x1122   : > { %21250 = vmatpush3.bf16.msra.mxu1 %v25593_v32 }
0x1123   : > { %21251 = vmatprep.subr.bf16.mxu1 %v25512_v42 }
0x1126   : > { %21253 = vmatpush3.bf16.msra.mxu1 %v25594_v11 }
0x1127   : > { %21254 = vmatprep.subr.bf16.mxu1 %v25512_v42 }
0x1129   : > { %18366 = vmatmul.mubr.f32.vlgmr.msra.gmra.mrb[14].mxu1 %v24304_v52 }
0x112a   : > { %21256 = vmatpush3.bf16.msra.mxu1 %v23102_v5  ;;  %18394 = vmatprep.mubr.msk.f32.mxu1 %vm22650_vm0, %v25510_v4 }
0x112b   : > { %21257 = vmatprep.subr.bf16.mxu1 %v25512_v42 }
0x112e   : > { %21259 = vmatpush3.bf16.msra.mxu1 %v23112_v10 }
0x112f   : > { %21260 = vmatprep.subr.bf16.mxu1 %v25512_v42 }
0x1132   : > { %21262 = vmatpush3.bf16.msra.mxu1 %v23122_v22 }
0x1133   : > { %21263 = vmatprep.subr.bf16.mxu1 %v25512_v42 }
0x1136   : > { %21265 = vmatpush3.bf16.msra.mxu1 %v23132_v47 }
0x1137   : > { %21266 = vmatprep.subr.bf16.mxu1 %v25512_v42 }
0x113a   : > { %21268 = vmatpush3.bf16.msra.mxu1 %v23142_v62 }
0x113b   : > { %21269 = vmatprep.subr.bf16.mxu1 %v25512_v42 }
0x113e   : > { %21271 = vmatpush3.bf16.msra.mxu1 %v23156_v45 }
0x113f   : > { %18392 = vmatprep.subr.mxu1 %v25510_v4 }
0x1142   : > { %18393 = vmatpush3.msra.mxu1 %v23167_v48 }
0x1143   : > { %21362 = vmatprep.subr.bf16.mxu1 %v25512_v42 }
0x11fc   : > { %v8097_v52 = vpop.f32.mrb[14].mxu1 }
0x11fd   : > { %v22274_v13 = vadd.f32 %v24419_v40, %v8097_v52  ;;  %v18367_v6 = vpop.f32.mrb[15].mxu1  ;;  %v25630_v52 = vld [vmem:[#allocation47_spill] sm:$0xff] }
0x11ff   : > { %v8101_v61 = vand.u32 2147483647, %v22274_v13 }
0x1201   : > { %v8102_v9 = vadd.f32 1.0, %v8101_v61 }
0x1203   : > { %22584 = vrcp.f32 %v8102_v9  ;;  %v25626_v9 = vld [vmem:[#allocation43_spill] sm:$0xff] }
0x120d   : > { %v22585_v44 = vpop.eup %22584 }
0x120e   : > { %v8104_v58 = vmul.f32 %v22585_v44, %v22274_v13  ;;  %v25625_v44 = vld [vmem:[#allocation42_spill] sm:$0xff]  ;;  %v25627_v13 = vld [vmem:[#allocation44_spill] sm:$0xff] }
0x1210   : > { %v8106_v53 = vsel %vm1108_vm2, %v8104_v58, 0 }
0x1211   : > { %v24423_v56 = vand.u32 4294901760, %v8106_v53 }
0x1213   : > { %v8187_v0 = vsub.f32 %v8106_v53, %v24423_v56  ;;  %18424 = vmatmul.mubr.f32.vlgmr.msra.gmra.mrb[10].mxu0 %v24423_v56  ;;  %v25629_v53 = vld [vmem:[#allocation46_spill] sm:$0xff] }
0x1214   : > { %21292 = vmatpush3.bf16.msra.mxu0 %v23252_v35  ;;  %18452 = vmatprep.mubr.msk.f32.mxu0 %vm22650_vm0, %v25510_v4 }
0x1215   : > { %21293 = vmatprep.subr.bf16.mxu0 %v25512_v42  ;;  %v8188_v6 = vand.u32 4294901760, %v8187_v0 }
0x1217   : > { %v8189_v61 = vsub.f32 %v8187_v0, %v8188_v6 }
0x1218   : > { %21295 = vmatpush3.bf16.msra.mxu0 %v23256_v37 }
0x1219   : > { %21296 = vmatprep.subr.bf16.mxu0 %v25512_v42  ;;  %v8190_v58 = vand.u32 4294901760, %v8189_v61 }
0x121b   : > { %18395 = vmatmul.mubr.f32.vlgmr.msra.gmra.mrb[16].mxu1 %v8190_v58  ;;  %v24520_v58 = vld [vmem:[%s25367_s5] ss:$0 sm:$0xff] }
0x121c   : > { %21298 = vmatpush3.bf16.msra.mxu0 %v23260_v46  ;;  %21364 = vmatpush3.bf16.msra.mxu1 %v23422_v38 }
0x121d   : > { %21299 = vmatprep.subr.bf16.mxu0 %v25512_v42  ;;  %21365 = vmatprep.subr.bf16.mxu1 %v25512_v42 }
0x121e   : > { %18550 = vmatprep.mubr.msk.f32.mxu1 %vm22650_vm0, %v25510_v4 }
0x1220   : > { %21301 = vmatpush3.bf16.msra.mxu0 %v23264_v50  ;;  %21367 = vmatpush3.bf16.msra.mxu1 %v23432_v8 }
0x1221   : > { %21302 = vmatprep.subr.bf16.mxu0 %v25512_v42  ;;  %21368 = vmatprep.subr.bf16.mxu1 %v25512_v42 }
0x1224   : > { %21304 = vmatpush3.bf16.msra.mxu0 %v23268_v60 }
0x1225   : > { %21305 = vmatprep.subr.bf16.mxu0 %v25512_v42 }
0x1228   : > { %21307 = vmatpush3.bf16.msra.mxu0 %v23272_v41 }
0x1229   : > { %18450 = vmatprep.subr.mxu0 %v25510_v4 }
0x122c   : > { %18451 = vmatpush3.msra.mxu0 %v25603_v43 }
0x122d   : > { %18453 = vmatmul.mubr.f32.vlgmr.msra.gmra.mrb[10].mxu0 %v8187_v0  ;;  %21308 = vmatprep.subr.bf16.mxu0 %v25512_v42  ;;  %v25628_v0 = vld [vmem:[#allocation45_spill] sm:$0xff] }
0x122e   : > { %21310 = vmatpush3.bf16.msra.mxu0 %v23102_v5  ;;  %18481 = vmatprep.mubr.msk.f32.mxu0 %vm22650_vm0, %v25510_v4 }
0x122f   : > { %21311 = vmatprep.subr.bf16.mxu0 %v25512_v42 }
0x1232   : > { %21313 = vmatpush3.bf16.msra.mxu0 %v23112_v10 }
0x1233   : > { %21314 = vmatprep.subr.bf16.mxu0 %v25512_v42 }
0x1236   : > { %21316 = vmatpush3.bf16.msra.mxu0 %v23122_v22 }
0x1237   : > { %21317 = vmatprep.subr.bf16.mxu0 %v25512_v42 }
0x123a   : > { %21319 = vmatpush3.bf16.msra.mxu0 %v23132_v47 }
0x123b   : > { %21320 = vmatprep.subr.bf16.mxu0 %v25512_v42 }
0x123e   : > { %21322 = vmatpush3.bf16.msra.mxu0 %v23142_v62 }
0x123f   : > { %21323 = vmatprep.subr.bf16.mxu0 %v25512_v42 }
0x1242   : > { %21325 = vmatpush3.bf16.msra.mxu0 %v23156_v45 }
0x1243   : > { %18479 = vmatprep.subr.mxu0 %v25510_v4 }
0x1246   : > { %18480 = vmatpush3.msra.mxu0 %v23167_v48 }
0x1247   : > { %18482 = vmatmul.mubr.f32.vlgmr.msra.gmra.mrb[10].mxu0 %v8188_v6  ;;  %21326 = vmatprep.subr.bf16.mxu0 %v25512_v42  ;;  %v25631_v6 = vld [vmem:[#allocation40_spill] sm:$0xff] }
0x1248   : > { %21328 = vmatpush3.bf16.msra.mxu0 %v25625_v44  ;;  %18510 = vmatprep.mubr.msk.f32.mxu0 %vm22650_vm0, %v25510_v4 }
0x1249   : > { %21329 = vmatprep.subr.bf16.mxu0 %v25512_v42 }
0x124c   : > { %21331 = vmatpush3.bf16.msra.mxu0 %v25626_v9 }
0x124d   : > { %21332 = vmatprep.subr.bf16.mxu0 %v25512_v42 }
0x1250   : > { %21334 = vmatpush3.bf16.msra.mxu0 %v25627_v13 }
0x1251   : > { %21335 = vmatprep.subr.bf16.mxu0 %v25512_v42 }
0x1254   : > { %21337 = vmatpush3.bf16.msra.mxu0 %v25628_v0 }
0x1255   : > { %21338 = vmatprep.subr.bf16.mxu0 %v25512_v42 }
0x1258   : > { %21340 = vmatpush3.bf16.msra.mxu0 %v25629_v53 }
0x1259   : > { %21341 = vmatprep.subr.bf16.mxu0 %v25512_v42 }
0x125c   : > { %21343 = vmatpush3.bf16.msra.mxu0 %v25630_v52 }
0x125d   : > { %18508 = vmatprep.subr.mxu0 %v25510_v4 }
0x1260   : > { %18509 = vmatpush3.msra.mxu0 %v25631_v6 }
0x1261   : > { %18511 = vmatmul.mubr.f32.vlgmr.msra.gmra.mrb[10].mxu0 %v24423_v56  ;;  %21344 = vmatprep.subr.bf16.mxu0 %v25512_v42 }
0x1262   : > { %21346 = vmatpush3.bf16.msra.mxu0 %v23102_v5  ;;  %18539 = vmatprep.mubr.msk.f32.mxu0 %vm22650_vm0, %v25510_v4 }
0x1263   : > { %21347 = vmatprep.subr.bf16.mxu0 %v25512_v42 }
0x1266   : > { %21349 = vmatpush3.bf16.msra.mxu0 %v23112_v10 }
0x1267   : > { %21350 = vmatprep.subr.bf16.mxu0 %v25512_v42 }
0x126a   : > { %21352 = vmatpush3.bf16.msra.mxu0 %v23122_v22 }
0x126b   : > { %21353 = vmatprep.subr.bf16.mxu0 %v25512_v42 }
0x126e   : > { %21355 = vmatpush3.bf16.msra.mxu0 %v23132_v47 }
0x126f   : > { %21356 = vmatprep.subr.bf16.mxu0 %v25512_v42 }
0x1272   : > { %21358 = vmatpush3.bf16.msra.mxu0 %v23142_v62 }
0x1273   : > { %21359 = vmatprep.subr.bf16.mxu0 %v25512_v42 }
0x1276   : > { %21361 = vmatpush3.bf16.msra.mxu0 %v23156_v45 }
0x1277   : > { %18537 = vmatprep.subr.mxu0 %v25510_v4 }
0x127a   : > { %18538 = vmatpush3.msra.mxu0 %v23167_v48 }
0x127b   : > { %18540 = vmatmul.mubr.f32.vlgmr.msra.gmra.mrb[10].mxu0 %v24423_v56  ;;  %21398 = vmatprep.subr.bf16.mxu0 %v25512_v42 }
0x127c   : > { %21400 = vmatpush3.bf16.msra.mxu0 %v25545_v59  ;;  %18640 = vmatprep.mubr.msk.f32.mxu0 %vm22650_vm0, %v25510_v4 }
0x127d   : > { %21401 = vmatprep.subr.bf16.mxu0 %v25512_v42 }
0x1280   : > { %21403 = vmatpush3.bf16.msra.mxu0 %v25546_v39 }
0x1281   : > { %21404 = vmatprep.subr.bf16.mxu0 %v25512_v42 }
0x1284   : > { %21406 = vmatpush3.bf16.msra.mxu0 %v25569_v27 }
0x1285   : > { %21407 = vmatprep.subr.bf16.mxu0 %v25512_v42 }
0x1288   : > { %21409 = vmatpush3.bf16.msra.mxu0 %v25590_v30 }
0x1289   : > { %21410 = vmatprep.subr.bf16.mxu0 %v25512_v42 }
0x128c   : > { %21412 = vmatpush3.bf16.msra.mxu0 %v25591_v57 }
0x128d   : > { %21413 = vmatprep.subr.bf16.mxu0 %v25512_v42 }
0x1290   : > { %21415 = vmatpush3.bf16.msra.mxu0 %v25592_v17 }
0x1291   : > { %21416 = vmatprep.subr.bf16.mxu0 %v25512_v42 }
0x1294   : > { %21418 = vmatpush3.bf16.msra.mxu0 %v25593_v32 }
0x1295   : > { %21419 = vmatprep.subr.bf16.mxu0 %v25512_v42 }
0x1298   : > { %21421 = vmatpush3.bf16.msra.mxu0 %v25594_v11 }
0x1299   : > { %21422 = vmatprep.subr.bf16.mxu0 %v25512_v42 }
0x12ee   : > { %v8192_v56 = vpop.f32.mrb[16].mxu1 }
0x12ef   : > { %v18396_v61 = vpop.f32.mrb[17].mxu1  ;;  %v8193_v6 = vadd.f32 %v24520_v58, %v8192_v56  ;;  %v25634_v56 = vld [vmem:[#allocation20_spill] sm:$0xff] }
0x134e   : > { %v8706_v52 = vpop.f32.mrb[10].mxu0 }
0x134f   : > { %v22276_v53 = vadd.f32 %v8706_v52, %v8193_v6  ;;  %v18541_v0 = vpop.f32.mrb[11].mxu0  ;;  %v25632_v52 = vld [vmem:[#allocation18_spill] sm:$0xff]  ;;  %v25633_v6 = vld [vmem:[#allocation19_spill] sm:$0xff] }
0x1351   : > { %v8710_v13 = vand.u32 2147483647, %v22276_v53 }
0x1353   : > { %v8711_v9 = vadd.f32 1.0, %v8710_v13 }
0x1355   : > { %22586 = vrcp.f32 %v8711_v9 }
0x135f   : > { %v22587_v44 = vpop.eup %22586 }
0x1360   : > { %v8713_v43 = vmul.f32 %v22587_v44, %v22276_v53 }
0x1362   : > { %v8715_v41 = vsel %vm1722_vm4, %v8713_v43, 0 }
0x1363   : > { %v8786_v60 = vand.u32 4294901760, %v8715_v41 }
0x1365   : > { %v8787_v50 = vsub.f32 %v8715_v41, %v8786_v60 }
0x1367   : > { %v8788_v61 = vand.u32 4294901760, %v8787_v50 }
0x1369   : > { %v8789_v46 = vsub.f32 %v8787_v50, %v8788_v61 }
0x136b   : > { %v8790_v37 = vand.u32 4294901760, %v8789_v46  ;;  %v14620_v46 = vld [vmem:[%s22792_s12 + $0x28] sm:$0xff] }
0x136d   : > { %18551 = vmatmul.mubr.f32.vlgmr.msra.gmra.mrb[18].mxu1 %v8790_v37 }
0x136e   : > { %21370 = vmatpush3.bf16.msra.mxu1 %v23436_v21  ;;  %18561 = vmatprep.mubr.msk.f32.mxu1 %vm22650_vm0, %v25510_v4 }
0x136f   : > { %21371 = vmatprep.subr.bf16.mxu1 %v25512_v42 }
0x1372   : > { %21373 = vmatpush3.bf16.msra.mxu1 %v23438_v29 }
0x1373   : > { %21374 = vmatprep.subr.bf16.mxu1 %v25512_v42 }
0x1375   : > { %18562 = vmatmul.mubr.f32.vlgmr.msra.gmra.mrb[18].mxu1 %v8786_v60 }
0x1376   : > { %21376 = vmatpush3.bf16.msra.mxu1 %v23440_v36  ;;  %18572 = vmatprep.mubr.msk.f32.mxu1 %vm22650_vm0, %v25510_v4 }
0x1377   : > { %21377 = vmatprep.subr.bf16.mxu1 %v25512_v42 }
0x137a   : > { %21379 = vmatpush3.bf16.msra.mxu1 %v23442_v23 }
0x137b   : > { %21380 = vmatprep.subr.bf16.mxu1 %v25512_v42 }
0x137d   : > { %18573 = vmatmul.mubr.f32.vlgmr.msra.gmra.mrb[18].mxu1 %v8787_v50  ;;  %v24574_v50 = vld [vmem:[%s25369_s7] ss:$0 sm:$0xff] }
0x137e   : > { %21382 = vmatpush3.bf16.msra.mxu1 %v23422_v38  ;;  %18583 = vmatprep.mubr.msk.f32.mxu1 %vm22650_vm0, %v25510_v4 }
0x137f   : > { %21383 = vmatprep.subr.bf16.mxu1 %v25512_v42 }
0x1382   : > { %21385 = vmatpush3.bf16.msra.mxu1 %v23432_v8 }
0x1383   : > { %21386 = vmatprep.subr.bf16.mxu1 %v25512_v42 }
0x1385   : > { %18584 = vmatmul.mubr.f32.vlgmr.msra.gmra.mrb[18].mxu1 %v8788_v61 }
0x1386   : > { %21388 = vmatpush3.bf16.msra.mxu1 %v23444_v16  ;;  %18594 = vmatprep.mubr.msk.f32.mxu1 %vm22650_vm0, %v25510_v4 }
0x1387   : > { %21389 = vmatprep.subr.bf16.mxu1 %v25512_v42 }
0x138a   : > { %21391 = vmatpush3.bf16.msra.mxu1 %v23446_v26 }
0x138b   : > { %21392 = vmatprep.subr.bf16.mxu1 %v25512_v42 }
0x138d   : > { %18595 = vmatmul.mubr.f32.vlgmr.msra.gmra.mrb[18].mxu1 %v8786_v60 }
0x138e   : > { %21394 = vmatpush3.bf16.msra.mxu1 %v23422_v38  ;;  %18605 = vmatprep.mubr.msk.f32.mxu1 %vm22650_vm0, %v25510_v4 }
0x138f   : > { %21395 = vmatprep.subr.bf16.mxu1 %v25512_v42 }
0x1392   : > { %21397 = vmatpush3.bf16.msra.mxu1 %v23432_v8 }
0x1393   : > { %21542 = vmatprep.subr.bf16.mxu1 %v25512_v42 }
0x1395   : > { %18606 = vmatmul.mubr.f32.vlgmr.msra.gmra.mrb[18].mxu1 %v8786_v60 }
0x1396   : > { %21544 = vmatpush3.bf16.msra.mxu1 %v23102_v5  ;;  %18844 = vmatprep.mubr.msk.f32.mxu1 %vm22650_vm0, %v25510_v4 }
0x1397   : > { %21545 = vmatprep.subr.bf16.mxu1 %v25512_v42 }
0x139a   : > { %21547 = vmatpush3.bf16.msra.mxu1 %v23112_v10 }
0x139b   : > { %21548 = vmatprep.subr.bf16.mxu1 %v25512_v42 }
0x139e   : > { %21550 = vmatpush3.bf16.msra.mxu1 %v23122_v22 }
0x139f   : > { %21551 = vmatprep.subr.bf16.mxu1 %v25512_v42 }
0x13a2   : > { %21553 = vmatpush3.bf16.msra.mxu1 %v23132_v47 }
0x13a3   : > { %21554 = vmatprep.subr.bf16.mxu1 %v25512_v42 }
0x13a6   : > { %21556 = vmatpush3.bf16.msra.mxu1 %v23142_v62 }
0x13a7   : > { %21557 = vmatprep.subr.bf16.mxu1 %v25512_v42 }
0x13aa   : > { %21559 = vmatpush3.bf16.msra.mxu1 %v23156_v45 }
0x13ab   : > { %18842 = vmatprep.subr.mxu1 %v25510_v4 }
0x13ae   : > { %18843 = vmatpush3.msra.mxu1 %v23167_v48 }
0x13af   : > { %21560 = vmatprep.subr.bf16.mxu1 %v25512_v42 }
0x1468   : > { %v9198_v37 = vpop.f32.mrb[18].mxu1 }
0x1469   : > { %v22277_v60 = vadd.f32 %v24574_v50, %v9198_v37  ;;  %v18607_v41 = vpop.f32.mrb[19].mxu1 }
0x146b   : > { %14619 = vst [vmem:[%s23509_s23 + $0x20] sm:$0xff] %v22277_v60  ;;  %v9206_v43 = vadd.f32 %v22277_v60, %v14620_v46 }
0x146d   : > { %v24578_v44 = vand.u32 4294901760, %v9206_v43 }
0x146f   : > { %v9289_v9 = vsub.f32 %v9206_v43, %v24578_v44 }
0x1471   : > { %v9290_v13 = vand.u32 4294901760, %v9289_v9 }
0x1473   : > { %v9291_v0 = vsub.f32 %v9289_v9, %v9290_v13 }
0x1475   : > { %v9292_v53 = vand.u32 4294901760, %v9291_v0 }
0x1477   : > { %18641 = vmatmul.mubr.f32.vlgmr.msra.gmra.mrb[12].mxu0 %v9292_v53 }
0x1478   : > { %21424 = vmatpush3.bf16.msra.mxu0 %v22922_v49  ;;  %18675 = vmatprep.mubr.msk.f32.mxu0 %vm22650_vm0, %v25510_v4 }
0x1479   : > { %21425 = vmatprep.subr.bf16.mxu0 %v25512_v42 }
0x147c   : > { %21427 = vmatpush3.bf16.msra.mxu0 %v22929_v1 }
0x147d   : > { %21428 = vmatprep.subr.bf16.mxu0 %v25512_v42 }
0x1480   : > { %21430 = vmatpush3.bf16.msra.mxu0 %v22935_v19 }
0x1481   : > { %21431 = vmatprep.subr.bf16.mxu0 %v25512_v42 }
0x1484   : > { %21433 = vmatpush3.bf16.msra.mxu0 %v22940_v24 }
0x1485   : > { %21434 = vmatprep.subr.bf16.mxu0 %v25512_v42 }
0x1488   : > { %21436 = vmatpush3.bf16.msra.mxu0 %v22948_v25 }
0x1489   : > { %21437 = vmatprep.subr.bf16.mxu0 %v25512_v42 }
0x148c   : > { %21439 = vmatpush3.bf16.msra.mxu0 %v22953_v28 }
0x148d   : > { %21440 = vmatprep.subr.bf16.mxu0 %v25512_v42 }
0x1490   : > { %21442 = vmatpush3.bf16.msra.mxu0 %v22959_v2 }
0x1491   : > { %21443 = vmatprep.subr.bf16.mxu0 %v25512_v42 }
0x1494   : > { %21445 = vmatpush3.bf16.msra.mxu0 %v22963_v14 }
0x1495   : > { %21446 = vmatprep.subr.bf16.mxu0 %v25512_v42 }
0x1497   : > { %18676 = vmatmul.mubr.f32.vlgmr.msra.gmra.mrb[12].mxu0 %v24578_v44 }
0x1498   : > { %21448 = vmatpush3.bf16.msra.mxu0 %v22969_v33  ;;  %18710 = vmatprep.mubr.msk.f32.mxu0 %vm22650_vm0, %v25510_v4 }
0x1499   : > { %21449 = vmatprep.subr.bf16.mxu0 %v25512_v42 }
0x149c   : > { %21451 = vmatpush3.bf16.msra.mxu0 %v22976_v34 }
0x149d   : > { %21452 = vmatprep.subr.bf16.mxu0 %v25512_v42 }
0x14a0   : > { %21454 = vmatpush3.bf16.msra.mxu0 %v25611_v18 }
0x14a1   : > { %21455 = vmatprep.subr.bf16.mxu0 %v25512_v42 }
0x14a4   : > { %21457 = vmatpush3.bf16.msra.mxu0 %v25612_v3 }
0x14a5   : > { %21458 = vmatprep.subr.bf16.mxu0 %v25512_v42 }
0x14a8   : > { %21460 = vmatpush3.bf16.msra.mxu0 %v25613_v12 }
0x14a9   : > { %21461 = vmatprep.subr.bf16.mxu0 %v25512_v42 }
0x14ac   : > { %21463 = vmatpush3.bf16.msra.mxu0 %v25614_v31 }
0x14ad   : > { %21464 = vmatprep.subr.bf16.mxu0 %v25512_v42 }
0x14b0   : > { %21466 = vmatpush3.bf16.msra.mxu0 %v25615_v54 }
0x14b1   : > { %21467 = vmatprep.subr.bf16.mxu0 %v25512_v42 }
0x14b4   : > { %21469 = vmatpush3.bf16.msra.mxu0 %v25616_v15 }
0x14b5   : > { %21470 = vmatprep.subr.bf16.mxu0 %v25512_v42 }
0x14b7   : > { %18711 = vmatmul.mubr.f32.vlgmr.msra.gmra.mrb[12].mxu0 %v9289_v9 }
0x14b8   : > { %21472 = vmatpush3.bf16.msra.mxu0 %v25545_v59  ;;  %18745 = vmatprep.mubr.msk.f32.mxu0 %vm22650_vm0, %v25510_v4 }
0x14b9   : > { %21473 = vmatprep.subr.bf16.mxu0 %v25512_v42 }
0x14bc   : > { %21475 = vmatpush3.bf16.msra.mxu0 %v25546_v39 }
0x14bd   : > { %21476 = vmatprep.subr.bf16.mxu0 %v25512_v42 }
0x14c0   : > { %21478 = vmatpush3.bf16.msra.mxu0 %v25569_v27 }
0x14c1   : > { %21479 = vmatprep.subr.bf16.mxu0 %v25512_v42 }
0x14c4   : > { %21481 = vmatpush3.bf16.msra.mxu0 %v25590_v30 }
0x14c5   : > { %21482 = vmatprep.subr.bf16.mxu0 %v25512_v42 }
0x14c8   : > { %21484 = vmatpush3.bf16.msra.mxu0 %v25591_v57 }
0x14c9   : > { %21485 = vmatprep.subr.bf16.mxu0 %v25512_v42 }
0x14cc   : > { %21487 = vmatpush3.bf16.msra.mxu0 %v25592_v17 }
0x14cd   : > { %21488 = vmatprep.subr.bf16.mxu0 %v25512_v42 }
0x14d0   : > { %21490 = vmatpush3.bf16.msra.mxu0 %v25593_v32 }
0x14d1   : > { %21491 = vmatprep.subr.bf16.mxu0 %v25512_v42 }
0x14d4   : > { %21493 = vmatpush3.bf16.msra.mxu0 %v25594_v11 }
0x14d5   : > { %21494 = vmatprep.subr.bf16.mxu0 %v25512_v42 }
0x14d7   : > { %18746 = vmatmul.mubr.f32.vlgmr.msra.gmra.mrb[12].mxu0 %v9290_v13 }
0x14d8   : > { %21496 = vmatpush3.bf16.msra.mxu0 %v25617_v51  ;;  %18780 = vmatprep.mubr.msk.f32.mxu0 %vm22650_vm0, %v25510_v4 }
0x14d9   : > { %21497 = vmatprep.subr.bf16.mxu0 %v25512_v42 }
0x14dc   : > { %21499 = vmatpush3.bf16.msra.mxu0 %v25618_v55 }
0x14dd   : > { %21500 = vmatprep.subr.bf16.mxu0 %v25512_v42 }
0x14e0   : > { %21502 = vmatpush3.bf16.msra.mxu0 %v25619_v63 }
0x14e1   : > { %21503 = vmatprep.subr.bf16.mxu0 %v25512_v42 }
0x14e4   : > { %21505 = vmatpush3.bf16.msra.mxu0 %v25620_v20 }
0x14e5   : > { %21506 = vmatprep.subr.bf16.mxu0 %v25512_v42 }
0x14e8   : > { %21508 = vmatpush3.bf16.msra.mxu0 %v25621_v7 }
0x14e9   : > { %21509 = vmatprep.subr.bf16.mxu0 %v25512_v42 }
0x14ec   : > { %21511 = vmatpush3.bf16.msra.mxu0 %v25632_v52  ;;  %v25635_v52 = vld [vmem:[#allocation27_spill] sm:$0xff] }
0x14ed   : > { %21512 = vmatprep.subr.bf16.mxu0 %v25512_v42 }
0x14f0   : > { %21514 = vmatpush3.bf16.msra.mxu0 %v25633_v6 }
0x14f1   : > { %21515 = vmatprep.subr.bf16.mxu0 %v25512_v42 }
0x14f4   : > { %21517 = vmatpush3.bf16.msra.mxu0 %v25634_v56 }
0x14f5   : > { %21518 = vmatprep.subr.bf16.mxu0 %v25512_v42 }
0x14f7   : > { %18781 = vmatmul.mubr.f32.vlgmr.msra.gmra.mrb[12].mxu0 %v24578_v44 }
0x14f8   : > { %21520 = vmatpush3.bf16.msra.mxu0 %v25545_v59  ;;  %18815 = vmatprep.mubr.msk.f32.mxu0 %vm22650_vm0, %v25510_v4 }
0x14f9   : > { %21521 = vmatprep.subr.bf16.mxu0 %v25512_v42 }
0x14fc   : > { %21523 = vmatpush3.bf16.msra.mxu0 %v25546_v39 }
0x14fd   : > { %21524 = vmatprep.subr.bf16.mxu0 %v25512_v42 }
0x1500   : > { %21526 = vmatpush3.bf16.msra.mxu0 %v25569_v27 }
0x1501   : > { %21527 = vmatprep.subr.bf16.mxu0 %v25512_v42 }
0x1504   : > { %21529 = vmatpush3.bf16.msra.mxu0 %v25590_v30 }
0x1505   : > { %21530 = vmatprep.subr.bf16.mxu0 %v25512_v42 }
0x1508   : > { %21532 = vmatpush3.bf16.msra.mxu0 %v25591_v57 }
0x1509   : > { %21533 = vmatprep.subr.bf16.mxu0 %v25512_v42 }
0x150c   : > { %21535 = vmatpush3.bf16.msra.mxu0 %v25592_v17 }
0x150d   : > { %21536 = vmatprep.subr.bf16.mxu0 %v25512_v42 }
0x1510   : > { %21538 = vmatpush3.bf16.msra.mxu0 %v25593_v32 }
0x1511   : > { %21539 = vmatprep.subr.bf16.mxu0 %v25512_v42 }
0x1514   : > { %21541 = vmatpush3.bf16.msra.mxu0 %v25594_v11 }
0x1515   : > { %21650 = vmatprep.subr.bf16.mxu0 %v25512_v42 }
0x1517   : > { %18816 = vmatmul.mubr.f32.vlgmr.msra.gmra.mrb[12].mxu0 %v24578_v44 }
0x1518   : > { %21652 = vmatpush3.bf16.msra.mxu0 %v23422_v38  ;;  %19000 = vmatprep.mubr.msk.f32.mxu0 %vm22650_vm0, %v25510_v4 }
0x1519   : > { %21653 = vmatprep.subr.bf16.mxu0 %v25512_v42 }
0x151c   : > { %21655 = vmatpush3.bf16.msra.mxu0 %v23432_v8 }
0x151d   : > { %21656 = vmatprep.subr.bf16.mxu0 %v25512_v42 }
0x15ea   : > { %v9844_v61 = vpop.f32.mrb[12].mxu0 }
0x15eb   : > { %v22278_v37 = vadd.f32 %v24419_v40, %v9844_v61  ;;  %v18817_v46 = vpop.f32.mrb[13].mxu0  ;;  %v25636_v40 = vld [vmem:[#allocation28_spill] sm:$0xff]  ;;  %v25637_v61 = vld [vmem:[#allocation29_spill] sm:$0xff] }
0x15ec   : > { %v25641_v46 = vld [vmem:[#allocation41_spill] sm:$0xff] }
0x15ed   : > { %v9848_v60 = vand.u32 2147483647, %v22278_v37 }
0x15ef   : > { %v9849_v41 = vadd.f32 1.0, %v9848_v60  ;;  %v25642_v60 = vld [vmem:[#allocation34_spill] sm:$0xff] }
0x15f1   : > { %22588 = vrcp.f32 %v9849_v41  ;;  %v25643_v41 = vld [vmem:[#allocation35_spill] sm:$0xff] }
0x15fb   : > { %v22589_v43 = vpop.eup %22588 }
0x15fc   : > { %v9851_v44 = vmul.f32 %v22589_v43, %v22278_v37  ;;  %v25638_v37 = vld [vmem:[#allocation30_spill] sm:$0xff]  ;;  %v25644_v43 = vld [vmem:[#allocation36_spill] sm:$0xff] }
0x15fe   : > { %v9853_v9 = vsel %vm1108_vm2, %v9851_v44, 0  ;;  %v25645_v44 = vld [vmem:[#allocation37_spill] sm:$0xff] }
0x15ff   : > { %v24682_v13 = vand.u32 4294901760, %v9853_v9 }
0x1601   : > { %v9934_v0 = vsub.f32 %v9853_v9, %v24682_v13  ;;  %v25646_v9 = vld [vmem:[#allocation38_spill] sm:$0xff] }
0x1603   : > { %v9935_v53 = vand.u32 4294901760, %v9934_v0 }
0x1605   : > { %v9936_v56 = vsub.f32 %v9934_v0, %v9935_v53 }
0x1607   : > { %v9937_v6 = vand.u32 4294901760, %v9936_v56  ;;  %v25640_v56 = vld [vmem:[#allocation32_spill] sm:$0xff] }
0x1609   : > { %18845 = vmatmul.mubr.f32.vlgmr.msra.gmra.mrb[20].mxu1 %v9937_v6  ;;  %v25639_v6 = vld [vmem:[#allocation31_spill] sm:$0xff] }
0x160a   : > { %21562 = vmatpush3.bf16.msra.mxu1 %v25635_v52  ;;  %18873 = vmatprep.mubr.msk.f32.mxu1 %vm22650_vm0, %v25510_v4 }
0x160b   : > { %21563 = vmatprep.subr.bf16.mxu1 %v25512_v42 }
0x160e   : > { %21565 = vmatpush3.bf16.msra.mxu1 %v25636_v40 }
0x160f   : > { %21566 = vmatprep.subr.bf16.mxu1 %v25512_v42 }
0x1612   : > { %21568 = vmatpush3.bf16.msra.mxu1 %v25637_v61 }
0x1613   : > { %21569 = vmatprep.subr.bf16.mxu1 %v25512_v42 }
0x1616   : > { %21571 = vmatpush3.bf16.msra.mxu1 %v25638_v37 }
0x1617   : > { %21572 = vmatprep.subr.bf16.mxu1 %v25512_v42 }
0x161a   : > { %21574 = vmatpush3.bf16.msra.mxu1 %v25639_v6 }
0x161b   : > { %21575 = vmatprep.subr.bf16.mxu1 %v25512_v42 }
0x161e   : > { %21577 = vmatpush3.bf16.msra.mxu1 %v25640_v56 }
0x161f   : > { %18871 = vmatprep.subr.mxu1 %v25510_v4 }
0x1622   : > { %18872 = vmatpush3.msra.mxu1 %v25641_v46 }
0x1623   : > { %18874 = vmatmul.mubr.f32.vlgmr.msra.gmra.mrb[20].mxu1 %v24682_v13  ;;  %21578 = vmatprep.subr.bf16.mxu1 %v25512_v42 }
0x1624   : > { %21580 = vmatpush3.bf16.msra.mxu1 %v23252_v35  ;;  %18902 = vmatprep.mubr.msk.f32.mxu1 %vm22650_vm0, %v25510_v4  ;;  %v25647_v35 = vld [vmem:[#allocation39_spill] sm:$0xff] }
0x1625   : > { %21581 = vmatprep.subr.bf16.mxu1 %v25512_v42 }
0x1628   : > { %21583 = vmatpush3.bf16.msra.mxu1 %v25642_v60 }
0x1629   : > { %21584 = vmatprep.subr.bf16.mxu1 %v25512_v42 }
0x162c   : > { %21586 = vmatpush3.bf16.msra.mxu1 %v25643_v41 }
0x162d   : > { %21587 = vmatprep.subr.bf16.mxu1 %v25512_v42 }
0x1630   : > { %21589 = vmatpush3.bf16.msra.mxu1 %v25644_v43  ;;  %v25654_v43 = vld [vmem:[#allocation40_spill] sm:$0xff] }
0x1631   : > { %21590 = vmatprep.subr.bf16.mxu1 %v25512_v42 }
0x1634   : > { %21592 = vmatpush3.bf16.msra.mxu1 %v25645_v44  ;;  %v25651_v44 = vld [vmem:[#allocation45_spill] sm:$0xff] }
0x1635   : > { %21593 = vmatprep.subr.bf16.mxu1 %v25512_v42 }
0x1638   : > { %21595 = vmatpush3.bf16.msra.mxu1 %v25646_v9  ;;  %v25650_v9 = vld [vmem:[#allocation44_spill] sm:$0xff] }
0x1639   : > { %18900 = vmatprep.subr.mxu1 %v25510_v4 }
0x163c   : > { %18901 = vmatpush3.msra.mxu1 %v25647_v35  ;;  %v25649_v35 = vld [vmem:[#allocation43_spill] sm:$0xff] }
0x163d   : > { %18903 = vmatmul.mubr.f32.vlgmr.msra.gmra.mrb[20].mxu1 %v9934_v0  ;;  %21596 = vmatprep.subr.bf16.mxu1 %v25512_v42  ;;  %v25648_v0 = vld [vmem:[#allocation42_spill] sm:$0xff] }
0x163e   : > { %21598 = vmatpush3.bf16.msra.mxu1 %v23102_v5  ;;  %18931 = vmatprep.mubr.msk.f32.mxu1 %vm22650_vm0, %v25510_v4 }
0x163f   : > { %21599 = vmatprep.subr.bf16.mxu1 %v25512_v42 }
0x1642   : > { %21601 = vmatpush3.bf16.msra.mxu1 %v23112_v10 }
0x1643   : > { %21602 = vmatprep.subr.bf16.mxu1 %v25512_v42 }
0x1646   : > { %21604 = vmatpush3.bf16.msra.mxu1 %v23122_v22 }
0x1647   : > { %21605 = vmatprep.subr.bf16.mxu1 %v25512_v42 }
0x164a   : > { %21607 = vmatpush3.bf16.msra.mxu1 %v23132_v47 }
0x164b   : > { %21608 = vmatprep.subr.bf16.mxu1 %v25512_v42 }
0x164e   : > { %21610 = vmatpush3.bf16.msra.mxu1 %v23142_v62 }
0x164f   : > { %21611 = vmatprep.subr.bf16.mxu1 %v25512_v42 }
0x1652   : > { %21613 = vmatpush3.bf16.msra.mxu1 %v23156_v45 }
0x1653   : > { %18929 = vmatprep.subr.mxu1 %v25510_v4 }
0x1656   : > { %18930 = vmatpush3.msra.mxu1 %v23167_v48 }
0x1657   : > { %18932 = vmatmul.mubr.f32.vlgmr.msra.gmra.mrb[20].mxu1 %v9935_v53  ;;  %21614 = vmatprep.subr.bf16.mxu1 %v25512_v42  ;;  %v25652_v53 = vld [vmem:[#allocation46_spill] sm:$0xff] }
0x1658   : > { %21616 = vmatpush3.bf16.msra.mxu1 %v25648_v0  ;;  %18960 = vmatprep.mubr.msk.f32.mxu1 %vm22650_vm0, %v25510_v4  ;;  %v25653_v0 = vld [vmem:[#allocation47_spill] sm:$0xff] }
0x1659   : > { %21617 = vmatprep.subr.bf16.mxu1 %v25512_v42 }
0x165c   : > { %21619 = vmatpush3.bf16.msra.mxu1 %v25649_v35 }
0x165d   : > { %21620 = vmatprep.subr.bf16.mxu1 %v25512_v42 }
0x1660   : > { %21622 = vmatpush3.bf16.msra.mxu1 %v25650_v9 }
0x1661   : > { %21623 = vmatprep.subr.bf16.mxu1 %v25512_v42 }
0x1664   : > { %21625 = vmatpush3.bf16.msra.mxu1 %v25651_v44 }
0x1665   : > { %21626 = vmatprep.subr.bf16.mxu1 %v25512_v42 }
0x1668   : > { %21628 = vmatpush3.bf16.msra.mxu1 %v25652_v53 }
0x1669   : > { %21629 = vmatprep.subr.bf16.mxu1 %v25512_v42 }
0x166c   : > { %21631 = vmatpush3.bf16.msra.mxu1 %v25653_v0 }
0x166d   : > { %18958 = vmatprep.subr.mxu1 %v25510_v4 }
0x1670   : > { %18959 = vmatpush3.msra.mxu1 %v25654_v43 }
0x1671   : > { %18961 = vmatmul.mubr.f32.vlgmr.msra.gmra.mrb[20].mxu1 %v24682_v13  ;;  %21632 = vmatprep.subr.bf16.mxu1 %v25512_v42 }
0x1672   : > { %21634 = vmatpush3.bf16.msra.mxu1 %v23102_v5  ;;  %18989 = vmatprep.mubr.msk.f32.mxu1 %vm22650_vm0, %v25510_v4 }
0x1673   : > { %21635 = vmatprep.subr.bf16.mxu1 %v25512_v42 }
0x1676   : > { %21637 = vmatpush3.bf16.msra.mxu1 %v23112_v10 }
0x1677   : > { %21638 = vmatprep.subr.bf16.mxu1 %v25512_v42 }
0x167a   : > { %21640 = vmatpush3.bf16.msra.mxu1 %v23122_v22 }
0x167b   : > { %21641 = vmatprep.subr.bf16.mxu1 %v25512_v42 }
0x167e   : > { %21643 = vmatpush3.bf16.msra.mxu1 %v23132_v47 }
0x167f   : > { %21644 = vmatprep.subr.bf16.mxu1 %v25512_v42 }
0x1682   : > { %21646 = vmatpush3.bf16.msra.mxu1 %v23142_v62 }
0x1683   : > { %21647 = vmatprep.subr.bf16.mxu1 %v25512_v42 }
0x1686   : > { %21649 = vmatpush3.bf16.msra.mxu1 %v23156_v45 }
0x1687   : > { %18987 = vmatprep.subr.mxu1 %v25510_v4 }
0x168a   : > { %18988 = vmatpush3.msra.mxu1 %v23167_v48 }
0x168b   : > { %18990 = vmatmul.mubr.f32.vlgmr.msra.gmra.mrb[20].mxu1 %v24682_v13  ;;  %21686 = vmatprep.subr.bf16.mxu1 %v25512_v42 }
0x168c   : > { %21688 = vmatpush3.bf16.msra.mxu1 %v25545_v59  ;;  %19090 = vmatprep.mubr.msk.f32.mxu1 %vm22650_vm0, %v25510_v4 }
0x168d   : > { %21689 = vmatprep.subr.bf16.mxu1 %v25512_v42 }
0x1690   : > { %21691 = vmatpush3.bf16.msra.mxu1 %v25546_v39 }
0x1691   : > { %21692 = vmatprep.subr.bf16.mxu1 %v25512_v42 }
0x1694   : > { %21694 = vmatpush3.bf16.msra.mxu1 %v25569_v27 }
0x1695   : > { %21695 = vmatprep.subr.bf16.mxu1 %v25512_v42 }
0x1698   : > { %21697 = vmatpush3.bf16.msra.mxu1 %v25590_v30 }
0x1699   : > { %21698 = vmatprep.subr.bf16.mxu1 %v25512_v42 }
0x169c   : > { %21700 = vmatpush3.bf16.msra.mxu1 %v25591_v57 }
0x169d   : > { %21701 = vmatprep.subr.bf16.mxu1 %v25512_v42 }
0x16a0   : > { %21703 = vmatpush3.bf16.msra.mxu1 %v25592_v17 }
0x16a1   : > { %21704 = vmatprep.subr.bf16.mxu1 %v25512_v42 }
0x16a4   : > { %21706 = vmatpush3.bf16.msra.mxu1 %v25593_v32 }
0x16a5   : > { %21707 = vmatprep.subr.bf16.mxu1 %v25512_v42 }
0x16a8   : > { %21709 = vmatpush3.bf16.msra.mxu1 %v25594_v11 }
0x16a9   : > { %21710 = vmatprep.subr.bf16.mxu1 %v25512_v42 }
0x175e   : > { %v10453_v13 = vpop.f32.mrb[20].mxu1 }
0x175f   : > { %v22279_v43 = vadd.f32 %v24520_v58, %v10453_v13  ;;  %v18991_v0 = vpop.f32.mrb[21].mxu1  ;;  %v14622_v58 = vld [vmem:[%s22792_s12 + $0x30] sm:$0xff]  ;;  %v24942_v13 = vld [vmem:[%s25365_s3] ss:$0 sm:$0xff] }
0x1760   : > { %v25657_v0 = vld [vmem:[#allocation20_spill] sm:$0xff] }
0x1761   : > { %v10457_v53 = vand.u32 2147483647, %v22279_v43 }
0x1763   : > { %v10458_v44 = vadd.f32 1.0, %v10457_v53 }
0x1765   : > { %22590 = vrcp.f32 %v10458_v44 }
0x176f   : > { %v22591_v9 = vpop.eup %22590 }
0x1770   : > { %v10460_v35 = vmul.f32 %v22591_v9, %v22279_v43  ;;  %v25656_v9 = vld [vmem:[#allocation19_spill] sm:$0xff] }
0x1772   : > { %v10462_v41 = vsel %vm1722_vm4, %v10460_v35, 0 }
0x1773   : > { %v10533_v60 = vand.u32 4294901760, %v10462_v41 }
0x1775   : > { %v10534_v46 = vsub.f32 %v10462_v41, %v10533_v60 }
0x1777   : > { %v10535_v56 = vand.u32 4294901760, %v10534_v46 }
0x1779   : > { %v10536_v6 = vsub.f32 %v10534_v46, %v10535_v56 }
0x177b   : > { %v10537_v37 = vand.u32 4294901760, %v10536_v6 }
0x177d   : > { %19001 = vmatmul.mubr.f32.vlgmr.msra.gmra.mrb[14].mxu0 %v10537_v37 }
0x177e   : > { %21658 = vmatpush3.bf16.msra.mxu0 %v23436_v21  ;;  %19011 = vmatprep.mubr.msk.f32.mxu0 %vm22650_vm0, %v25510_v4 }
0x177f   : > { %21659 = vmatprep.subr.bf16.mxu0 %v25512_v42 }
0x1782   : > { %21661 = vmatpush3.bf16.msra.mxu0 %v23438_v29 }
0x1783   : > { %21662 = vmatprep.subr.bf16.mxu0 %v25512_v42 }
0x1785   : > { %19012 = vmatmul.mubr.f32.vlgmr.msra.gmra.mrb[14].mxu0 %v10533_v60 }
0x1786   : > { %21664 = vmatpush3.bf16.msra.mxu0 %v23440_v36  ;;  %19022 = vmatprep.mubr.msk.f32.mxu0 %vm22650_vm0, %v25510_v4 }
0x1787   : > { %21665 = vmatprep.subr.bf16.mxu0 %v25512_v42 }
0x178a   : > { %21667 = vmatpush3.bf16.msra.mxu0 %v23442_v23 }
0x178b   : > { %21668 = vmatprep.subr.bf16.mxu0 %v25512_v42 }
0x178d   : > { %19023 = vmatmul.mubr.f32.vlgmr.msra.gmra.mrb[14].mxu0 %v10534_v46 }
0x178e   : > { %21670 = vmatpush3.bf16.msra.mxu0 %v23422_v38  ;;  %19033 = vmatprep.mubr.msk.f32.mxu0 %vm22650_vm0, %v25510_v4 }
0x178f   : > { %21671 = vmatprep.subr.bf16.mxu0 %v25512_v42 }
0x1792   : > { %21673 = vmatpush3.bf16.msra.mxu0 %v23432_v8 }
0x1793   : > { %21674 = vmatprep.subr.bf16.mxu0 %v25512_v42 }
0x1795   : > { %19034 = vmatmul.mubr.f32.vlgmr.msra.gmra.mrb[14].mxu0 %v10535_v56 }
0x1796   : > { %21676 = vmatpush3.bf16.msra.mxu0 %v23444_v16  ;;  %19044 = vmatprep.mubr.msk.f32.mxu0 %vm22650_vm0, %v25510_v4 }
0x1797   : > { %21677 = vmatprep.subr.bf16.mxu0 %v25512_v42 }
0x179a   : > { %21679 = vmatpush3.bf16.msra.mxu0 %v23446_v26 }
0x179b   : > { %21680 = vmatprep.subr.bf16.mxu0 %v25512_v42 }
0x179d   : > { %19045 = vmatmul.mubr.f32.vlgmr.msra.gmra.mrb[14].mxu0 %v10533_v60 }
0x179e   : > { %21682 = vmatpush3.bf16.msra.mxu0 %v23422_v38  ;;  %19055 = vmatprep.mubr.msk.f32.mxu0 %vm22650_vm0, %v25510_v4 }
0x179f   : > { %21683 = vmatprep.subr.bf16.mxu0 %v25512_v42 }
0x17a2   : > { %21685 = vmatpush3.bf16.msra.mxu0 %v23432_v8 }
0x17a3   : > { %21830 = vmatprep.subr.bf16.mxu0 %v25512_v42 }
0x17a5   : > { %19056 = vmatmul.mubr.f32.vlgmr.msra.gmra.mrb[14].mxu0 %v10533_v60 }
0x17a6   : > { %21832 = vmatpush3.bf16.msra.mxu0 %v23102_v5  ;;  %19294 = vmatprep.mubr.msk.f32.mxu0 %vm22650_vm0, %v25510_v4 }
0x17a7   : > { %21833 = vmatprep.subr.bf16.mxu0 %v25512_v42 }
0x17aa   : > { %21835 = vmatpush3.bf16.msra.mxu0 %v23112_v10 }
0x17ab   : > { %21836 = vmatprep.subr.bf16.mxu0 %v25512_v42 }
0x17ae   : > { %21838 = vmatpush3.bf16.msra.mxu0 %v23122_v22 }
0x17af   : > { %21839 = vmatprep.subr.bf16.mxu0 %v25512_v42 }
0x17b2   : > { %21841 = vmatpush3.bf16.msra.mxu0 %v23132_v47 }
0x17b3   : > { %21842 = vmatprep.subr.bf16.mxu0 %v25512_v42 }
0x17b6   : > { %21844 = vmatpush3.bf16.msra.mxu0 %v23142_v62 }
0x17b7   : > { %21845 = vmatprep.subr.bf16.mxu0 %v25512_v42 }
0x17ba   : > { %21847 = vmatpush3.bf16.msra.mxu0 %v23156_v45 }
0x17bb   : > { %19292 = vmatprep.subr.mxu0 %v25510_v4 }
0x17be   : > { %19293 = vmatpush3.msra.mxu0 %v23167_v48 }
0x17bf   : > { %21848 = vmatprep.subr.bf16.mxu0 %v25512_v42 }
0x1878   : > { %v10945_v35 = vpop.f32.mrb[14].mxu0 }
0x1879   : > { %v22280_v37 = vadd.f32 %v24574_v50, %v10945_v35  ;;  %v19057_v6 = vpop.f32.mrb[15].mxu0  ;;  %v25655_v50 = vld [vmem:[#allocation18_spill] sm:$0xff] }
0x187b   : > { %14621 = vst [vmem:[%s23509_s23 + $0x28] sm:$0xff] %v22280_v37  ;;  %v10953_v56 = vadd.f32 %v22280_v37, %v14622_v58 }
0x187d   : > { %v24837_v46 = vand.u32 4294901760, %v10953_v56 }
0x187f   : > { %v11036_v60 = vsub.f32 %v10953_v56, %v24837_v46 }
0x1881   : > { %v11037_v41 = vand.u32 4294901760, %v11036_v60 }
0x1883   : > { %v11038_v43 = vsub.f32 %v11036_v60, %v11037_v41 }
0x1885   : > { %v11039_v44 = vand.u32 4294901760, %v11038_v43 }
0x1887   : > { %19091 = vmatmul.mubr.f32.vlgmr.msra.gmra.mrb[22].mxu1 %v11039_v44 }
0x1888   : > { %21712 = vmatpush3.bf16.msra.mxu1 %v22922_v49  ;;  %19125 = vmatprep.mubr.msk.f32.mxu1 %vm22650_vm0, %v25510_v4 }
0x1889   : > { %21713 = vmatprep.subr.bf16.mxu1 %v25512_v42 }
0x188c   : > { %21715 = vmatpush3.bf16.msra.mxu1 %v22929_v1 }
0x188d   : > { %21716 = vmatprep.subr.bf16.mxu1 %v25512_v42 }
0x1890   : > { %21718 = vmatpush3.bf16.msra.mxu1 %v22935_v19 }
0x1891   : > { %21719 = vmatprep.subr.bf16.mxu1 %v25512_v42 }
0x1894   : > { %21721 = vmatpush3.bf16.msra.mxu1 %v22940_v24 }
0x1895   : > { %21722 = vmatprep.subr.bf16.mxu1 %v25512_v42 }
0x1898   : > { %21724 = vmatpush3.bf16.msra.mxu1 %v22948_v25 }
0x1899   : > { %21725 = vmatprep.subr.bf16.mxu1 %v25512_v42 }
0x189c   : > { %21727 = vmatpush3.bf16.msra.mxu1 %v22953_v28 }
0x189d   : > { %21728 = vmatprep.subr.bf16.mxu1 %v25512_v42 }
0x18a0   : > { %21730 = vmatpush3.bf16.msra.mxu1 %v22959_v2 }
0x18a1   : > { %21731 = vmatprep.subr.bf16.mxu1 %v25512_v42 }
0x18a4   : > { %21733 = vmatpush3.bf16.msra.mxu1 %v22963_v14 }
0x18a5   : > { %21734 = vmatprep.subr.bf16.mxu1 %v25512_v42 }
0x18a7   : > { %19126 = vmatmul.mubr.f32.vlgmr.msra.gmra.mrb[22].mxu1 %v24837_v46 }
0x18a8   : > { %21736 = vmatpush3.bf16.msra.mxu1 %v22969_v33  ;;  %19160 = vmatprep.mubr.msk.f32.mxu1 %vm22650_vm0, %v25510_v4 }
0x18a9   : > { %21737 = vmatprep.subr.bf16.mxu1 %v25512_v42 }
0x18ac   : > { %21739 = vmatpush3.bf16.msra.mxu1 %v22976_v34 }
0x18ad   : > { %21740 = vmatprep.subr.bf16.mxu1 %v25512_v42 }
0x18b0   : > { %21742 = vmatpush3.bf16.msra.mxu1 %v25611_v18 }
0x18b1   : > { %21743 = vmatprep.subr.bf16.mxu1 %v25512_v42 }
0x18b4   : > { %21745 = vmatpush3.bf16.msra.mxu1 %v25612_v3 }
0x18b5   : > { %21746 = vmatprep.subr.bf16.mxu1 %v25512_v42 }
0x18b8   : > { %21748 = vmatpush3.bf16.msra.mxu1 %v25613_v12 }
0x18b9   : > { %21749 = vmatprep.subr.bf16.mxu1 %v25512_v42 }
0x18bc   : > { %21751 = vmatpush3.bf16.msra.mxu1 %v25614_v31 }
0x18bd   : > { %21752 = vmatprep.subr.bf16.mxu1 %v25512_v42 }
0x18c0   : > { %21754 = vmatpush3.bf16.msra.mxu1 %v25615_v54 }
0x18c1   : > { %21755 = vmatprep.subr.bf16.mxu1 %v25512_v42 }
0x18c4   : > { %21757 = vmatpush3.bf16.msra.mxu1 %v25616_v15 }
0x18c5   : > { %21758 = vmatprep.subr.bf16.mxu1 %v25512_v42 }
0x18c7   : > { %19161 = vmatmul.mubr.f32.vlgmr.msra.gmra.mrb[22].mxu1 %v11036_v60 }
0x18c8   : > { %21760 = vmatpush3.bf16.msra.mxu1 %v25545_v59  ;;  %19195 = vmatprep.mubr.msk.f32.mxu1 %vm22650_vm0, %v25510_v4 }
0x18c9   : > { %21761 = vmatprep.subr.bf16.mxu1 %v25512_v42 }
0x18cc   : > { %21763 = vmatpush3.bf16.msra.mxu1 %v25546_v39 }
0x18cd   : > { %21764 = vmatprep.subr.bf16.mxu1 %v25512_v42 }
0x18d0   : > { %21766 = vmatpush3.bf16.msra.mxu1 %v25569_v27 }
0x18d1   : > { %21767 = vmatprep.subr.bf16.mxu1 %v25512_v42 }
0x18d4   : > { %21769 = vmatpush3.bf16.msra.mxu1 %v25590_v30 }
0x18d5   : > { %21770 = vmatprep.subr.bf16.mxu1 %v25512_v42 }
0x18d8   : > { %21772 = vmatpush3.bf16.msra.mxu1 %v25591_v57 }
0x18d9   : > { %21773 = vmatprep.subr.bf16.mxu1 %v25512_v42 }
0x18dc   : > { %21775 = vmatpush3.bf16.msra.mxu1 %v25592_v17 }
0x18dd   : > { %21776 = vmatprep.subr.bf16.mxu1 %v25512_v42 }
0x18e0   : > { %21778 = vmatpush3.bf16.msra.mxu1 %v25593_v32 }
0x18e1   : > { %21779 = vmatprep.subr.bf16.mxu1 %v25512_v42 }
0x18e4   : > { %21781 = vmatpush3.bf16.msra.mxu1 %v25594_v11 }
0x18e5   : > { %21782 = vmatprep.subr.bf16.mxu1 %v25512_v42 }
0x18e7   : > { %19196 = vmatmul.mubr.f32.vlgmr.msra.gmra.mrb[22].mxu1 %v11037_v41 }
0x18e8   : > { %21784 = vmatpush3.bf16.msra.mxu1 %v25617_v51  ;;  %19230 = vmatprep.mubr.msk.f32.mxu1 %vm22650_vm0, %v25510_v4 }
0x18e9   : > { %21785 = vmatprep.subr.bf16.mxu1 %v25512_v42 }
0x18ec   : > { %21787 = vmatpush3.bf16.msra.mxu1 %v25618_v55 }
0x18ed   : > { %21788 = vmatprep.subr.bf16.mxu1 %v25512_v42 }
0x18f0   : > { %21790 = vmatpush3.bf16.msra.mxu1 %v25619_v63 }
0x18f1   : > { %21791 = vmatprep.subr.bf16.mxu1 %v25512_v42 }
0x18f4   : > { %21793 = vmatpush3.bf16.msra.mxu1 %v25620_v20 }
0x18f5   : > { %21794 = vmatprep.subr.bf16.mxu1 %v25512_v42 }
0x18f8   : > { %21796 = vmatpush3.bf16.msra.mxu1 %v25621_v7 }
0x18f9   : > { %21797 = vmatprep.subr.bf16.mxu1 %v25512_v42 }
0x18fc   : > { %21799 = vmatpush3.bf16.msra.mxu1 %v25655_v50 }
0x18fd   : > { %21800 = vmatprep.subr.bf16.mxu1 %v25512_v42 }
0x1900   : > { %21802 = vmatpush3.bf16.msra.mxu1 %v25656_v9 }
0x1901   : > { %21803 = vmatprep.subr.bf16.mxu1 %v25512_v42 }
0x1904   : > { %21805 = vmatpush3.bf16.msra.mxu1 %v25657_v0 }
0x1905   : > { %21806 = vmatprep.subr.bf16.mxu1 %v25512_v42 }
0x1907   : > { %19231 = vmatmul.mubr.f32.vlgmr.msra.gmra.mrb[22].mxu1 %v24837_v46 }
0x1908   : > { %21808 = vmatpush3.bf16.msra.mxu1 %v25545_v59  ;;  %19265 = vmatprep.mubr.msk.f32.mxu1 %vm22650_vm0, %v25510_v4 }
0x1909   : > { %21809 = vmatprep.subr.bf16.mxu1 %v25512_v42 }
0x190c   : > { %21811 = vmatpush3.bf16.msra.mxu1 %v25546_v39 }
0x190d   : > { %21812 = vmatprep.subr.bf16.mxu1 %v25512_v42 }
0x1910   : > { %21814 = vmatpush3.bf16.msra.mxu1 %v25569_v27 }
0x1911   : > { %21815 = vmatprep.subr.bf16.mxu1 %v25512_v42 }
0x1914   : > { %21817 = vmatpush3.bf16.msra.mxu1 %v25590_v30 }
0x1915   : > { %21818 = vmatprep.subr.bf16.mxu1 %v25512_v42 }
0x1918   : > { %21820 = vmatpush3.bf16.msra.mxu1 %v25591_v57 }
0x1919   : > { %21821 = vmatprep.subr.bf16.mxu1 %v25512_v42 }
0x191c   : > { %21823 = vmatpush3.bf16.msra.mxu1 %v25592_v17 }
0x191d   : > { %21824 = vmatprep.subr.bf16.mxu1 %v25512_v42 }
0x1920   : > { %21826 = vmatpush3.bf16.msra.mxu1 %v25593_v32 }
0x1921   : > { %21827 = vmatprep.subr.bf16.mxu1 %v25512_v42 }
0x1924   : > { %21829 = vmatpush3.bf16.msra.mxu1 %v25594_v11 }
0x1925   : > { %21938 = vmatprep.subr.bf16.mxu1 %v25512_v42 }
0x1927   : > { %19266 = vmatmul.mubr.f32.vlgmr.msra.gmra.mrb[22].mxu1 %v24837_v46 }
0x1928   : > { %21940 = vmatpush3.bf16.msra.mxu1 %v23422_v38  ;;  %19450 = vmatprep.mubr.msk.f32.mxu1 %vm22650_vm0, %v25510_v4 }
0x1929   : > { %21941 = vmatprep.subr.bf16.mxu1 %v25512_v42 }
0x192c   : > { %21943 = vmatpush3.bf16.msra.mxu1 %v23432_v8 }
0x192d   : > { %21944 = vmatprep.subr.bf16.mxu1 %v25512_v42 }
0x19fa   : > { %v11591_v53 = vpop.f32.mrb[22].mxu1 }
0x19fb   : > { %v22281_v35 = vadd.f32 %v24942_v13, %v11591_v53  ;;  %v19267_v58 = vpop.f32.mrb[23].mxu1  ;;  %v25658_v53 = vld [vmem:[#allocation30_spill] sm:$0xff] }
0x19fc   : > { %v25662_v58 = vld [vmem:[#allocation33_spill] sm:$0xff] }
0x19fd   : > { %v11595_v37 = vand.u32 2147483647, %v22281_v35 }
0x19ff   : > { %v11596_v6 = vadd.f32 1.0, %v11595_v37  ;;  %v25663_v37 = vld [vmem:[#allocation34_spill] sm:$0xff] }
0x1a01   : > { %22592 = vrcp.f32 %v11596_v6  ;;  %v25664_v6 = vld [vmem:[#allocation35_spill] sm:$0xff] }
0x1a0b   : > { %v22593_v56 = vpop.eup %22592 }
0x1a0c   : > { %v11598_v46 = vmul.f32 %v22593_v56, %v22281_v35  ;;  %v25661_v35 = vld [vmem:[#allocation41_spill] sm:$0xff]  ;;  %v25665_v56 = vld [vmem:[#allocation36_spill] sm:$0xff] }
0x1a0e   : > { %v11600_v60 = vsel %vm1108_vm2, %v11598_v46, 0  ;;  %v25666_v46 = vld [vmem:[#allocation37_spill] sm:$0xff] }
0x1a0f   : > { %v24946_v41 = vand.u32 4294901760, %v11600_v60 }
0x1a11   : > { %v11681_v43 = vsub.f32 %v11600_v60, %v24946_v41  ;;  %v25667_v60 = vld [vmem:[#allocation38_spill] sm:$0xff] }
0x1a13   : > { %v11682_v44 = vand.u32 4294901760, %v11681_v43 }
0x1a15   : > { %v11683_v0 = vsub.f32 %v11681_v43, %v11682_v44 }
0x1a17   : > { %v11684_v9 = vand.u32 4294901760, %v11683_v0  ;;  %v25660_v0 = vld [vmem:[#allocation32_spill] sm:$0xff] }
0x1a19   : > { %19295 = vmatmul.mubr.f32.vlgmr.msra.gmra.mrb[16].mxu0 %v11684_v9  ;;  %v25659_v9 = vld [vmem:[#allocation31_spill] sm:$0xff] }
0x1a1a   : > { %21850 = vmatpush3.bf16.msra.mxu0 %v25635_v52  ;;  %19323 = vmatprep.mubr.msk.f32.mxu0 %vm22650_vm0, %v25510_v4 }
0x1a1b   : > { %21851 = vmatprep.subr.bf16.mxu0 %v25512_v42 }
0x1a1e   : > { %21853 = vmatpush3.bf16.msra.mxu0 %v25636_v40 }
0x1a1f   : > { %21854 = vmatprep.subr.bf16.mxu0 %v25512_v42 }
0x1a22   : > { %21856 = vmatpush3.bf16.msra.mxu0 %v25637_v61 }
0x1a23   : > { %21857 = vmatprep.subr.bf16.mxu0 %v25512_v42 }
0x1a26   : > { %21859 = vmatpush3.bf16.msra.mxu0 %v25658_v53 }
0x1a27   : > { %21860 = vmatprep.subr.bf16.mxu0 %v25512_v42 }
0x1a2a   : > { %21862 = vmatpush3.bf16.msra.mxu0 %v25659_v9 }
0x1a2b   : > { %21863 = vmatprep.subr.bf16.mxu0 %v25512_v42 }
0x1a2e   : > { %21865 = vmatpush3.bf16.msra.mxu0 %v25660_v0 }
0x1a2f   : > { %19321 = vmatprep.subr.mxu0 %v25510_v4 }
0x1a32   : > { %19322 = vmatpush3.msra.mxu0 %v25661_v35 }
0x1a33   : > { %19324 = vmatmul.mubr.f32.vlgmr.msra.gmra.mrb[16].mxu0 %v24946_v41  ;;  %21866 = vmatprep.subr.bf16.mxu0 %v25512_v42 }
0x1a34   : > { %21868 = vmatpush3.bf16.msra.mxu0 %v25662_v58  ;;  %19352 = vmatprep.mubr.msk.f32.mxu0 %vm22650_vm0, %v25510_v4  ;;  %v25668_v58 = vld [vmem:[#allocation39_spill] sm:$0xff] }
0x1a35   : > { %21869 = vmatprep.subr.bf16.mxu0 %v25512_v42 }
0x1a38   : > { %21871 = vmatpush3.bf16.msra.mxu0 %v25663_v37 }
0x1a39   : > { %21872 = vmatprep.subr.bf16.mxu0 %v25512_v42 }
0x1a3c   : > { %21874 = vmatpush3.bf16.msra.mxu0 %v25664_v6 }
0x1a3d   : > { %21875 = vmatprep.subr.bf16.mxu0 %v25512_v42 }
0x1a40   : > { %21877 = vmatpush3.bf16.msra.mxu0 %v25665_v56  ;;  %v25675_v56 = vld [vmem:[#allocation40_spill] sm:$0xff] }
0x1a41   : > { %21878 = vmatprep.subr.bf16.mxu0 %v25512_v42 }
0x1a44   : > { %21880 = vmatpush3.bf16.msra.mxu0 %v25666_v46  ;;  %v25672_v46 = vld [vmem:[#allocation45_spill] sm:$0xff] }
0x1a45   : > { %21881 = vmatprep.subr.bf16.mxu0 %v25512_v42 }
0x1a48   : > { %21883 = vmatpush3.bf16.msra.mxu0 %v25667_v60  ;;  %v25671_v60 = vld [vmem:[#allocation44_spill] sm:$0xff] }
0x1a49   : > { %19350 = vmatprep.subr.mxu0 %v25510_v4 }
0x1a4c   : > { %19351 = vmatpush3.msra.mxu0 %v25668_v58  ;;  %v25670_v58 = vld [vmem:[#allocation43_spill] sm:$0xff] }
0x1a4d   : > { %19353 = vmatmul.mubr.f32.vlgmr.msra.gmra.mrb[16].mxu0 %v11681_v43  ;;  %21884 = vmatprep.subr.bf16.mxu0 %v25512_v42  ;;  %v25669_v43 = vld [vmem:[#allocation42_spill] sm:$0xff] }
0x1a4e   : > { %21886 = vmatpush3.bf16.msra.mxu0 %v23102_v5  ;;  %19381 = vmatprep.mubr.msk.f32.mxu0 %vm22650_vm0, %v25510_v4 }
0x1a4f   : > { %21887 = vmatprep.subr.bf16.mxu0 %v25512_v42 }
0x1a52   : > { %21889 = vmatpush3.bf16.msra.mxu0 %v23112_v10 }
0x1a53   : > { %21890 = vmatprep.subr.bf16.mxu0 %v25512_v42 }
0x1a56   : > { %21892 = vmatpush3.bf16.msra.mxu0 %v23122_v22 }
0x1a57   : > { %21893 = vmatprep.subr.bf16.mxu0 %v25512_v42 }
0x1a5a   : > { %21895 = vmatpush3.bf16.msra.mxu0 %v23132_v47 }
0x1a5b   : > { %21896 = vmatprep.subr.bf16.mxu0 %v25512_v42 }
0x1a5e   : > { %21898 = vmatpush3.bf16.msra.mxu0 %v23142_v62 }
0x1a5f   : > { %21899 = vmatprep.subr.bf16.mxu0 %v25512_v42 }
0x1a62   : > { %21901 = vmatpush3.bf16.msra.mxu0 %v23156_v45 }
0x1a63   : > { %19379 = vmatprep.subr.mxu0 %v25510_v4 }
0x1a66   : > { %19380 = vmatpush3.msra.mxu0 %v23167_v48 }
0x1a67   : > { %19382 = vmatmul.mubr.f32.vlgmr.msra.gmra.mrb[16].mxu0 %v11682_v44  ;;  %21902 = vmatprep.subr.bf16.mxu0 %v25512_v42  ;;  %v25673_v44 = vld [vmem:[#allocation46_spill] sm:$0xff] }
0x1a68   : > { %21904 = vmatpush3.bf16.msra.mxu0 %v25669_v43  ;;  %19410 = vmatprep.mubr.msk.f32.mxu0 %vm22650_vm0, %v25510_v4  ;;  %v25674_v43 = vld [vmem:[#allocation47_spill] sm:$0xff] }
0x1a69   : > { %21905 = vmatprep.subr.bf16.mxu0 %v25512_v42 }
0x1a6c   : > { %21907 = vmatpush3.bf16.msra.mxu0 %v25670_v58 }
0x1a6d   : > { %21908 = vmatprep.subr.bf16.mxu0 %v25512_v42 }
0x1a70   : > { %21910 = vmatpush3.bf16.msra.mxu0 %v25671_v60 }
0x1a71   : > { %21911 = vmatprep.subr.bf16.mxu0 %v25512_v42 }
0x1a74   : > { %21913 = vmatpush3.bf16.msra.mxu0 %v25672_v46 }
0x1a75   : > { %21914 = vmatprep.subr.bf16.mxu0 %v25512_v42 }
0x1a78   : > { %21916 = vmatpush3.bf16.msra.mxu0 %v25673_v44 }
0x1a79   : > { %21917 = vmatprep.subr.bf16.mxu0 %v25512_v42 }
0x1a7c   : > { %21919 = vmatpush3.bf16.msra.mxu0 %v25674_v43 }
0x1a7d   : > { %19408 = vmatprep.subr.mxu0 %v25510_v4 }
0x1a80   : > { %19409 = vmatpush3.msra.mxu0 %v25675_v56  ;;  %v25053_v56 = vld [vmem:[%s25367_s5] ss:$0 sm:$0xff] }
0x1a81   : > { %19411 = vmatmul.mubr.f32.vlgmr.msra.gmra.mrb[16].mxu0 %v24946_v41  ;;  %21920 = vmatprep.subr.bf16.mxu0 %v25512_v42 }
0x1a82   : > { %21922 = vmatpush3.bf16.msra.mxu0 %v23102_v5  ;;  %19439 = vmatprep.mubr.msk.f32.mxu0 %vm22650_vm0, %v25510_v4 }
0x1a83   : > { %21923 = vmatprep.subr.bf16.mxu0 %v25512_v42 }
0x1a86   : > { %21925 = vmatpush3.bf16.msra.mxu0 %v23112_v10 }
0x1a87   : > { %21926 = vmatprep.subr.bf16.mxu0 %v25512_v42 }
0x1a8a   : > { %21928 = vmatpush3.bf16.msra.mxu0 %v23122_v22 }
0x1a8b   : > { %21929 = vmatprep.subr.bf16.mxu0 %v25512_v42 }
0x1a8e   : > { %21931 = vmatpush3.bf16.msra.mxu0 %v23132_v47 }
0x1a8f   : > { %21932 = vmatprep.subr.bf16.mxu0 %v25512_v42 }
0x1a92   : > { %21934 = vmatpush3.bf16.msra.mxu0 %v23142_v62 }
0x1a93   : > { %21935 = vmatprep.subr.bf16.mxu0 %v25512_v42 }
0x1a96   : > { %21937 = vmatpush3.bf16.msra.mxu0 %v23156_v45 }
0x1a97   : > { %19437 = vmatprep.subr.mxu0 %v25510_v4 }
0x1a9a   : > { %19438 = vmatpush3.msra.mxu0 %v23167_v48 }
0x1a9b   : > { %19440 = vmatmul.mubr.f32.vlgmr.msra.gmra.mrb[16].mxu0 %v24946_v41  ;;  %21974 = vmatprep.subr.bf16.mxu0 %v25512_v42 }
0x1a9c   : > { %21976 = vmatpush3.bf16.msra.mxu0 %v25545_v59  ;;  %19540 = vmatprep.mubr.msk.f32.mxu0 %vm22650_vm0, %v25510_v4 }
0x1a9d   : > { %21977 = vmatprep.subr.bf16.mxu0 %v25512_v42 }
0x1aa0   : > { %21979 = vmatpush3.bf16.msra.mxu0 %v25546_v39 }
0x1aa1   : > { %21980 = vmatprep.subr.bf16.mxu0 %v25512_v42 }
0x1aa4   : > { %21982 = vmatpush3.bf16.msra.mxu0 %v25569_v27 }
0x1aa5   : > { %21983 = vmatprep.subr.bf16.mxu0 %v25512_v42 }
0x1aa8   : > { %21985 = vmatpush3.bf16.msra.mxu0 %v25590_v30 }
0x1aa9   : > { %21986 = vmatprep.subr.bf16.mxu0 %v25512_v42 }
0x1aac   : > { %21988 = vmatpush3.bf16.msra.mxu0 %v25591_v57 }
0x1aad   : > { %21989 = vmatprep.subr.bf16.mxu0 %v25512_v42 }
0x1ab0   : > { %21991 = vmatpush3.bf16.msra.mxu0 %v25592_v17 }
0x1ab1   : > { %21992 = vmatprep.subr.bf16.mxu0 %v25512_v42 }
0x1ab4   : > { %21994 = vmatpush3.bf16.msra.mxu0 %v25593_v32 }
0x1ab5   : > { %21995 = vmatprep.subr.bf16.mxu0 %v25512_v42 }
0x1ab8   : > { %21997 = vmatpush3.bf16.msra.mxu0 %v25594_v11 }
0x1ab9   : > { %21998 = vmatprep.subr.bf16.mxu0 %v25512_v42 }
0x1b6e   : > { %v12200_v41 = vpop.f32.mrb[16].mxu0 }
0x1b6f   : > { %v22282_v43 = vadd.f32 %v25053_v56, %v12200_v41  ;;  %v19441_v44 = vpop.f32.mrb[17].mxu0 }
0x1b70   : > { %v25696_v44 = vld [vmem:[#allocation40_spill] sm:$0xff] }
0x1b71   : > { %v12204_v46 = vand.u32 2147483647, %v22282_v43 }
0x1b73   : > { %v12205_v60 = vadd.f32 1.0, %v12204_v46 }
0x1b75   : > { %22594 = vrcp.f32 %v12205_v60 }
0x1b7f   : > { %v22595_v58 = vpop.eup %22594 }
0x1b80   : > { %v12207_v6 = vmul.f32 %v22595_v58, %v22282_v43 }
0x1b82   : > { %v12209_v37 = vsel %vm1722_vm4, %v12207_v6, 0 }
0x1b83   : > { %v12280_v35 = vand.u32 4294901760, %v12209_v37 }
0x1b85   : > { %v12281_v0 = vsub.f32 %v12209_v37, %v12280_v35 }
0x1b87   : > { %v12282_v9 = vand.u32 4294901760, %v12281_v0 }
0x1b89   : > { %v12283_v53 = vsub.f32 %v12281_v0, %v12282_v9 }
0x1b8b   : > { %v12284_v61 = vand.u32 4294901760, %v12283_v53  ;;  %v14624_v53 = vld [vmem:[%s22792_s12 + $0x38] sm:$0xff]  ;;  %s14627_s12 = sshll.u32 (%p22732_p6), %s22639_s29, 3 }
0x1b8c   : > { %s14457_s17 = scalar_lea.vmem (%p22732_p6), %s25370_s8, %s14627_s12 }
0x1b8d   : > { %19451 = vmatmul.mubr.f32.vlgmr.msra.gmra.mrb[24].mxu1 %v12284_v61 }
0x1b8e   : > { %21946 = vmatpush3.bf16.msra.mxu1 %v23436_v21  ;;  %19461 = vmatprep.mubr.msk.f32.mxu1 %vm22650_vm0, %v25510_v4 }
0x1b8f   : > { %21947 = vmatprep.subr.bf16.mxu1 %v25512_v42 }
0x1b92   : > { %21949 = vmatpush3.bf16.msra.mxu1 %v23438_v29 }
0x1b93   : > { %21950 = vmatprep.subr.bf16.mxu1 %v25512_v42 }
0x1b95   : > { %19462 = vmatmul.mubr.f32.vlgmr.msra.gmra.mrb[24].mxu1 %v12280_v35 }
0x1b96   : > { %21952 = vmatpush3.bf16.msra.mxu1 %v23440_v36  ;;  %19472 = vmatprep.mubr.msk.f32.mxu1 %vm22650_vm0, %v25510_v4 }
0x1b97   : > { %21953 = vmatprep.subr.bf16.mxu1 %v25512_v42 }
0x1b9a   : > { %21955 = vmatpush3.bf16.msra.mxu1 %v23442_v23 }
0x1b9b   : > { %21956 = vmatprep.subr.bf16.mxu1 %v25512_v42 }
0x1b9d   : > { %19473 = vmatmul.mubr.f32.vlgmr.msra.gmra.mrb[24].mxu1 %v12281_v0 }
0x1b9e   : > { %21958 = vmatpush3.bf16.msra.mxu1 %v23422_v38  ;;  %19483 = vmatprep.mubr.msk.f32.mxu1 %vm22650_vm0, %v25510_v4 }
0x1b9f   : > { %21959 = vmatprep.subr.bf16.mxu1 %v25512_v42 }
0x1ba2   : > { %21961 = vmatpush3.bf16.msra.mxu1 %v23432_v8 }
0x1ba3   : > { %21962 = vmatprep.subr.bf16.mxu1 %v25512_v42 }
0x1ba5   : > { %19484 = vmatmul.mubr.f32.vlgmr.msra.gmra.mrb[24].mxu1 %v12282_v9  ;;  %v25107_v9 = vld [vmem:[%s25369_s7] ss:$0 sm:$0xff] }
0x1ba6   : > { %21964 = vmatpush3.bf16.msra.mxu1 %v23444_v16  ;;  %19494 = vmatprep.mubr.msk.f32.mxu1 %vm22650_vm0, %v25510_v4 }
0x1ba7   : > { %21965 = vmatprep.subr.bf16.mxu1 %v25512_v42 }
0x1baa   : > { %21967 = vmatpush3.bf16.msra.mxu1 %v23446_v26 }
0x1bab   : > { %21968 = vmatprep.subr.bf16.mxu1 %v25512_v42 }
0x1bad   : > { %19495 = vmatmul.mubr.f32.vlgmr.msra.gmra.mrb[24].mxu1 %v12280_v35 }
0x1bae   : > { %21970 = vmatpush3.bf16.msra.mxu1 %v23422_v38  ;;  %19505 = vmatprep.mubr.msk.f32.mxu1 %vm22650_vm0, %v25510_v4 }
0x1baf   : > { %21971 = vmatprep.subr.bf16.mxu1 %v25512_v42 }
0x1bb2   : > { %21973 = vmatpush3.bf16.msra.mxu1 %v23432_v8 }
0x1bb3   : > { %22118 = vmatprep.subr.bf16.mxu1 %v25512_v42 }
0x1bb5   : > { %19506 = vmatmul.mubr.f32.vlgmr.msra.gmra.mrb[24].mxu1 %v12280_v35 }
0x1bb6   : > { %22120 = vmatpush3.bf16.msra.mxu1 %v23102_v5  ;;  %19744 = vmatprep.mubr.msk.f32.mxu1 %vm22650_vm0, %v25510_v4 }
0x1bb7   : > { %22121 = vmatprep.subr.bf16.mxu1 %v25512_v42 }
0x1bba   : > { %22123 = vmatpush3.bf16.msra.mxu1 %v23112_v10 }
0x1bbb   : > { %22124 = vmatprep.subr.bf16.mxu1 %v25512_v42 }
0x1bbe   : > { %22126 = vmatpush3.bf16.msra.mxu1 %v23122_v22 }
0x1bbf   : > { %22127 = vmatprep.subr.bf16.mxu1 %v25512_v42 }
0x1bc2   : > { %22129 = vmatpush3.bf16.msra.mxu1 %v23132_v47 }
0x1bc3   : > { %22130 = vmatprep.subr.bf16.mxu1 %v25512_v42 }
0x1bc6   : > { %22132 = vmatpush3.bf16.msra.mxu1 %v23142_v62 }
0x1bc7   : > { %22133 = vmatprep.subr.bf16.mxu1 %v25512_v42 }
0x1bca   : > { %22135 = vmatpush3.bf16.msra.mxu1 %v23156_v45 }
0x1bcb   : > { %19742 = vmatprep.subr.mxu1 %v25510_v4 }
0x1bce   : > { %19743 = vmatpush3.msra.mxu1 %v23167_v48 }
0x1bcf   : > { %22136 = vmatprep.subr.bf16.mxu1 %v25512_v42 }
0x1c88   : > { %v12692_v61 = vpop.f32.mrb[24].mxu1 }
0x1c89   : > { %v22283_v0 = vadd.f32 %v25107_v9, %v12692_v61  ;;  %v19507_v35 = vpop.f32.mrb[25].mxu1 }
0x1c8b   : > { %14623 = vst [vmem:[%s23509_s23 + $0x30] sm:$0xff] %v22283_v0  ;;  %v12700_v58 = vadd.f32 %v22283_v0, %v14624_v53 }
0x1c8d   : > { %v25111_v37 = vand.u32 4294901760, %v12700_v58 }
0x1c8f   : > { %v12783_v6 = vsub.f32 %v12700_v58, %v25111_v37 }
0x1c91   : > { %v12784_v46 = vand.u32 4294901760, %v12783_v6 }
0x1c93   : > { %v12785_v60 = vsub.f32 %v12783_v6, %v12784_v46 }
0x1c95   : > { %v12786_v43 = vand.u32 4294901760, %v12785_v60 }
0x1c97   : > { %19541 = vmatmul.mubr.f32.vlgmr.msra.gmra.mrb[18].mxu0 %v12786_v43 }
0x1c98   : > { %22000 = vmatpush3.bf16.msra.mxu0 %v22922_v49  ;;  %19575 = vmatprep.mubr.msk.f32.mxu0 %vm22650_vm0, %v25510_v4  ;;  %v25676_v49 = vld [vmem:[#allocation19_spill] sm:$0xff] }
0x1c99   : > { %22001 = vmatprep.subr.bf16.mxu0 %v25512_v42 }
0x1c9c   : > { %22003 = vmatpush3.bf16.msra.mxu0 %v22929_v1  ;;  %v25677_v1 = vld [vmem:[#allocation20_spill] sm:$0xff] }
0x1c9d   : > { %22004 = vmatprep.subr.bf16.mxu0 %v25512_v42 }
0x1ca0   : > { %22006 = vmatpush3.bf16.msra.mxu0 %v22935_v19 }
0x1ca1   : > { %22007 = vmatprep.subr.bf16.mxu0 %v25512_v42 }
0x1ca4   : > { %22009 = vmatpush3.bf16.msra.mxu0 %v22940_v24 }
0x1ca5   : > { %22010 = vmatprep.subr.bf16.mxu0 %v25512_v42 }
0x1ca8   : > { %22012 = vmatpush3.bf16.msra.mxu0 %v22948_v25 }
0x1ca9   : > { %22013 = vmatprep.subr.bf16.mxu0 %v25512_v42 }
0x1cac   : > { %22015 = vmatpush3.bf16.msra.mxu0 %v22953_v28 }
0x1cad   : > { %22016 = vmatprep.subr.bf16.mxu0 %v25512_v42 }
0x1cb0   : > { %22018 = vmatpush3.bf16.msra.mxu0 %v22959_v2 }
0x1cb1   : > { %22019 = vmatprep.subr.bf16.mxu0 %v25512_v42 }
0x1cb4   : > { %22021 = vmatpush3.bf16.msra.mxu0 %v22963_v14 }
0x1cb5   : > { %22022 = vmatprep.subr.bf16.mxu0 %v25512_v42 }
0x1cb7   : > { %19576 = vmatmul.mubr.f32.vlgmr.msra.gmra.mrb[18].mxu0 %v25111_v37 }
0x1cb8   : > { %22024 = vmatpush3.bf16.msra.mxu0 %v22969_v33  ;;  %19610 = vmatprep.mubr.msk.f32.mxu0 %vm22650_vm0, %v25510_v4 }
0x1cb9   : > { %22025 = vmatprep.subr.bf16.mxu0 %v25512_v42 }
0x1cbc   : > { %22027 = vmatpush3.bf16.msra.mxu0 %v22976_v34 }
0x1cbd   : > { %22028 = vmatprep.subr.bf16.mxu0 %v25512_v42 }
0x1cc0   : > { %22030 = vmatpush3.bf16.msra.mxu0 %v25611_v18  ;;  %v25681_v18 = vld [vmem:[#allocation32_spill] sm:$0xff] }
0x1cc1   : > { %22031 = vmatprep.subr.bf16.mxu0 %v25512_v42 }
0x1cc4   : > { %22033 = vmatpush3.bf16.msra.mxu0 %v25612_v3  ;;  %v25682_v3 = vld [vmem:[#allocation41_spill] sm:$0xff] }
0x1cc5   : > { %22034 = vmatprep.subr.bf16.mxu0 %v25512_v42 }
0x1cc8   : > { %22036 = vmatpush3.bf16.msra.mxu0 %v25613_v12  ;;  %v25683_v12 = vld [vmem:[#allocation33_spill] sm:$0xff] }
0x1cc9   : > { %22037 = vmatprep.subr.bf16.mxu0 %v25512_v42 }
0x1ccc   : > { %22039 = vmatpush3.bf16.msra.mxu0 %v25614_v31  ;;  %v25684_v31 = vld [vmem:[#allocation34_spill] sm:$0xff] }
0x1ccd   : > { %22040 = vmatprep.subr.bf16.mxu0 %v25512_v42 }
0x1cd0   : > { %22042 = vmatpush3.bf16.msra.mxu0 %v25615_v54  ;;  %v25685_v54 = vld [vmem:[#allocation35_spill] sm:$0xff] }
0x1cd1   : > { %22043 = vmatprep.subr.bf16.mxu0 %v25512_v42 }
0x1cd4   : > { %22045 = vmatpush3.bf16.msra.mxu0 %v25616_v15  ;;  %v25686_v15 = vld [vmem:[#allocation36_spill] sm:$0xff] }
0x1cd5   : > { %22046 = vmatprep.subr.bf16.mxu0 %v25512_v42 }
0x1cd7   : > { %19611 = vmatmul.mubr.f32.vlgmr.msra.gmra.mrb[18].mxu0 %v12783_v6 }
0x1cd8   : > { %22048 = vmatpush3.bf16.msra.mxu0 %v25545_v59  ;;  %19645 = vmatprep.mubr.msk.f32.mxu0 %vm22650_vm0, %v25510_v4 }
0x1cd9   : > { %22049 = vmatprep.subr.bf16.mxu0 %v25512_v42 }
0x1cdc   : > { %22051 = vmatpush3.bf16.msra.mxu0 %v25546_v39 }
0x1cdd   : > { %22052 = vmatprep.subr.bf16.mxu0 %v25512_v42 }
0x1ce0   : > { %22054 = vmatpush3.bf16.msra.mxu0 %v25569_v27 }
0x1ce1   : > { %22055 = vmatprep.subr.bf16.mxu0 %v25512_v42 }
0x1ce4   : > { %22057 = vmatpush3.bf16.msra.mxu0 %v25590_v30 }
0x1ce5   : > { %22058 = vmatprep.subr.bf16.mxu0 %v25512_v42 }
0x1ce8   : > { %22060 = vmatpush3.bf16.msra.mxu0 %v25591_v57 }
0x1ce9   : > { %22061 = vmatprep.subr.bf16.mxu0 %v25512_v42 }
0x1cec   : > { %22063 = vmatpush3.bf16.msra.mxu0 %v25592_v17 }
0x1ced   : > { %22064 = vmatprep.subr.bf16.mxu0 %v25512_v42 }
0x1cf0   : > { %22066 = vmatpush3.bf16.msra.mxu0 %v25593_v32 }
0x1cf1   : > { %22067 = vmatprep.subr.bf16.mxu0 %v25512_v42 }
0x1cf4   : > { %22069 = vmatpush3.bf16.msra.mxu0 %v25594_v11 }
0x1cf5   : > { %22070 = vmatprep.subr.bf16.mxu0 %v25512_v42 }
0x1cf7   : > { %19646 = vmatmul.mubr.f32.vlgmr.msra.gmra.mrb[18].mxu0 %v12784_v46 }
0x1cf8   : > { %22072 = vmatpush3.bf16.msra.mxu0 %v25617_v51  ;;  %19680 = vmatprep.mubr.msk.f32.mxu0 %vm22650_vm0, %v25510_v4  ;;  %v25687_v51 = vld [vmem:[#allocation37_spill] sm:$0xff] }
0x1cf9   : > { %22073 = vmatprep.subr.bf16.mxu0 %v25512_v42 }
0x1cfc   : > { %22075 = vmatpush3.bf16.msra.mxu0 %v25618_v55  ;;  %v25688_v55 = vld [vmem:[#allocation38_spill] sm:$0xff] }
0x1cfd   : > { %22076 = vmatprep.subr.bf16.mxu0 %v25512_v42 }
0x1d00   : > { %22078 = vmatpush3.bf16.msra.mxu0 %v25619_v63  ;;  %v25689_v63 = vld [vmem:[#allocation39_spill] sm:$0xff] }
0x1d01   : > { %22079 = vmatprep.subr.bf16.mxu0 %v25512_v42 }
0x1d04   : > { %22081 = vmatpush3.bf16.msra.mxu0 %v25620_v20  ;;  %v25690_v20 = vld [vmem:[#allocation42_spill] sm:$0xff] }
0x1d05   : > { %22082 = vmatprep.subr.bf16.mxu0 %v25512_v42 }
0x1d08   : > { %22084 = vmatpush3.bf16.msra.mxu0 %v25621_v7  ;;  %v25691_v7 = vld [vmem:[#allocation43_spill] sm:$0xff] }
0x1d09   : > { %22085 = vmatprep.subr.bf16.mxu0 %v25512_v42 }
0x1d0c   : > { %22087 = vmatpush3.bf16.msra.mxu0 %v25655_v50  ;;  %v25694_v50 = vld [vmem:[#allocation46_spill] sm:$0xff] }
0x1d0d   : > { %22088 = vmatprep.subr.bf16.mxu0 %v25512_v42 }
0x1d10   : > { %22090 = vmatpush3.bf16.msra.mxu0 %v25676_v49 }
0x1d11   : > { %22091 = vmatprep.subr.bf16.mxu0 %v25512_v42 }
0x1d14   : > { %22093 = vmatpush3.bf16.msra.mxu0 %v25677_v1 }
0x1d15   : > { %22094 = vmatprep.subr.bf16.mxu0 %v25512_v42 }
0x1d17   : > { %19681 = vmatmul.mubr.f32.vlgmr.msra.gmra.mrb[18].mxu0 %v25111_v37 }
0x1d18   : > { %22096 = vmatpush3.bf16.msra.mxu0 %v25545_v59  ;;  %19715 = vmatprep.mubr.msk.f32.mxu0 %vm22650_vm0, %v25510_v4 }
0x1d19   : > { %22097 = vmatprep.subr.bf16.mxu0 %v25512_v42 }
0x1d1c   : > { %22099 = vmatpush3.bf16.msra.mxu0 %v25546_v39 }
0x1d1d   : > { %22100 = vmatprep.subr.bf16.mxu0 %v25512_v42 }
0x1d20   : > { %22102 = vmatpush3.bf16.msra.mxu0 %v25569_v27 }
0x1d21   : > { %22103 = vmatprep.subr.bf16.mxu0 %v25512_v42 }
0x1d24   : > { %22105 = vmatpush3.bf16.msra.mxu0 %v25590_v30 }
0x1d25   : > { %22106 = vmatprep.subr.bf16.mxu0 %v25512_v42 }
0x1d28   : > { %22108 = vmatpush3.bf16.msra.mxu0 %v25591_v57 }
0x1d29   : > { %22109 = vmatprep.subr.bf16.mxu0 %v25512_v42 }
0x1d2c   : > { %22111 = vmatpush3.bf16.msra.mxu0 %v25592_v17  ;;  %v25678_v17 = vld [vmem:[#allocation29_spill] sm:$0xff] }
0x1d2d   : > { %22112 = vmatprep.subr.bf16.mxu0 %v25512_v42 }
0x1d30   : > { %22114 = vmatpush3.bf16.msra.mxu0 %v25593_v32  ;;  %v25679_v32 = vld [vmem:[#allocation30_spill] sm:$0xff] }
0x1d31   : > { %22115 = vmatprep.subr.bf16.mxu0 %v25512_v42 }
0x1d34   : > { %22117 = vmatpush3.bf16.msra.mxu0 %v25594_v11  ;;  %v25680_v11 = vld [vmem:[#allocation31_spill] sm:$0xff] }
0x1d35   : > { %22226 = vmatprep.subr.bf16.mxu0 %v25512_v42 }
0x1d37   : > { %19716 = vmatmul.mubr.f32.vlgmr.msra.gmra.mrb[18].mxu0 %v25111_v37 }
0x1d38   : > { %22228 = vmatpush3.bf16.msra.mxu0 %v23422_v38  ;;  %19900 = vmatprep.mubr.msk.f32.mxu0 %vm22650_vm0, %v25510_v4 }
0x1d39   : > { %22229 = vmatprep.subr.bf16.mxu0 %v25512_v42 }
0x1d3c   : > { %22231 = vmatpush3.bf16.msra.mxu0 %v23432_v8 }
0x1d3d   : > { %22232 = vmatprep.subr.bf16.mxu0 %v25512_v42 }
0x1e0a   : > { %v13338_v19 = vpop.f32.mrb[18].mxu0 }
0x1e0b   : > { %v22284_v24 = vadd.f32 %v24942_v13, %v13338_v19  ;;  %v19717_v25 = vpop.f32.mrb[19].mxu0  ;;  %v25695_v13 = vld [vmem:[#allocation47_spill] sm:$0xff] }
0x1e0d   : > { %v13342_v28 = vand.u32 2147483647, %v22284_v24 }
0x1e0f   : > { %v13343_v2 = vadd.f32 1.0, %v13342_v28 }
0x1e11   : > { %22596 = vrcp.f32 %v13343_v2 }
0x1e1b   : > { %v22597_v14 = vpop.eup %22596 }
0x1e1c   : > { %v13345_v33 = vmul.f32 %v22597_v14, %v22284_v24 }
0x1e1e   : > { %v13347_v34 = vsel %vm1108_vm2, %v13345_v33, 0 }
0x1e1f   : > { %v25215_v59 = vand.u32 4294901760, %v13347_v34 }
0x1e21   : > { %v13428_v39 = vsub.f32 %v13347_v34, %v25215_v59 }
0x1e23   : > { %v13429_v27 = vand.u32 4294901760, %v13428_v39 }
0x1e25   : > { %v13430_v30 = vsub.f32 %v13428_v39, %v13429_v27 }
0x1e27   : > { %v13431_v57 = vand.u32 4294901760, %v13430_v30 }
0x1e29   : > { %19745 = vmatmul.mubr.f32.vlgmr.msra.gmra.mrb[26].mxu1 %v13431_v57 }
0x1e2a   : > { %22138 = vmatpush3.bf16.msra.mxu1 %v25635_v52  ;;  %19773 = vmatprep.mubr.msk.f32.mxu1 %vm22650_vm0, %v25510_v4  ;;  %v25692_v52 = vld [vmem:[#allocation44_spill] sm:$0xff] }
0x1e2b   : > { %22139 = vmatprep.subr.bf16.mxu1 %v25512_v42 }
0x1e2e   : > { %22141 = vmatpush3.bf16.msra.mxu1 %v25636_v40  ;;  %v25693_v40 = vld [vmem:[#allocation45_spill] sm:$0xff] }
0x1e2f   : > { %22142 = vmatprep.subr.bf16.mxu1 %v25512_v42 }
0x1e32   : > { %22144 = vmatpush3.bf16.msra.mxu1 %v25678_v17 }
0x1e33   : > { %22145 = vmatprep.subr.bf16.mxu1 %v25512_v42 }
0x1e36   : > { %22147 = vmatpush3.bf16.msra.mxu1 %v25679_v32 }
0x1e37   : > { %22148 = vmatprep.subr.bf16.mxu1 %v25512_v42 }
0x1e3a   : > { %22150 = vmatpush3.bf16.msra.mxu1 %v25680_v11 }
0x1e3b   : > { %22151 = vmatprep.subr.bf16.mxu1 %v25512_v42 }
0x1e3e   : > { %22153 = vmatpush3.bf16.msra.mxu1 %v25681_v18 }
0x1e3f   : > { %19771 = vmatprep.subr.mxu1 %v25510_v4 }
0x1e42   : > { %19772 = vmatpush3.msra.mxu1 %v25682_v3 }
0x1e43   : > { %19774 = vmatmul.mubr.f32.vlgmr.msra.gmra.mrb[26].mxu1 %v25215_v59  ;;  %22154 = vmatprep.subr.bf16.mxu1 %v25512_v42 }
0x1e44   : > { %22156 = vmatpush3.bf16.msra.mxu1 %v25683_v12  ;;  %19802 = vmatprep.mubr.msk.f32.mxu1 %vm22650_vm0, %v25510_v4 }
0x1e45   : > { %22157 = vmatprep.subr.bf16.mxu1 %v25512_v42 }
0x1e48   : > { %22159 = vmatpush3.bf16.msra.mxu1 %v25684_v31 }
0x1e49   : > { %22160 = vmatprep.subr.bf16.mxu1 %v25512_v42 }
0x1e4c   : > { %22162 = vmatpush3.bf16.msra.mxu1 %v25685_v54 }
0x1e4d   : > { %22163 = vmatprep.subr.bf16.mxu1 %v25512_v42 }
0x1e50   : > { %22165 = vmatpush3.bf16.msra.mxu1 %v25686_v15 }
0x1e51   : > { %22166 = vmatprep.subr.bf16.mxu1 %v25512_v42 }
0x1e54   : > { %22168 = vmatpush3.bf16.msra.mxu1 %v25687_v51 }
0x1e55   : > { %22169 = vmatprep.subr.bf16.mxu1 %v25512_v42 }
0x1e58   : > { %22171 = vmatpush3.bf16.msra.mxu1 %v25688_v55 }
0x1e59   : > { %19800 = vmatprep.subr.mxu1 %v25510_v4 }
0x1e5c   : > { %19801 = vmatpush3.msra.mxu1 %v25689_v63 }
0x1e5d   : > { %19803 = vmatmul.mubr.f32.vlgmr.msra.gmra.mrb[26].mxu1 %v13428_v39  ;;  %22172 = vmatprep.subr.bf16.mxu1 %v25512_v42 }
0x1e5e   : > { %22174 = vmatpush3.bf16.msra.mxu1 %v23102_v5  ;;  %19831 = vmatprep.mubr.msk.f32.mxu1 %vm22650_vm0, %v25510_v4 }
0x1e5f   : > { %22175 = vmatprep.subr.bf16.mxu1 %v25512_v42 }
0x1e62   : > { %22177 = vmatpush3.bf16.msra.mxu1 %v23112_v10 }
0x1e63   : > { %22178 = vmatprep.subr.bf16.mxu1 %v25512_v42 }
0x1e66   : > { %22180 = vmatpush3.bf16.msra.mxu1 %v23122_v22 }
0x1e67   : > { %22181 = vmatprep.subr.bf16.mxu1 %v25512_v42 }
0x1e6a   : > { %22183 = vmatpush3.bf16.msra.mxu1 %v23132_v47 }
0x1e6b   : > { %22184 = vmatprep.subr.bf16.mxu1 %v25512_v42 }
0x1e6e   : > { %22186 = vmatpush3.bf16.msra.mxu1 %v23142_v62 }
0x1e6f   : > { %22187 = vmatprep.subr.bf16.mxu1 %v25512_v42 }
0x1e72   : > { %22189 = vmatpush3.bf16.msra.mxu1 %v23156_v45 }
0x1e73   : > { %19829 = vmatprep.subr.mxu1 %v25510_v4 }
0x1e76   : > { %19830 = vmatpush3.msra.mxu1 %v23167_v48 }
0x1e77   : > { %19832 = vmatmul.mubr.f32.vlgmr.msra.gmra.mrb[26].mxu1 %v13429_v27  ;;  %22190 = vmatprep.subr.bf16.mxu1 %v25512_v42 }
0x1e78   : > { %22192 = vmatpush3.bf16.msra.mxu1 %v25690_v20  ;;  %19860 = vmatprep.mubr.msk.f32.mxu1 %vm22650_vm0, %v25510_v4 }
0x1e79   : > { %22193 = vmatprep.subr.bf16.mxu1 %v25512_v42 }
0x1e7c   : > { %22195 = vmatpush3.bf16.msra.mxu1 %v25691_v7 }
0x1e7d   : > { %22196 = vmatprep.subr.bf16.mxu1 %v25512_v42 }
0x1e80   : > { %22198 = vmatpush3.bf16.msra.mxu1 %v25692_v52 }
0x1e81   : > { %22199 = vmatprep.subr.bf16.mxu1 %v25512_v42 }
0x1e84   : > { %22201 = vmatpush3.bf16.msra.mxu1 %v25693_v40 }
0x1e85   : > { %22202 = vmatprep.subr.bf16.mxu1 %v25512_v42 }
0x1e88   : > { %22204 = vmatpush3.bf16.msra.mxu1 %v25694_v50 }
0x1e89   : > { %22205 = vmatprep.subr.bf16.mxu1 %v25512_v42 }
0x1e8c   : > { %22207 = vmatpush3.bf16.msra.mxu1 %v25695_v13 }
0x1e8d   : > { %19858 = vmatprep.subr.mxu1 %v25510_v4 }
0x1e90   : > { %19859 = vmatpush3.msra.mxu1 %v25696_v44 }
0x1e91   : > { %19861 = vmatmul.mubr.f32.vlgmr.msra.gmra.mrb[26].mxu1 %v25215_v59  ;;  %22208 = vmatprep.subr.bf16.mxu1 %v25512_v42 }
0x1e92   : > { %22210 = vmatpush3.bf16.msra.mxu1 %v23102_v5  ;;  %19889 = vmatprep.mubr.msk.f32.mxu1 %vm22650_vm0, %v25510_v4 }
0x1e93   : > { %22211 = vmatprep.subr.bf16.mxu1 %v25512_v42 }
0x1e96   : > { %22213 = vmatpush3.bf16.msra.mxu1 %v23112_v10 }
0x1e97   : > { %22214 = vmatprep.subr.bf16.mxu1 %v25512_v42 }
0x1e9a   : > { %22216 = vmatpush3.bf16.msra.mxu1 %v23122_v22 }
0x1e9b   : > { %22217 = vmatprep.subr.bf16.mxu1 %v25512_v42 }
0x1e9e   : > { %22219 = vmatpush3.bf16.msra.mxu1 %v23132_v47 }
0x1e9f   : > { %22220 = vmatprep.subr.bf16.mxu1 %v25512_v42 }
0x1ea2   : > { %22222 = vmatpush3.bf16.msra.mxu1 %v23142_v62 }
0x1ea3   : > { %22223 = vmatprep.subr.bf16.mxu1 %v25512_v42 }
0x1ea6   : > { %22225 = vmatpush3.bf16.msra.mxu1 %v23156_v45 }
0x1ea7   : > { %19887 = vmatprep.subr.mxu1 %v25510_v4 }
0x1eaa   : > { %19888 = vmatpush3.msra.mxu1 %v23167_v48 }
0x1eab   : > { %19890 = vmatmul.mubr.f32.vlgmr.msra.gmra.mrb[26].mxu1 %v25215_v59 }
0x1f7e   : > { %v13947_v5 = vpop.f32.mrb[26].mxu1 }
0x1f7f   : > { %v22285_v10 = vadd.f32 %v25053_v56, %v13947_v5  ;;  %v19891_v22 = vpop.f32.mrb[27].mxu1 }
0x1f81   : > { %v13951_v41 = vand.u32 2147483647, %v22285_v10 }
0x1f83   : > { %v13952_v47 = vadd.f32 1.0, %v13951_v41 }
0x1f85   : > { %22598 = vrcp.f32 %v13952_v47 }
0x1f8f   : > { %v22599_v61 = vpop.eup %22598 }
0x1f90   : > { %v13954_v53 = vmul.f32 %v22599_v61, %v22285_v10 }
0x1f92   : > { %v13956_v62 = vsel %vm1722_vm4, %v13954_v53, 0 }
0x1f93   : > { %v14027_v0 = vand.u32 4294901760, %v13956_v62 }
0x1f95   : > { %v14028_v35 = vsub.f32 %v13956_v62, %v14027_v0 }
0x1f97   : > { %v14029_v45 = vand.u32 4294901760, %v14028_v35 }
0x1f99   : > { %v14030_v58 = vsub.f32 %v14028_v35, %v14029_v45 }
0x1f9b   : > { %v14031_v37 = vand.u32 4294901760, %v14030_v58 }
0x1f9d   : > { %19901 = vmatmul.mubr.f32.vlgmr.msra.gmra.mrb[20].mxu0 %v14031_v37 }
0x1f9e   : > { %22234 = vmatpush3.bf16.msra.mxu0 %v23436_v21  ;;  %19911 = vmatprep.mubr.msk.f32.mxu0 %vm22650_vm0, %v25510_v4  ;;  %v14503_v21 = vld [vmem:[%s23509_s23 + $0x10] sm:$0xff] (%p22732_p6) }
0x1f9f   : > { %22235 = vmatprep.subr.bf16.mxu0 %v25512_v42  ;;  %14504 = vst [vmem:[%s14457_s17 + $0x20] sm:$0xff] (%p22732_p6), %v14503_v21 }
0x1fa2   : > { %22237 = vmatpush3.bf16.msra.mxu0 %v23438_v29 }
0x1fa3   : > { %22238 = vmatprep.subr.bf16.mxu0 %v25512_v42 }
0x1fa5   : > { %19912 = vmatmul.mubr.f32.vlgmr.msra.gmra.mrb[20].mxu0 %v14027_v0 }
0x1fa6   : > { %22240 = vmatpush3.bf16.msra.mxu0 %v23440_v36  ;;  %19922 = vmatprep.mubr.msk.f32.mxu0 %vm22650_vm0, %v25510_v4 }
0x1fa7   : > { %22241 = vmatprep.subr.bf16.mxu0 %v25512_v42 }
0x1faa   : > { %22243 = vmatpush3.bf16.msra.mxu0 %v23442_v23  ;;  %v14509_v23 = vld [vmem:[%s23509_s23 + $0x28] sm:$0xff] (%p22732_p6) }
0x1fab   : > { %22244 = vmatprep.subr.bf16.mxu0 %v25512_v42  ;;  %14510 = vst [vmem:[%s14457_s17 + $0x50] sm:$0xff] (%p22732_p6), %v14509_v23 }
0x1fad   : > { %19923 = vmatmul.mubr.f32.vlgmr.msra.gmra.mrb[20].mxu0 %v14028_v35 }
0x1fae   : > { %22246 = vmatpush3.bf16.msra.mxu0 %v23422_v38  ;;  %19933 = vmatprep.mubr.msk.f32.mxu0 %vm22650_vm0, %v25510_v4 }
0x1faf   : > { %22247 = vmatprep.subr.bf16.mxu0 %v25512_v42 }
0x1fb2   : > { %22249 = vmatpush3.bf16.msra.mxu0 %v23432_v8 }
0x1fb3   : > { %22250 = vmatprep.subr.bf16.mxu0 %v25512_v42 }
0x1fb5   : > { %19934 = vmatmul.mubr.f32.vlgmr.msra.gmra.mrb[20].mxu0 %v14029_v45 }
0x1fb6   : > { %22252 = vmatpush3.bf16.msra.mxu0 %v23444_v16  ;;  %19944 = vmatprep.mubr.msk.f32.mxu0 %vm22650_vm0, %v25510_v4  ;;  %v14511_v16 = vld [vmem:[%s23509_s23 + $0x30] sm:$0xff] (%p22732_p6) }
0x1fb7   : > { %22253 = vmatprep.subr.bf16.mxu0 %v25512_v42  ;;  %14512 = vst [vmem:[%s14457_s17 + $0x60] sm:$0xff] (%p22732_p6), %v14511_v16 }
0x1fba   : > { %22255 = vmatpush3.bf16.msra.mxu0 %v23446_v26 }
0x1fbb   : > { %22256 = vmatprep.subr.bf16.mxu0 %v25512_v42 }
0x1fbd   : > { %19945 = vmatmul.mubr.f32.vlgmr.msra.gmra.mrb[20].mxu0 %v14027_v0 }
0x1fbe   : > { %22258 = vmatpush3.bf16.msra.mxu0 %v23422_v38  ;;  %19955 = vmatprep.mubr.msk.f32.mxu0 %vm22650_vm0, %v25510_v4  ;;  %v14501_v4 = vld [vmem:[%s23509_s23 + $0x8] sm:$0xff] (%p22732_p6)  ;;  %v14505_v38 = vld [vmem:[%s23509_s23 + $0x18] sm:$0xff] (%p22732_p6) }
0x1fbf   : > { %22259 = vmatprep.subr.bf16.mxu0 %v25512_v42  ;;  %v14499_v42 = vld [vmem:[%s23509_s23] sm:$0xff] (%p22732_p6)  ;;  %14502 = vst [vmem:[%s14457_s17 + $0x10] sm:$0xff] (%p22732_p6), %v14501_v4  ;;  %14506 = vst [vmem:[%s14457_s17 + $0x30] sm:$0xff] (%p22732_p6), %v14505_v38 }
0x1fc0   : > { %14500 = vst [vmem:[%s14457_s17] sm:$0xff] (%p22732_p6), %v14499_v42 }
0x1fc2   : > { %22261 = vmatpush3.bf16.msra.mxu0 %v23432_v8  ;;  %v14507_v8 = vld [vmem:[%s23509_s23 + $0x20] sm:$0xff] (%p22732_p6) }
0x1fc3   : > { %14508 = vst [vmem:[%s14457_s17 + $0x40] sm:$0xff] (%p22732_p6), %v14507_v8 }
0x1fc5   : > { %19956 = vmatmul.mubr.f32.vlgmr.msra.gmra.mrb[20].mxu0 %v14027_v0 }
0x2095   : > { %14452 = sbr.rel (!%p22732_p6) target bundleno = 8356 (0x20a4), region = 98 }
0x2098   : > { %v14439_v48 = vpop.f32.mrb[20].mxu0 }
0x2099   : > { %v22286_v36 = vadd.f32 %v25107_v9, %v14439_v48  ;;  %v19957_v29 = vpop.f32.mrb[21].mxu0 }
0x209b   : > { %14625 = vst [vmem:[%s23509_s23 + $0x38] sm:$0xff] %v22286_v36 }
0x20a2   : > { %v14513_v26 = vld [vmem:[%s23509_s23 + $0x38] sm:$0xff] }
0x20a3   : > { %14514 = vst [vmem:[%s14457_s17 + $0x70] sm:$0xff] %v14513_v26 }
0x20a4 PF: > { %s18_s9 = sadd.s32 1, %s22647_s9   ;;  %s25697_s27 = smov %s22635_s28 }
0x20a5   : > { %p15_p12 = scmp.ge.s32.totalorder %s18_s9, 4   ;;  %s25698_s28 = smov %s22737_s15 }
0x20a6   : > { %s25699_s29 = smov %s22643_s30  ;;  %s25700_s30 = smov %s25702_s10 }
0x20a7   :  { %17 = sbr.rel (!%p15_p12) target bundleno = 3 (0x3), region = 184 }

</bundles_post_ra>
